<compile_context>
chip_gen: v7x
topology: tpu7x:2x2x1
jax: 0.10.0
libtpu: 0.0.40
codegen_flags: <defaults>
</compile_context>

<pallas_src>
import functools
import math

import jax
import jax.numpy as jnp
from jax import lax
from jax.experimental import pallas as pl
from jax.experimental.pallas import tpu as pltpu

DIM = 128
NHEADS = 4
HEAD_SIZE = DIM // NHEADS
BLOCK_SIZE = 64  # max sequence length (causal-mask buffer size in the torch module)


def _causal_attn_kernel(x_ref, wqkv_ref, wproj_ref, o_ref, y_ref, *,
                        seq_len, batch_block):
    """One grid step = `batch_block` batch elements, flattened on the row axis.

    x_ref    : (batch_block*T, C)   bf16  VMEM
    wqkv_ref : (C, 3C)              bf16  VMEM (resident across grid; Q cols pre-scaled)
    wproj_ref: (C, C)               bf16  VMEM (resident across grid)
    o_ref    : (batch_block*T, C)   f32   VMEM
    y_ref    : (batch_block*T, C)   bf16  VMEM scratch (per-head attention outputs)
    """
    bb, T = batch_block, seq_len
    C = x_ref.shape[-1]
    hd = C // NHEADS

    x = x_ref[...]                                            # (rows, C) bf16

    # Single fused QKV projection on the MXU: (rows,128) @ (128,384), f32 acc.
    qkv = jnp.dot(x, wqkv_ref[...],
                  preferred_element_type=jnp.float32)         # (rows, 3C) f32
    qkv = qkv.astype(jnp.bfloat16)                            # one cast pass

    # Additive causal mask (0 on/below diagonal, -1e30 above), built & broadcast once.
    row = lax.broadcasted_iota(jnp.int32, (T, T), 0)
    col = lax.broadcasted_iota(jnp.int32, (T, T), 1)
    mask_bias = jnp.where(col <= row, 0.0, -1e30).astype(jnp.float32)  # (T, T)
    mask_b = jnp.broadcast_to(mask_bias, (bb, T, T))          # hoisted out of loop

    for h in range(NHEADS):  # static unroll over 4 heads
        lo = h * hd
        # Static 32-lane per-head slices of the fused QKV result.
        q = qkv[:, lo:lo + hd].reshape(bb, T, hd)             # scale already in W
        k = qkv[:, C + lo:C + lo + hd].reshape(bb, T, hd)
        v = qkv[:, 2 * C + lo:2 * C + lo + hd].reshape(bb, T, hd)

        # Scores (+ additive causal mask) and numerically stable softmax.
        s = jnp.einsum('btd,bsd->bts', q, k,
                       preferred_element_type=jnp.float32)    # (bb, T, T) f32
        s = s + mask_b
        m = jnp.max(s, axis=-1, keepdims=True)
        p = jnp.exp(s - m)
        denom = jnp.sum(p, axis=-1, keepdims=True)
        p = (p * pl.reciprocal(denom, approx=True)).astype(jnp.bfloat16)

        yh = jnp.einsum('bts,bsd->btd', p, v,
                        preferred_element_type=jnp.float32)   # (bb, T, hd) f32
        # Store this head's output at its static column offset (cheap 32-lane store).
        y_ref[:, lo:lo + hd] = yh.reshape(bb * T, hd).astype(jnp.bfloat16)

    # One dense (rows,128) @ (128,128) output projection, written straight to o_ref.
    o_ref[...] = jnp.dot(y_ref[...], wproj_ref[...],
                         preferred_element_type=jnp.float32).astype(o_ref.dtype)


def causal_self_attention(x, w_qkv, w_proj, *, batch_block=None):
    """x: (B, T, C) f32; w_qkv: (C, 3C); w_proj: (C, C)  (both stored as x-in/out,
    i.e. PyTorch weight.T).  Returns (B, T, C) in x.dtype.

    batch_block=None collapses the whole batch into one grid step (best on the
    single-TensorCore v5e/v6e at small B).  On v7x, or once B grows, pass a
    batch_block giving ~512-2048 rows per step so the DMA pipeline has >=3
    steps and per-step VMEM stays inside the 64 MiB v7x budget.
    """
    B, T, C = x.shape
    assert C == DIM and C % NHEADS == 0 and T <= BLOCK_SIZE
    hd = C // NHEADS
    if batch_block is None:
        batch_block = B
    assert B % batch_block == 0

    # Flatten batch/seq into one lane-dense 2D slab; cast operands to bf16.
    x2 = x.reshape(B * T, C).astype(jnp.bfloat16)
    # Fold the 1/sqrt(hd) attention scale into the Q weight columns (free at prep time),
    # keep the natural lane-dense (C, 3C) layout (q/k/v contiguous 128-col blocks).
    scale = 1.0 / math.sqrt(hd)
    wqkv_b = w_qkv.at[:, :C].multiply(scale).astype(jnp.bfloat16)
    wproj_b = w_proj.astype(jnp.bfloat16)

    rows = batch_block * T
    kernel = functools.partial(_causal_attn_kernel,
                               seq_len=T, batch_block=batch_block)

    out2 = pl.pallas_call(
        kernel,
        out_shape=jax.ShapeDtypeStruct((B * T, C), x.dtype),
        grid_spec=pltpu.PrefetchScalarGridSpec(
            num_scalar_prefetch=0,
            grid=(B // batch_block,),
            in_specs=[
                pl.BlockSpec((rows, C), lambda i: (i, 0)),
                pl.BlockSpec((C, 3 * C), lambda i: (0, 0)),
                pl.BlockSpec((C, C), lambda i: (0, 0)),
            ],
            out_specs=pl.BlockSpec((rows, C), lambda i: (i, 0)),
            scratch_shapes=[pltpu.VMEM((rows, C), jnp.bfloat16)],
        ),
        compiler_params=pltpu.CompilerParams(
            dimension_semantics=("parallel",)),
    )(x2, wqkv_b, wproj_b)

    return out2.reshape(B, T, C)


def _reference(x, w_qkv, w_proj):
    """Pure-JAX f32 reference mirroring the PyTorch forward (eval mode)."""
    B, T, C = x.shape
    hd = C // NHEADS
    qkv = x @ w_qkv                                    # (B, T, 3C)
    q, k, v = jnp.split(qkv, 3, axis=-1)

    def to_heads(t):
        return t.reshape(B, T, NHEADS, hd).transpose(0, 2, 1, 3)  # (B, H, T, hd)

    q, k, v = to_heads(q), to_heads(k), to_heads(v)
    s = jnp.einsum('bhqd,bhkd->bhqk', q, k) / math.sqrt(hd)
    mask = jnp.tril(jnp.ones((T, T), dtype=bool))
    s = jnp.where(mask[None, None], s, -jnp.inf)
    p = jax.nn.softmax(s, axis=-1)
    y = jnp.einsum('bhqk,bhkd->bhqd', p, v)
    y = y.transpose(0, 2, 1, 3).reshape(B, T, C)
    return y @ w_proj


if __name__ == "__main__":
    key = jax.random.PRNGKey(0)
    kx, kw1, kw2 = jax.random.split(key, 3)

    B, T, C = 2, BLOCK_SIZE, DIM

    x = jax.random.normal(kx, (B, T, C), dtype=jnp.float32)

    # Deterministic init matching nn.Linear's uniform(-1/sqrt(fan_in), ...) scale.
    # Stored as (in, out) == PyTorch weight.T so the kernel computes x @ W.
    bound = 1.0 / math.sqrt(DIM)
    w_qkv = jax.random.uniform(kw1, (DIM, 3 * DIM), jnp.float32, -bound, bound)
    w_proj = jax.random.uniform(kw2, (DIM, DIM), jnp.float32, -bound, bound)

    out = causal_self_attention(x, w_qkv, w_proj)
    out = jax.block_until_ready(out)

    ref = _reference(x, w_qkv, w_proj)
    assert out.shape == (B, T, C)
    max_err = float(jnp.max(jnp.abs(out - ref)))
    # bf16 MXU operands (f32 accumulation) => relaxed tolerance vs f32 reference.
    assert jnp.allclose(out, ref, atol=3e-2, rtol=3e-2), (
        f"mismatch vs reference (max abs err {max_err})")

    print("KERNEL_OK")
</pallas_src>

<mosaic_0001>
module attributes {stable_mosaic.version = 11 : i64} {
  func.func @_causal_attn_kernel(%arg0: i32, %arg1: memref<128x128xbf16, #tpu.memory_space<vmem>>, %arg2: memref<128x384xbf16, #tpu.memory_space<vmem>>, %arg3: memref<128x128xbf16, #tpu.memory_space<vmem>>, %arg4: memref<128x128xf32, #tpu.memory_space<vmem>>, %arg5: memref<128x128xbf16, #tpu.memory_space<vmem>>) attributes {dimension_semantics = [#tpu.dimension_semantics<parallel>], iteration_bounds = array<i64: 1>, scalar_prefetch = 0 : i64, scratch_operands = 1 : i64, tpu.core_type = #tpu.core_type<tc>, window_params = [{transform_indices = @transform_0, window_bounds = array<i64: 128, 128>}, {pipeline_mode = #tpu.pipeline_mode<synchronous>, transform_indices = @transform_1, window_bounds = array<i64: 128, 384>}, {pipeline_mode = #tpu.pipeline_mode<synchronous>, transform_indices = @transform_2, window_bounds = array<i64: 128, 128>}, {transform_indices = @transform_3, window_bounds = array<i64: 128, 128>}]} {
    %c0 = arith.constant 0 : index
    %c0_0 = arith.constant 0 : index
    %0 = vector.load %arg1[%c0, %c0_0] : memref<128x128xbf16, #tpu.memory_space<vmem>>, vector<128x128xbf16>
    %c0_1 = arith.constant 0 : index
    %c0_2 = arith.constant 0 : index
    %1 = vector.load %arg2[%c0_1, %c0_2] : memref<128x384xbf16, #tpu.memory_space<vmem>>, vector<128x384xbf16>
    %cst = arith.constant dense<0.000000e+00> : vector<128x384xf32>
    %2 = tpu.matmul %0, %1, %cst {dimension_numbers = #tpu.dot_dimension_numbers<[1], [0], [0], [1], [0, 0, 1, 1], [], []>} : vector<128x128xbf16>, vector<128x384xbf16>, vector<128x384xf32> -> vector<128x384xf32>
    %3 = arith.truncf %2 : vector<128x384xf32> to vector<128x384xbf16>
    %4 = tpu.iota {dimensions = array<i32: 0>} : vector<64x64xi32>
    %5 = tpu.iota {dimensions = array<i32: 1>} : vector<64x64xi32>
    %6 = arith.cmpi sle, %5, %4 : vector<64x64xi32>
    %cst_3 = arith.constant 0.000000e+00 : f32
    %cst_4 = arith.constant -1.000000e+30 : f32
    %7 = vector.broadcast %cst_3 : f32 to vector<64x64xf32>
    %8 = vector.broadcast %cst_4 : f32 to vector<64x64xf32>
    %9 = arith.select %6, %7, %8 : vector<64x64xi1>, vector<64x64xf32>
    %10 = vector.shape_cast %9 : vector<64x64xf32> to vector<1x64x64xf32>
    %11 = vector.broadcast %10 : vector<1x64x64xf32> to vector<2x64x64xf32>
    %12 = vector.extract_strided_slice %3 {offsets = [0, 0], sizes = [128, 32], strides = [1, 1]} : vector<128x384xbf16> to vector<128x32xbf16>
    %13 = vector.shape_cast %12 : vector<128x32xbf16> to vector<2x64x32xbf16>
    %14 = vector.extract_strided_slice %3 {offsets = [0, 128], sizes = [128, 32], strides = [1, 1]} : vector<128x384xbf16> to vector<128x32xbf16>
    %15 = vector.shape_cast %14 : vector<128x32xbf16> to vector<2x64x32xbf16>
    %16 = vector.extract_strided_slice %3 {offsets = [0, 256], sizes = [128, 32], strides = [1, 1]} : vector<128x384xbf16> to vector<128x32xbf16>
    %17 = vector.shape_cast %16 : vector<128x32xbf16> to vector<2x64x32xbf16>
    "tpu.trace_start"() <{level = 10 : i32, message = "btd,bsd->bts"}> : () -> ()
    %cst_5 = arith.constant dense<0.000000e+00> : vector<2x64x64xf32>
    %18 = tpu.matmul %13, %15, %cst_5 {dimension_numbers = #tpu.dot_dimension_numbers<[2], [2], [1], [1], [0, 0, 0, 1, 1, 1], [0], [0]>} : vector<2x64x32xbf16>, vector<2x64x32xbf16>, vector<2x64x64xf32> -> vector<2x64x64xf32>
    "tpu.trace_stop"() : () -> ()
    %19 = arith.addf %18, %11 : vector<2x64x64xf32>
    %cst_6 = arith.constant dense<0xFF800000> : vector<2x64xf32>
    %20 = vector.multi_reduction <maximumf>, %19, %cst_6 [2] : vector<2x64x64xf32> to vector<2x64xf32>
    %21 = vector.shape_cast %20 : vector<2x64xf32> to vector<2x64x1xf32>
    %22 = vector.broadcast %21 : vector<2x64x1xf32> to vector<2x64x64xf32>
    %23 = arith.subf %19, %22 : vector<2x64x64xf32>
    %24 = math.exp %23 : vector<2x64x64xf32>
    %cst_7 = arith.constant dense<0.000000e+00> : vector<2x64xf32>
    %25 = vector.multi_reduction <add>, %24, %cst_7 [2] : vector<2x64x64xf32> to vector<2x64xf32>
    %26 = vector.shape_cast %25 : vector<2x64xf32> to vector<2x64x1xf32>
    %27 = tpu.reciprocal %26 {approx = true} : vector<2x64x1xf32> -> vector<2x64x1xf32>
    %28 = vector.broadcast %27 : vector<2x64x1xf32> to vector<2x64x64xf32>
    %29 = arith.mulf %24, %28 : vector<2x64x64xf32>
    %30 = arith.truncf %29 : vector<2x64x64xf32> to vector<2x64x64xbf16>
    "tpu.trace_start"() <{level = 10 : i32, message = "bts,bsd->btd"}> : () -> ()
    %cst_8 = arith.constant dense<0.000000e+00> : vector<2x64x32xf32>
    %31 = tpu.matmul %30, %17, %cst_8 {dimension_numbers = #tpu.dot_dimension_numbers<[2], [1], [1], [2], [0, 0, 0, 1, 1, 2], [0], [0]>} : vector<2x64x64xbf16>, vector<2x64x32xbf16>, vector<2x64x32xf32> -> vector<2x64x32xf32>
    "tpu.trace_stop"() : () -> ()
    %32 = vector.shape_cast %31 : vector<2x64x32xf32> to vector<128x32xf32>
    %33 = arith.truncf %32 : vector<128x32xf32> to vector<128x32xbf16>
    %c0_9 = arith.constant 0 : index
    %c0_10 = arith.constant 0 : index
    %34 = vector.load %arg5[%c0_9, %c0_10] : memref<128x128xbf16, #tpu.memory_space<vmem>>, vector<128x32xbf16>
    tpu.vector_store %arg5[%c0_9, %c0_10], %33 {strides = array<i32>} : memref<128x128xbf16, #tpu.memory_space<vmem>>, vector<128x32xbf16>,
    %35 = vector.extract_strided_slice %3 {offsets = [0, 32], sizes = [128, 32], strides = [1, 1]} : vector<128x384xbf16> to vector<128x32xbf16>
    %36 = vector.shape_cast %35 : vector<128x32xbf16> to vector<2x64x32xbf16>
    %37 = vector.extract_strided_slice %3 {offsets = [0, 160], sizes = [128, 32], strides = [1, 1]} : vector<128x384xbf16> to vector<128x32xbf16>
    %38 = vector.shape_cast %37 : vector<128x32xbf16> to vector<2x64x32xbf16>
    %39 = vector.extract_strided_slice %3 {offsets = [0, 288], sizes = [128, 32], strides = [1, 1]} : vector<128x384xbf16> to vector<128x32xbf16>
    %40 = vector.shape_cast %39 : vector<128x32xbf16> to vector<2x64x32xbf16>
    "tpu.trace_start"() <{level = 10 : i32, message = "btd,bsd->bts"}> : () -> ()
    %cst_11 = arith.constant dense<0.000000e+00> : vector<2x64x64xf32>
    %41 = tpu.matmul %36, %38, %cst_11 {dimension_numbers = #tpu.dot_dimension_numbers<[2], [2], [1], [1], [0, 0, 0, 1, 1, 1], [0], [0]>} : vector<2x64x32xbf16>, vector<2x64x32xbf16>, vector<2x64x64xf32> -> vector<2x64x64xf32>
    "tpu.trace_stop"() : () -> ()
    %42 = arith.addf %41, %11 : vector<2x64x64xf32>
    %cst_12 = arith.constant dense<0xFF800000> : vector<2x64xf32>
    %43 = vector.multi_reduction <maximumf>, %42, %cst_12 [2] : vector<2x64x64xf32> to vector<2x64xf32>
    %44 = vector.shape_cast %43 : vector<2x64xf32> to vector<2x64x1xf32>
    %45 = vector.broadcast %44 : vector<2x64x1xf32> to vector<2x64x64xf32>
    %46 = arith.subf %42, %45 : vector<2x64x64xf32>
    %47 = math.exp %46 : vector<2x64x64xf32>
    %cst_13 = arith.constant dense<0.000000e+00> : vector<2x64xf32>
    %48 = vector.multi_reduction <add>, %47, %cst_13 [2] : vector<2x64x64xf32> to vector<2x64xf32>
    %49 = vector.shape_cast %48 : vector<2x64xf32> to vector<2x64x1xf32>
    %50 = tpu.reciprocal %49 {approx = true} : vector<2x64x1xf32> -> vector<2x64x1xf32>
    %51 = vector.broadcast %50 : vector<2x64x1xf32> to vector<2x64x64xf32>
    %52 = arith.mulf %47, %51 : vector<2x64x64xf32>
    %53 = arith.truncf %52 : vector<2x64x64xf32> to vector<2x64x64xbf16>
    "tpu.trace_start"() <{level = 10 : i32, message = "bts,bsd->btd"}> : () -> ()
    %cst_14 = arith.constant dense<0.000000e+00> : vector<2x64x32xf32>
    %54 = tpu.matmul %53, %40, %cst_14 {dimension_numbers = #tpu.dot_dimension_numbers<[2], [1], [1], [2], [0, 0, 0, 1, 1, 2], [0], [0]>} : vector<2x64x64xbf16>, vector<2x64x32xbf16>, vector<2x64x32xf32> -> vector<2x64x32xf32>
    "tpu.trace_stop"() : () -> ()
    %55 = vector.shape_cast %54 : vector<2x64x32xf32> to vector<128x32xf32>
    %56 = arith.truncf %55 : vector<128x32xf32> to vector<128x32xbf16>
    %c0_15 = arith.constant 0 : index
    %c32 = arith.constant 32 : index
    %57 = vector.load %arg5[%c0_15, %c32] : memref<128x128xbf16, #tpu.memory_space<vmem>>, vector<128x32xbf16>
    tpu.vector_store %arg5[%c0_15, %c32], %56 {strides = array<i32>} : memref<128x128xbf16, #tpu.memory_space<vmem>>, vector<128x32xbf16>,
    %58 = vector.extract_strided_slice %3 {offsets = [0, 64], sizes = [128, 32], strides = [1, 1]} : vector<128x384xbf16> to vector<128x32xbf16>
    %59 = vector.shape_cast %58 : vector<128x32xbf16> to vector<2x64x32xbf16>
    %60 = vector.extract_strided_slice %3 {offsets = [0, 192], sizes = [128, 32], strides = [1, 1]} : vector<128x384xbf16> to vector<128x32xbf16>
    %61 = vector.shape_cast %60 : vector<128x32xbf16> to vector<2x64x32xbf16>
    %62 = vector.extract_strided_slice %3 {offsets = [0, 320], sizes = [128, 32], strides = [1, 1]} : vector<128x384xbf16> to vector<128x32xbf16>
    %63 = vector.shape_cast %62 : vector<128x32xbf16> to vector<2x64x32xbf16>
    "tpu.trace_start"() <{level = 10 : i32, message = "btd,bsd->bts"}> : () -> ()
    %cst_16 = arith.constant dense<0.000000e+00> : vector<2x64x64xf32>
    %64 = tpu.matmul %59, %61, %cst_16 {dimension_numbers = #tpu.dot_dimension_numbers<[2], [2], [1], [1], [0, 0, 0, 1, 1, 1], [0], [0]>} : vector<2x64x32xbf16>, vector<2x64x32xbf16>, vector<2x64x64xf32> -> vector<2x64x64xf32>
    "tpu.trace_stop"() : () -> ()
    %65 = arith.addf %64, %11 : vector<2x64x64xf32>
    %cst_17 = arith.constant dense<0xFF800000> : vector<2x64xf32>
    %66 = vector.multi_reduction <maximumf>, %65, %cst_17 [2] : vector<2x64x64xf32> to vector<2x64xf32>
    %67 = vector.shape_cast %66 : vector<2x64xf32> to vector<2x64x1xf32>
    %68 = vector.broadcast %67 : vector<2x64x1xf32> to vector<2x64x64xf32>
    %69 = arith.subf %65, %68 : vector<2x64x64xf32>
    %70 = math.exp %69 : vector<2x64x64xf32>
    %cst_18 = arith.constant dense<0.000000e+00> : vector<2x64xf32>
    %71 = vector.multi_reduction <add>, %70, %cst_18 [2] : vector<2x64x64xf32> to vector<2x64xf32>
    %72 = vector.shape_cast %71 : vector<2x64xf32> to vector<2x64x1xf32>
    %73 = tpu.reciprocal %72 {approx = true} : vector<2x64x1xf32> -> vector<2x64x1xf32>
    %74 = vector.broadcast %73 : vector<2x64x1xf32> to vector<2x64x64xf32>
    %75 = arith.mulf %70, %74 : vector<2x64x64xf32>
    %76 = arith.truncf %75 : vector<2x64x64xf32> to vector<2x64x64xbf16>
    "tpu.trace_start"() <{level = 10 : i32, message = "bts,bsd->btd"}> : () -> ()
    %cst_19 = arith.constant dense<0.000000e+00> : vector<2x64x32xf32>
    %77 = tpu.matmul %76, %63, %cst_19 {dimension_numbers = #tpu.dot_dimension_numbers<[2], [1], [1], [2], [0, 0, 0, 1, 1, 2], [0], [0]>} : vector<2x64x64xbf16>, vector<2x64x32xbf16>, vector<2x64x32xf32> -> vector<2x64x32xf32>
    "tpu.trace_stop"() : () -> ()
    %78 = vector.shape_cast %77 : vector<2x64x32xf32> to vector<128x32xf32>
    %79 = arith.truncf %78 : vector<128x32xf32> to vector<128x32xbf16>
    %c0_20 = arith.constant 0 : index
    %c64 = arith.constant 64 : index
    %80 = vector.load %arg5[%c0_20, %c64] : memref<128x128xbf16, #tpu.memory_space<vmem>>, vector<128x32xbf16>
    tpu.vector_store %arg5[%c0_20, %c64], %79 {strides = array<i32>} : memref<128x128xbf16, #tpu.memory_space<vmem>>, vector<128x32xbf16>,
    %81 = vector.extract_strided_slice %3 {offsets = [0, 96], sizes = [128, 32], strides = [1, 1]} : vector<128x384xbf16> to vector<128x32xbf16>
    %82 = vector.shape_cast %81 : vector<128x32xbf16> to vector<2x64x32xbf16>
    %83 = vector.extract_strided_slice %3 {offsets = [0, 224], sizes = [128, 32], strides = [1, 1]} : vector<128x384xbf16> to vector<128x32xbf16>
    %84 = vector.shape_cast %83 : vector<128x32xbf16> to vector<2x64x32xbf16>
    %85 = vector.extract_strided_slice %3 {offsets = [0, 352], sizes = [128, 32], strides = [1, 1]} : vector<128x384xbf16> to vector<128x32xbf16>
    %86 = vector.shape_cast %85 : vector<128x32xbf16> to vector<2x64x32xbf16>
    "tpu.trace_start"() <{level = 10 : i32, message = "btd,bsd->bts"}> : () -> ()
    %cst_21 = arith.constant dense<0.000000e+00> : vector<2x64x64xf32>
    %87 = tpu.matmul %82, %84, %cst_21 {dimension_numbers = #tpu.dot_dimension_numbers<[2], [2], [1], [1], [0, 0, 0, 1, 1, 1], [0], [0]>} : vector<2x64x32xbf16>, vector<2x64x32xbf16>, vector<2x64x64xf32> -> vector<2x64x64xf32>
    "tpu.trace_stop"() : () -> ()
    %88 = arith.addf %87, %11 : vector<2x64x64xf32>
    %cst_22 = arith.constant dense<0xFF800000> : vector<2x64xf32>
    %89 = vector.multi_reduction <maximumf>, %88, %cst_22 [2] : vector<2x64x64xf32> to vector<2x64xf32>
    %90 = vector.shape_cast %89 : vector<2x64xf32> to vector<2x64x1xf32>
    %91 = vector.broadcast %90 : vector<2x64x1xf32> to vector<2x64x64xf32>
    %92 = arith.subf %88, %91 : vector<2x64x64xf32>
    %93 = math.exp %92 : vector<2x64x64xf32>
    %cst_23 = arith.constant dense<0.000000e+00> : vector<2x64xf32>
    %94 = vector.multi_reduction <add>, %93, %cst_23 [2] : vector<2x64x64xf32> to vector<2x64xf32>
    %95 = vector.shape_cast %94 : vector<2x64xf32> to vector<2x64x1xf32>
    %96 = tpu.reciprocal %95 {approx = true} : vector<2x64x1xf32> -> vector<2x64x1xf32>
    %97 = vector.broadcast %96 : vector<2x64x1xf32> to vector<2x64x64xf32>
    %98 = arith.mulf %93, %97 : vector<2x64x64xf32>
    %99 = arith.truncf %98 : vector<2x64x64xf32> to vector<2x64x64xbf16>
    "tpu.trace_start"() <{level = 10 : i32, message = "bts,bsd->btd"}> : () -> ()
    %cst_24 = arith.constant dense<0.000000e+00> : vector<2x64x32xf32>
    %100 = tpu.matmul %99, %86, %cst_24 {dimension_numbers = #tpu.dot_dimension_numbers<[2], [1], [1], [2], [0, 0, 0, 1, 1, 2], [0], [0]>} : vector<2x64x64xbf16>, vector<2x64x32xbf16>, vector<2x64x32xf32> -> vector<2x64x32xf32>
    "tpu.trace_stop"() : () -> ()
    %101 = vector.shape_cast %100 : vector<2x64x32xf32> to vector<128x32xf32>
    %102 = arith.truncf %101 : vector<128x32xf32> to vector<128x32xbf16>
    %c0_25 = arith.constant 0 : index
    %c96 = arith.constant 96 : index
    %103 = vector.load %arg5[%c0_25, %c96] : memref<128x128xbf16, #tpu.memory_space<vmem>>, vector<128x32xbf16>
    tpu.vector_store %arg5[%c0_25, %c96], %102 {strides = array<i32>} : memref<128x128xbf16, #tpu.memory_space<vmem>>, vector<128x32xbf16>,
    %c0_26 = arith.constant 0 : index
    %c0_27 = arith.constant 0 : index
    %104 = vector.load %arg5[%c0_26, %c0_27] : memref<128x128xbf16, #tpu.memory_space<vmem>>, vector<128x128xbf16>
    %c0_28 = arith.constant 0 : index
    %c0_29 = arith.constant 0 : index
    %105 = vector.load %arg3[%c0_28, %c0_29] : memref<128x128xbf16, #tpu.memory_space<vmem>>, vector<128x128xbf16>
    %cst_30 = arith.constant dense<0.000000e+00> : vector<128x128xf32>
    %106 = tpu.matmul %104, %105, %cst_30 {dimension_numbers = #tpu.dot_dimension_numbers<[1], [0], [0], [1], [0, 0, 1, 1], [], []>} : vector<128x128xbf16>, vector<128x128xbf16>, vector<128x128xf32> -> vector<128x128xf32>
    %c0_31 = arith.constant 0 : index
    %c0_32 = arith.constant 0 : index
    %107 = vector.load %arg4[%c0_31, %c0_32] : memref<128x128xf32, #tpu.memory_space<vmem>>, vector<128x128xf32>
    tpu.vector_store %arg4[%c0_31, %c0_32], %106 {strides = array<i32>} : memref<128x128xf32, #tpu.memory_space<vmem>>, vector<128x128xf32>,
    return
  }
  func.func @transform_0(%arg0: i32) -> (i32, i32) {
    %c0_i32 = arith.constant 0 : i32
    %c0_i32_0 = arith.constant 0 : i32
    return %arg0, %c0_i32 : i32, i32
  }
  func.func @transform_1(%arg0: i32) -> (i32, i32) {
    %c0_i32 = arith.constant 0 : i32
    %c0_i32_0 = arith.constant 0 : i32
    %c0_i32_1 = arith.constant 0 : i32
    return %c0_i32, %c0_i32_0 : i32, i32
  }
  func.func @transform_2(%arg0: i32) -> (i32, i32) {
    %c0_i32 = arith.constant 0 : i32
    %c0_i32_0 = arith.constant 0 : i32
    %c0_i32_1 = arith.constant 0 : i32
    return %c0_i32, %c0_i32_0 : i32, i32
  }
  func.func @transform_3(%arg0: i32) -> (i32, i32) {
    %c0_i32 = arith.constant 0 : i32
    %c0_i32_0 = arith.constant 0 : i32
    return %arg0, %c0_i32 : i32, i32
  }
}

</mosaic_0001>

<bundles_post_ra>
// kernel: tpu_custom_call.1
= control target key start
LH: loop header
LB: loop body
LE: loop exit
PB: predicated region body
PF: predicated region fallthrough
CT: control target
= control target key end

     0   :  { %8 = vsyncpa [#allocation4], 0  ;;  %s5623_s0 = inlined_call_operand.hbm [shape: bf16[128,128], index: 0, kind: input, shape index: {}]   ;;  %s5624_s1 = inlined_call_operand.hbm [shape: bf16[128,384], index: 1, kind: input, shape index: {}]   ;;  %s5625_s2 = inlined_call_operand.hbm [shape: bf16[128,128], index: 2, kind: input, shape index: {}]   ;;  %s5626_s3 = inlined_call_operand.hbm [shape: f32[128,128], index: 3, kind: output, shape index: {}]  }
   0x1   :  { %9 = vsyncpa [#allocation7], 0 }
   0x2   :  { %10 = vsyncpa [#allocation5], 0  ;;  %s4210_s12 = smov [#allocation6]   ;;  %s4116_s16 = scalar_lea.hbm %s5624_s1, 3072 }
   0x3   :  { %s28_s13 = sshll.u32 %s4210_s12, 4  ;;  %p4117_p0 = scmp.ne.s32.totalorder %s5624_s1, %s4116_s16  ;;  %s29_s13 = int_to_ptr.vmem [resolvable:$true] %s28_s13 }
   0x4   :  { %p4120_p1 = scmp.lt.u32.totalorder %s4116_s16, %s5624_s1 }
   0x6   :  { %p4122_p2 = pnand %p4120_p1, %p4117_p0 }
   0x8   :  { %4125 = shalt.err (!%p4122_p2)
}
   0x9   :  { %s4126_s21 = scalar_lea.vmem %s29_s13, 3072  ;;  %p4131_p4 = scmp.lt.s32.totalorder %s29_s13, %s29_s13 }
   0xa   :  { %p4127_p3 = scmp.ne.s32.totalorder %s29_s13, %s4126_s21  ;;  %p4132_p5 = scmp.lt.s32.totalorder %s4126_s21, %s4126_s21 }
   0xc   :  { %p4133_p6 = por %p4132_p5, %p4131_p4 }
   0xe   :  { %p4134_p7 = pnand %p4133_p6, %p4127_p3 }
  0x10   :  { %4137 = shalt.err (!%p4134_p7)
}
  0x11   :  { %s4211_s22 = smov 192   ;;  %s4212_s23 = smov 12  }
  0x12   :  { %34 = dma.hbm_to_vmem [thread:$0]  %s5624_s1, 3072, %s29_s13, [#allocation7], %s4211_s22, %s4211_s22, %s4212_s23  }
  0x13   :  { %s4213_s26 = smov [#allocation3]   ;;  %s4138_s30 = scalar_lea.hbm %s5623_s0, 1024 }
  0x14   :  { %s16_s27 = sshll.u32 %s4213_s26, 4  ;;  %p4139_p8 = scmp.ne.s32.totalorder %s5623_s0, %s4138_s30  ;;  %s17_s27 = int_to_ptr.vmem [resolvable:$true] %s16_s27 }
  0x15   :  { %p4142_p9 = scmp.lt.u32.totalorder %s4138_s30, %s5623_s0 }
  0x17   :  { %p4144_p10 = pnand %p4142_p9, %p4139_p8 }
  0x19   :  { %4147 = shalt.err (!%p4144_p10)
}
  0x1a   :  { %s4148_s8 = scalar_lea.vmem %s17_s27, 1024  ;;  %p4153_p12 = scmp.lt.s32.totalorder %s17_s27, %s17_s27 }
  0x1b   :  { %p4149_p11 = scmp.ne.s32.totalorder %s17_s27, %s4148_s8  ;;  %p4154_p13 = scmp.lt.s32.totalorder %s4148_s8, %s4148_s8 }
  0x1d   :  { %p4155_p0 = por %p4154_p13, %p4153_p12 }
  0x1f   :  { %p4156_p1 = pnand %p4155_p0, %p4149_p11 }
  0x21   :  { %4159 = shalt.err (!%p4156_p1)
}
  0x22   :  { %s4214_s1 = smov 64   ;;  %s4215_s9 = smov 4  }
  0x23   :  { %22 = dma.hbm_to_vmem [thread:$0]  %s5623_s0, 1024, %s17_s27, [#allocation4], %s4214_s1, %s4214_s1, %s4215_s9  }
  0x24   :  { %s4216_s12 = smov [#allocation8]   ;;  %s4160_s16 = scalar_lea.hbm %s5625_s2, 1024 }
  0x25   :  { %s40_s13 = sshll.u32 %s4216_s12, 4  ;;  %p4161_p2 = scmp.ne.s32.totalorder %s5625_s2, %s4160_s16  ;;  %s41_s13 = int_to_ptr.vmem [resolvable:$true] %s40_s13 }
  0x26   :  { %p4164_p3 = scmp.lt.u32.totalorder %s4160_s16, %s5625_s2 }
  0x28   :  { %p4166_p4 = pnand %p4164_p3, %p4161_p2 }
  0x2a   :  { %4169 = shalt.err (!%p4166_p4)
}
  0x2b   :  { %s4170_s21 = scalar_lea.vmem %s41_s13, 1024  ;;  %p4175_p6 = scmp.lt.s32.totalorder %s41_s13, %s41_s13 }
  0x2c   :  { %p4171_p5 = scmp.ne.s32.totalorder %s41_s13, %s4170_s21  ;;  %p4176_p7 = scmp.lt.s32.totalorder %s4170_s21, %s4170_s21 }
  0x2e   :  { %p4177_p8 = por %p4176_p7, %p4175_p6 }
  0x30   :  { %p4178_p9 = pnand %p4177_p8, %p4171_p5 }
  0x32   :  { %4181 = shalt.err (!%p4178_p9)
}
  0x33   :  { %46 = dma.hbm_to_vmem [thread:$0]  %s5625_s2, 1024, %s41_s13, [#allocation7], %s4214_s1, %s4214_s1, %s4215_s9  }
  0x34   :  { %4204 = dma.done.wait [#allocation4], 1024  }
  0x35   :  { %4205 = vsyncadd [#allocation4], 4294966272 }
  0x36   :  { %4206 = dma.done.wait [#allocation7], 4096  }
  0x37   :  { %4207 = vsyncadd [#allocation7], 4294963200  ;;  %v4217_v0 = vmov 0   ;;  %v3812_v1 = vld [vmem:[#allocation6 + $0x4] ss:$12 sps:$4 sm:$0xff]   ;;  %v3838_v22 = vld [vmem:[#allocation3 + $0x8] sm:$0xff]  }
  0x38   :  { %313 = vmatprep.mubr.bf16.mxu0 %v4217_v0  ;;  %353 = vmatprep.mubr.bf16.mxu1 %v4217_v0  ;;  %v3814_v2 = vld [vmem:[#allocation6] ss:$12 sps:$4 sm:$0xff]   ;;  %v3815_v3 = vld [vmem:[#allocation6 + $0x1c] ss:$12 sps:$4 sm:$0xff]   ;;  %v3817_v4 = vld [vmem:[#allocation6 + $0x18] ss:$12 sps:$4 sm:$0xff]  }
  0x39   :  { %281 = vmatprep.subr.bf16.mxu0 %v3812_v1  ;;  %3750 = vmatprep.subr.bf16.mxu1 %v3812_v1  ;;  %v3818_v5 = vld [vmem:[#allocation6 + $0x34] ss:$12 sps:$4 sm:$0xff]   ;;  %v3820_v6 = vld [vmem:[#allocation6 + $0x30] ss:$12 sps:$4 sm:$0xff]   ;;  %v3821_v7 = vld [vmem:[#allocation6 + $0x4c] ss:$12 sps:$4 sm:$0xff]  }
  0x3a   :  { %282 = vmatpush1.bf16.msra.mxu0 %v3814_v2  ;;  %3758 = vmatpush1.bf16.msra.mxu1 %v3814_v2  ;;  %v3823_v8 = vld [vmem:[#allocation6 + $0x48] ss:$12 sps:$4 sm:$0xff]   ;;  %v3824_v9 = vld [vmem:[#allocation6 + $0x64] ss:$12 sps:$4 sm:$0xff]   ;;  %v3826_v10 = vld [vmem:[#allocation6 + $0x60] ss:$12 sps:$4 sm:$0xff]  }
  0x3b   :  { %283 = vmatprep.subr.bf16.mxu0 %v3815_v3  ;;  %3751 = vmatprep.subr.bf16.mxu1 %v3815_v3  ;;  %v3827_v11 = vld [vmem:[#allocation6 + $0x7c] ss:$12 sps:$4 sm:$0xff]   ;;  %v3829_v12 = vld [vmem:[#allocation6 + $0x78] ss:$12 sps:$4 sm:$0xff]   ;;  %v3830_v13 = vld [vmem:[#allocation6 + $0x94] ss:$12 sps:$4 sm:$0xff]  }
  0x3c   :  { %v3832_v14 = vld [vmem:[#allocation6 + $0x90] ss:$12 sps:$4 sm:$0xff]   ;;  %v3833_v15 = vld [vmem:[#allocation6 + $0xac] ss:$12 sps:$4 sm:$0xff]   ;;  %v3835_v16 = vld [vmem:[#allocation6 + $0xa8] ss:$12 sps:$4 sm:$0xff]  }
  0x3d   :  { %v3844_v17 = vld [vmem:[#allocation6 + $0x8] ss:$12 sps:$4 sm:$0xff]   ;;  %v3836_v18 = vld [vmem:[#allocation3] sm:$0xff]   ;;  %v3847_v24 = vld [vmem:[#allocation6 + $0x50] ss:$12 sps:$4 sm:$0xff]   ;;  %vm542_vm0 = vcmask 261120  }
  0x3e   :  { %284 = vmatpush1.bf16.msra.mxu0 %v3817_v4  ;;  %3759 = vmatpush1.bf16.msra.mxu1 %v3817_v4  ;;  %v3837_v19 = vld [vmem:[#allocation3 + $0x20] sm:$0xff]   ;;  %v3839_v23 = vld [vmem:[#allocation3 + $0x28] sm:$0xff]   ;;  %v3840_v26 = vld [vmem:[#allocation3 + $0x10] sm:$0xff]   ;;  %vm721_vm4 = vcmask 523264   ;;  %s4219_s2 = smov 96   ;;  %s4220_s23 = smov 32  }
  0x3f   :  { %285 = vmatprep.subr.bf16.mxu0 %v3818_v5  ;;  %3752 = vmatprep.subr.bf16.mxu1 %v3818_v5  ;;  %v3845_v20 = vld [vmem:[#allocation6 + $0x20] ss:$12 sps:$4 sm:$0xff]   ;;  %v3846_v21 = vld [vmem:[#allocation6 + $0x38] ss:$12 sps:$4 sm:$0xff]   ;;  %v3848_v25 = vld [vmem:[#allocation6 + $0x68] ss:$12 sps:$4 sm:$0xff]  }
  0x40   :  { %v3841_v27 = vld [vmem:[#allocation3 + $0x30] sm:$0xff]   ;;  %v3849_v28 = vld [vmem:[#allocation6 + $0x80] ss:$12 sps:$4 sm:$0xff]   ;;  %v3850_v29 = vld [vmem:[#allocation6 + $0x98] ss:$12 sps:$4 sm:$0xff]   ;;  %vm1712_vm10 = vcmask 523520  }
  0x41   :  { %v3842_v30 = vld [vmem:[#allocation3 + $0x18] sm:$0xff]   ;;  %vm2333_vm11 = vcmask 785920   ;;  %vm2954_vm12 = vcmask 1048320   ;;  %s4221_s24 = smov [#allocation9]  }
  0x42   :  { %286 = vmatpush1.bf16.msra.mxu0 %v3820_v6  ;;  %3760 = vmatpush1.bf16.msra.mxu1 %v3820_v6  ;;  %v3843_v31 = vld [vmem:[#allocation3 + $0x38] sm:$0xff]   ;;  %s3153_s25 = sshll.u32 %s4221_s24, 4  ;;  %s3154_s25 = int_to_ptr.vmem [resolvable:$true] %s3153_s25 }
  0x43   :  { %287 = vmatprep.subr.bf16.mxu0 %v3821_v7  ;;  %3753 = vmatprep.subr.bf16.mxu1 %v3821_v7  ;;  %v3851_v32 = vld [vmem:[#allocation6 + $0xb0] ss:$12 sps:$4 sm:$0xff]   ;;  %s4182_s26 = scalar_lea.vmem %s3154_s25, 2048  ;;  %p4187_p11 = scmp.lt.s32.totalorder %s3154_s25, %s3154_s25 }
  0x44   :  { %p4183_p10 = scmp.ne.s32.totalorder %s3154_s25, %s4182_s26  ;;  %p4188_p12 = scmp.lt.s32.totalorder %s4182_s26, %s4182_s26 }
  0x46   :  { %288 = vmatpush1.bf16.msra.mxu0 %v3823_v8  ;;  %3761 = vmatpush1.bf16.msra.mxu1 %v3823_v8  ;;  %p4189_p13 = por %p4188_p12, %p4187_p11 }
  0x47   :  { %289 = vmatprep.subr.bf16.mxu0 %v3824_v9  ;;  %3754 = vmatprep.subr.bf16.mxu1 %v3824_v9 }
  0x48   :  { %p4190_p0 = pnand %p4189_p13, %p4183_p10 }
  0x4a   :  { %290 = vmatpush1.bf16.msra.mxu0 %v3826_v10  ;;  %3762 = vmatpush1.bf16.msra.mxu1 %v3826_v10 }
  0x4b   :  { %291 = vmatprep.subr.bf16.mxu0 %v3827_v11  ;;  %3755 = vmatprep.subr.bf16.mxu1 %v3827_v11 }
  0x4e   :  { %292 = vmatpush1.bf16.msra.mxu0 %v3829_v12  ;;  %3763 = vmatpush1.bf16.msra.mxu1 %v3829_v12 }
  0x4f   :  { %293 = vmatprep.subr.bf16.mxu0 %v3830_v13  ;;  %3756 = vmatprep.subr.bf16.mxu1 %v3830_v13 }
  0x52   :  { %294 = vmatpush1.bf16.msra.mxu0 %v3832_v14  ;;  %3764 = vmatpush1.bf16.msra.mxu1 %v3832_v14 }
  0x53   :  { %295 = vmatprep.subr.bf16.mxu0 %v3833_v15  ;;  %3757 = vmatprep.subr.bf16.mxu1 %v3833_v15 }
  0x56   :  { %296 = vmatpush1.bf16.msra.mxu0 %v3835_v16  ;;  %3765 = vmatpush1.bf16.msra.mxu1 %v3835_v16 }
  0x57   :  { %3430 = vmatprep.subr.bf16.mxu1 %v3844_v17 }
  0x59   :  { %314 = vmatmul.mubr.bf16.vlgmr.msra.gmra.mrb[0].mxu0 %v3836_v18  ;;  %354 = vmatmul.mubr.bf16.vlgmr.msra.gmra.mrb[0].mxu1 %v3837_v19 }
  0x5a   :  { %323 = vmatprep.mubr.bf16.mxu0 %v4217_v0  ;;  %363 = vmatprep.mubr.bf16.mxu1 %v4217_v0 }
  0x5b   :  { %3431 = vmatpush3.bf16.msra.mxu1 %v3844_v17 }
  0x5c   :  { %3432 = vmatprep.subr.bf16.mxu1 %v3845_v20 }
  0x5f   :  { %3433 = vmatpush3.bf16.msra.mxu1 %v3845_v20 }
  0x60   :  { %3434 = vmatprep.subr.bf16.mxu1 %v3846_v21 }
  0x61   :  { %324 = vmatmul.mubr.bf16.gmra.mrb[4].mxu0 %v3838_v22  ;;  %364 = vmatmul.mubr.bf16.gmra.mrb[4].mxu1 %v3839_v23 }
  0x62   :  { %333 = vmatprep.mubr.bf16.mxu0 %v4217_v0  ;;  %373 = vmatprep.mubr.bf16.mxu1 %v4217_v0 }
  0x63   :  { %3435 = vmatpush3.bf16.msra.mxu1 %v3846_v21 }
  0x64   :  { %3436 = vmatprep.subr.bf16.mxu1 %v3847_v24 }
  0x67   :  { %3437 = vmatpush3.bf16.msra.mxu1 %v3847_v24 }
  0x68   :  { %3438 = vmatprep.subr.bf16.mxu1 %v3848_v25 }
  0x69   :  { %334 = vmatmul.mubr.bf16.gmra.mrb[8].mxu0 %v3840_v26  ;;  %374 = vmatmul.mubr.bf16.gmra.mrb[8].mxu1 %v3841_v27 }
  0x6a   :  { %343 = vmatprep.mubr.bf16.mxu0 %v4217_v0  ;;  %383 = vmatprep.mubr.bf16.mxu1 %v4217_v0 }
  0x6b   :  { %3439 = vmatpush3.bf16.msra.mxu1 %v3848_v25 }
  0x6c   :  { %3440 = vmatprep.subr.bf16.mxu1 %v3849_v28 }
  0x6f   :  { %3441 = vmatpush3.bf16.msra.mxu1 %v3849_v28 }
  0x70   :  { %3442 = vmatprep.subr.bf16.mxu1 %v3850_v29 }
  0x71   :  { %344 = vmatmul.mubr.bf16.gmra.mrb[12].mxu0 %v3842_v30  ;;  %384 = vmatmul.mubr.bf16.gmra.mrb[12].mxu1 %v3843_v31 }
  0x72   :  { %3446 = vmatprep.mubr.bf16.mxu1 %v3836_v18 }
  0x73   :  { %3443 = vmatpush3.bf16.msra.mxu1 %v3850_v29 }
  0x74   :  { %3444 = vmatprep.subr.bf16.mxu1 %v3851_v32 }
  0x77   :  { %3445 = vmatpush3.bf16.msra.mxu1 %v3851_v32 }
  0x7a   :  { %3447 = vmatmul.mubr.bf16.vlgmr.msra.gmra.mrb[16].mxu1 %v3838_v22 }
  0x7b   :  { %3450 = vmatprep.mubr.bf16.mxu1 %v3840_v26 }
  0x82   :  { %3451 = vmatmul.mubr.bf16.gmra.mrb[20].mxu1 %v3842_v30 }
  0x83   :  { %3454 = vmatprep.mubr.bf16.mxu1 %v3837_v19 }
  0x8a   :  { %3455 = vmatmul.mubr.bf16.gmra.mrb[24].mxu1 %v3839_v23 }
  0x8b   :  { %3458 = vmatprep.mubr.bf16.mxu1 %v3841_v27 }
  0x92   :  { %3459 = vmatmul.mubr.bf16.gmra.mrb[28].mxu1 %v3843_v31 }
 0x12c   :  { %v315_v33 = vpop.f32.mrb[0].mxu0  ;;  %v355_v34 = vpop.f32.mrb[0].mxu1 }
 0x12d   :  { %v317_v35 = vpop.f32.mrb[1].mxu0  ;;  %v357_v36 = vpop.f32.mrb[1].mxu1 }
 0x12e   :  { %v319_v37 = vpop.f32.mrb[2].mxu0  ;;  %v359_v38 = vpop.f32.mrb[2].mxu1 }
 0x12f   :  { %v4292_v39 = vpack.c.bf16 %v319_v37, %v315_v33  ;;  %v4294_v40 = vpack.c.bf16 %v359_v38, %v355_v34  ;;  %v321_v41 = vpop.f32.mrb[3].mxu0  ;;  %v361_v42 = vpop.f32.mrb[3].mxu1 }
 0x130   :  { %v4296_v43 = vpack.c.bf16 %v321_v41, %v317_v35  ;;  %v4298_v44 = vpack.c.bf16 %v361_v42, %v357_v36 }
 0x131   :  { %3470 = vmatprep.mubr.msk.bf16.mxu1 %vm542_vm0, %v4292_v39  ;;  %3486 = vmatprep.mubr.msk.bf16.mxu0 %vm542_vm0, %v4294_v40 }
 0x132   :  { %3766 = vmatprep.subr.msk.bf16.mxu1 %vm542_vm0, %v4296_v43  ;;  %3770 = vmatprep.subr.msk.bf16.mxu0 %vm542_vm0, %v4298_v44  ;;  %v556_v45 = vsel %vm542_vm0, %v4296_v43, 0  ;;  %v645_v46 = vsel %vm542_vm0, %v4298_v44, 0 }
 0x133   :  { %3463 = vmatpush3.bf16.xpose.msra.mxu1 %v556_v45  ;;  %3479 = vmatpush3.bf16.xpose.msra.mxu0 %v645_v46 }
 0x134   :  { %v325_v47 = vpop.f32.mrb[4].mxu0  ;;  %v365_v48 = vpop.f32.mrb[4].mxu1 }
 0x135   :  { %v327_v49 = vpop.f32.mrb[5].mxu0  ;;  %v367_v50 = vpop.f32.mrb[5].mxu1 }
 0x136   :  { %v329_v51 = vpop.f32.mrb[6].mxu0  ;;  %v369_v52 = vpop.f32.mrb[6].mxu1 }
 0x137   :  { %v4312_v53 = vpack.c.bf16 %v329_v51, %v325_v47  ;;  %v4314_v54 = vpack.c.bf16 %v369_v52, %v365_v48  ;;  %v331_v55 = vpop.f32.mrb[7].mxu0  ;;  %v371_v56 = vpop.f32.mrb[7].mxu1 }
 0x138   :  { %v4316_v57 = vpack.c.bf16 %v331_v55, %v327_v49  ;;  %v4318_v58 = vpack.c.bf16 %v371_v56, %v367_v50  ;;  %v515_v55 = vlaneseq }
 0x13a   :  { %3767 = vmatprep.subr.msk.bf16.mxu1 %vm542_vm0, %v4316_v57  ;;  %3771 = vmatprep.subr.msk.bf16.mxu0 %vm542_vm0, %v4318_v58  ;;  %v559_v59 = vsel %vm542_vm0, %v4316_v57, 0  ;;  %v648_v60 = vsel %vm542_vm0, %v4318_v58, 0  ;;  %v516_v56 = vshrl.u32 %v515_v55, 7 }
 0x13b   :  { %3465 = vmatpush3.bf16.xpose.msra.mxu1 %v559_v59  ;;  %3481 = vmatpush3.bf16.xpose.msra.mxu0 %v648_v60  ;;  %v4397_v60 = vand.u32 127, %v515_v55 }
 0x13c   :  { %v335_v61 = vpop.f32.mrb[8].mxu0  ;;  %v375_v62 = vpop.f32.mrb[8].mxu1  ;;  %v518_v59 = vadd.s32 16, %v516_v56 }
 0x13d   :  { %v337_v63 = vpop.f32.mrb[9].mxu0  ;;  %v377_v0 = vpop.f32.mrb[9].mxu1  ;;  %vm526_vm2 = vcmp.le.s32.totalorder %v4397_v60, %v516_v56 }
 0x13e   :  { %v339_v1 = vpop.f32.mrb[10].mxu0  ;;  %v379_v2 = vpop.f32.mrb[10].mxu1  ;;  %vm528_vm1 = vcmp.le.s32.totalorder %v4397_v60, %v518_v59 }
 0x13f   :  { %v4328_v3 = vpack.c.bf16 %v339_v1, %v335_v61  ;;  %v4330_v4 = vpack.c.bf16 %v379_v2, %v375_v62  ;;  %v341_v5 = vpop.f32.mrb[11].mxu0  ;;  %v381_v6 = vpop.f32.mrb[11].mxu1  ;;  %v519_v61 = vadd.s32 24, %v516_v56  ;;  %v4218_v62 = vmov -1e+30  }
 0x140   :  { %v4332_v7 = vpack.c.bf16 %v341_v5, %v337_v63  ;;  %v4334_v8 = vpack.c.bf16 %v381_v6, %v377_v0  ;;  %v4403_v63 = vsel %vm528_vm1, 0.0, %v4218_v62  ;;  %v4406_v2 = vsel %vm526_vm2, 0.0, %v4218_v62 }
 0x141   :  { %5648 = vst [vmem:[#allocation13_spill] sm:$0xff] %v4330_v4  ;;  %vm529_vm3 = vcmp.le.s32.totalorder %v4397_v60, %v519_v61 }
 0x142   :  { %3768 = vmatprep.subr.msk.bf16.mxu1 %vm542_vm0, %v4332_v7  ;;  %3772 = vmatprep.subr.msk.bf16.mxu0 %vm542_vm0, %v4334_v8  ;;  %v562_v9 = vsel %vm542_vm0, %v4332_v7, 0  ;;  %v651_v10 = vsel %vm542_vm0, %v4334_v8, 0  ;;  %v4409_v5 = vsel %vm529_vm3, 0.0, %v4218_v62 }
 0x143   :  { %3467 = vmatpush3.bf16.xpose.msra.mxu1 %v562_v9  ;;  %3483 = vmatpush3.bf16.xpose.msra.mxu0 %v651_v10 }
 0x144   :  { %v345_v11 = vpop.f32.mrb[12].mxu0  ;;  %v385_v12 = vpop.f32.mrb[12].mxu1 }
 0x145   :  { %v347_v13 = vpop.f32.mrb[13].mxu0  ;;  %v387_v14 = vpop.f32.mrb[13].mxu1 }
 0x146   :  { %v349_v15 = vpop.f32.mrb[14].mxu0  ;;  %v389_v16 = vpop.f32.mrb[14].mxu1 }
 0x147   :  { %v4344_v17 = vpack.c.bf16 %v349_v15, %v345_v11  ;;  %v4346_v18 = vpack.c.bf16 %v389_v16, %v385_v12  ;;  %v351_v19 = vpop.f32.mrb[15].mxu0  ;;  %v391_v20 = vpop.f32.mrb[15].mxu1  ;;  %v517_v12 = vadd.s32 8, %v516_v56 }
 0x148   :  { %v4348_v21 = vpack.c.bf16 %v351_v19, %v347_v13  ;;  %v4350_v22 = vpack.c.bf16 %v391_v20, %v387_v14 }
 0x149   :  { %5649 = vst [vmem:[#allocation14_spill] sm:$0xff] %v4344_v17  ;;  %5650 = vst [vmem:[#allocation15_spill] sm:$0xff] %v4346_v18  ;;  %vm527_vm5 = vcmp.le.s32.totalorder %v4397_v60, %v517_v12 }
 0x14a   :  { %3769 = vmatprep.subr.msk.bf16.mxu1 %vm542_vm0, %v4348_v21  ;;  %3773 = vmatprep.subr.msk.bf16.mxu0 %vm542_vm0, %v4350_v22  ;;  %v565_v23 = vsel %vm542_vm0, %v4348_v21, 0  ;;  %v654_v24 = vsel %vm542_vm0, %v4350_v22, 0 }
 0x14b   :  { %3469 = vmatpush3.bf16.xpose.msra.mxu1 %v565_v23  ;;  %3485 = vmatpush3.bf16.xpose.msra.mxu0 %v654_v24 }
 0x14d   :  { %v3448_v25 = vpop.f32.mrb[16].mxu1 }
 0x14e   :  { %v428_v26 = vpop.f32.mrb[17].mxu1 }
 0x14f   :  { %v3449_v27 = vpop.f32.mrb[18].mxu1 }
 0x150   :  { %v4360_v28 = vpack.c.bf16 %v3449_v27, %v3448_v25  ;;  %v431_v29 = vpop.f32.mrb[19].mxu1  ;;  %v522_v25 = vadd.s32 48, %v516_v56 }
 0x151   :  { %v4362_v30 = vpack.c.bf16 %v431_v29, %v428_v26  ;;  %v523_v26 = vadd.s32 56, %v516_v56 }
 0x152   :  { %3471 = vmatmul.mubr.msk.bf16.vlgmr.msra.gmra.mrb[32].mxu1 %vm542_vm0, %v4312_v53  ;;  %3487 = vmatmul.mubr.msk.bf16.vlgmr.msra.gmra.mrb[16].mxu0 %vm542_vm0, %v4314_v54  ;;  %vm532_vm6 = vcmp.le.s32.totalorder %v4397_v60, %v522_v25 }
 0x153   :  { %3474 = vmatprep.mubr.msk.bf16.mxu1 %vm542_vm0, %v4328_v3  ;;  %3490 = vmatprep.mubr.msk.bf16.mxu0 %vm542_vm0, %v4330_v4  ;;  %vm533_vm7 = vcmp.le.s32.totalorder %v4397_v60, %v523_v26 }
 0x154   :  { %3494 = vmatprep.subr.bf16.mxu1 %v4362_v30 }
 0x155   :  { %3495 = vmatpush3.bf16.msra.mxu1 %v4362_v30  ;;  %v3452_v31 = vpop.f32.mrb[20].mxu1 }
 0x156   :  { %v444_v32 = vpop.f32.mrb[21].mxu1  ;;  %3496 = vmatprep.subr.bf16.mxu1 %v4360_v28 }
 0x157   :  { %v3453_v33 = vpop.f32.mrb[22].mxu1 }
 0x158   :  { %v4375_v34 = vpack.c.bf16 %v3453_v33, %v3452_v31  ;;  %v447_v35 = vpop.f32.mrb[23].mxu1  ;;  %v4439_v33 = vsel %vm527_vm5, 0.0, %v4218_v62 }
 0x159   :  { %v4377_v36 = vpack.c.bf16 %v447_v35, %v444_v32  ;;  %3497 = vmatpush3.bf16.msra.mxu1 %v4360_v28 }
 0x15a   :  { %3475 = vmatmul.mubr.msk.bf16.gmra.mrb[36].mxu1 %vm542_vm0, %v4344_v17  ;;  %3491 = vmatmul.mubr.msk.bf16.gmra.mrb[20].mxu0 %vm542_vm0, %v4346_v18 }
 0x15b   :  { %3498 = vmatprep.subr.bf16.mxu1 %v4377_v36 }
 0x15d   :  { %3499 = vmatpush3.bf16.msra.mxu1 %v4377_v36  ;;  %v3456_v37 = vpop.f32.mrb[24].mxu1 }
 0x15e   :  { %3500 = vmatprep.subr.bf16.mxu1 %v4375_v34  ;;  %v460_v38 = vpop.f32.mrb[25].mxu1 }
 0x15f   :  { %v3457_v41 = vpop.f32.mrb[26].mxu1 }
 0x160   :  { %v4387_v42 = vpack.c.bf16 %v3457_v41, %v3456_v37  ;;  %v463_v45 = vpop.f32.mrb[27].mxu1 }
 0x161   :  { %3501 = vmatpush3.bf16.msra.mxu1 %v4375_v34  ;;  %v4390_v46 = vpack.c.bf16 %v463_v45, %v460_v38  ;;  %v521_v45 = vadd.s32 40, %v516_v56 }
 0x163   :  { %3510 = vmatprep.subr.bf16.mxu1 %v4390_v46  ;;  %vm531_vm8 = vcmp.le.s32.totalorder %v4397_v60, %v521_v45 }
 0x165   :  { %v3460_v47 = vpop.f32.mrb[28].mxu1 }
 0x166   :  { %v476_v48 = vpop.f32.mrb[29].mxu1 }
 0x167   :  { %v3461_v49 = vpop.f32.mrb[30].mxu1 }
 0x168   :  { %v4393_v50 = vpack.c.bf16 %v3461_v49, %v3460_v47  ;;  %v479_v51 = vpop.f32.mrb[31].mxu1 }
 0x169   :  { %v4395_v52 = vpack.c.bf16 %v479_v51, %v476_v48 }
 0x225   :  { %v3472_v0 = vpop.f32.mrb[32].mxu1  ;;  %v3488_v1 = vpop.f32.mrb[16].mxu0 }
 0x226   :  { %v4412_v6 = vadd.f32 %v3472_v0, %v4403_v63  ;;  %v4415_v9 = vadd.f32 %v3488_v1, %v4403_v63  ;;  %v601_v10 = vpop.f32.mrb[33].mxu1  ;;  %v690_v11 = vpop.f32.mrb[17].mxu0  ;;  %v4454_v1 = vsel %vm532_vm6, 0.0, %v4218_v62 }
 0x227   :  { %v3473_v13 = vpop.f32.mrb[34].mxu1  ;;  %v3489_v14 = vpop.f32.mrb[18].mxu0  ;;  %v4418_v15 = vadd.f32 %v601_v10, %v4406_v2  ;;  %v4429_v27 = vadd.f32 %v690_v11, %v4406_v2  ;;  %v4457_v10 = vsel %vm533_vm7, 0.0, %v4218_v62  ;;  %v520_v11 = vadd.s32 32, %v516_v56 }
 0x228   :  { %v4421_v16 = vadd.f32 %v3473_v13, %v4409_v5  ;;  %v604_v19 = vpop.f32.mrb[35].mxu1  ;;  %v693_v20 = vpop.f32.mrb[19].mxu0  ;;  %v752_v23 = vsel %vm721_vm4, %v4415_v9, -inf  ;;  %v728_v24 = vsel %vm721_vm4, %v4412_v6, -inf  ;;  %v4432_v29 = vadd.f32 %v3489_v14, %v4409_v5 }
 0x229   :  { %753 = vmax.xlane.f32.xlu0 %v752_v23  ;;  %729 = vmax.xlane.f32.xlu1 %v728_v24  ;;  %v722_v32 = vsel %vm721_vm4, %v4418_v15, -inf  ;;  %v4444_v49 = vadd.f32 %v604_v19, %v4439_v33  ;;  %v4447_v51 = vadd.f32 %v693_v20, %v4439_v33  ;;  %v746_v0 = vsel %vm721_vm4, %v4429_v27, -inf }
 0x22a   :  { %v731_v31 = vsel %vm721_vm4, %v4421_v16, -inf  ;;  %v755_v61 = vsel %vm721_vm4, %v4432_v29, -inf  ;;  %v4471_v20 = vsel %vm531_vm8, 0.0, %v4218_v62  ;;  %vm530_vm9 = vcmp.le.s32.totalorder %v4397_v60, %v520_v11 }
 0x22b   :  { %v749_v14 = vsel %vm721_vm4, %v4447_v51, -inf  ;;  %v725_v19 = vsel %vm721_vm4, %v4444_v49, -inf  ;;  %v4485_v26 = vsel %vm530_vm9, 0.0, %v4218_v62 }
 0x22d   :  { %v3492_v35 = vpop.f32.mrb[20].mxu0  ;;  %732 = vmax.xlane.f32.xlu1 %v731_v31  ;;  %v3476_v37 = vpop.f32.mrb[36].mxu1  ;;  %723 = vmax.xlane.f32.xlu0 %v722_v32 }
 0x22e   :  { %v617_v38 = vpop.f32.mrb[37].mxu1  ;;  %v706_v41 = vpop.f32.mrb[21].mxu0  ;;  %v4461_v12 = vadd.f32 %v3476_v37, %v4454_v1  ;;  %v4475_v56 = vadd.f32 %v3492_v35, %v4454_v1 }
 0x22f   :  { %v3477_v47 = vpop.f32.mrb[38].mxu1  ;;  %v3493_v48 = vpop.f32.mrb[22].mxu0  ;;  %v4488_v31 = vadd.f32 %v617_v38, %v4485_v26  ;;  %v4498_v37 = vadd.f32 %v706_v41, %v4485_v26 }
 0x230   :  { %v620_v55 = vpop.f32.mrb[39].mxu1  ;;  %v709_v59 = vpop.f32.mrb[23].mxu0  ;;  %v4464_v13 = vadd.f32 %v3477_v47, %v4457_v10  ;;  %v740_v25 = vsel %vm721_vm4, %v4461_v12, -inf  ;;  %v4491_v60 = vadd.f32 %v3493_v48, %v4457_v10  ;;  %v764_v35 = vsel %vm721_vm4, %v4475_v56, -inf }
 0x231   :  { %756 = vmax.xlane.f32.xlu1 %v755_v61  ;;  %747 = vmax.xlane.f32.xlu0 %v746_v0  ;;  %v4478_v23 = vadd.f32 %v620_v55, %v4471_v20  ;;  %v4501_v62 = vadd.f32 %v709_v59, %v4471_v20  ;;  %v734_v45 = vsel %vm721_vm4, %v4488_v31, -inf  ;;  %v758_v48 = vsel %vm721_vm4, %v4498_v37, -inf }
 0x232   :  { %v743_v24 = vsel %vm721_vm4, %v4464_v13, -inf  ;;  %v767_v38 = vsel %vm721_vm4, %v4491_v60, -inf }
 0x233   :  { %v737_v32 = vsel %vm721_vm4, %v4478_v23, -inf  ;;  %v761_v47 = vsel %vm721_vm4, %v4501_v62, -inf }
 0x235   :  { %750 = vmax.xlane.f32.xlu1 %v749_v14  ;;  %726 = vmax.xlane.f32.xlu0 %v725_v19 }
 0x239   :  { %744 = vmax.xlane.f32.xlu1 %v743_v24  ;;  %741 = vmax.xlane.f32.xlu0 %v740_v25 }
 0x23d   :  { %738 = vmax.xlane.f32.xlu1 %v737_v32  ;;  %765 = vmax.xlane.f32.xlu0 %v764_v35 }
 0x241   :  { %768 = vmax.xlane.f32.xlu1 %v767_v38  ;;  %735 = vmax.xlane.f32.xlu0 %v734_v45 }
 0x245   :  { %762 = vmax.xlane.f32.xlu1 %v761_v47  ;;  %759 = vmax.xlane.f32.xlu0 %v758_v48 }
 0x256   :  { %1094 = vrot.lane.b32.xlu1 %v4316_v57, %s4219_s2 }
 0x25b   :  { %1092 = vrot.lane.b32.xlu0 %v4296_v43, %s4219_s2 }
 0x2b6   :  { %v754_v41 = vpop.xlane.xlu0 %753  ;;  %v730_v55 = vpop.xlane.xlu1 %729 }
 0x2b7   :  { %v780_v59 = vsub.f32 %v4415_v9, %v754_v41  ;;  %v772_v61 = vsub.f32 %v4412_v6, %v730_v55 }
 0x2b9   :  { %v790_v0 = vmul.f32 1.442695, %v772_v61  ;;  %v806_v11 = vmul.f32 1.442695, %v780_v59 }
 0x2ba   :  { %v733_v14 = vpop.xlane.xlu1 %732  ;;  %v724_v19 = vpop.xlane.xlu0 %723 }
 0x2bb   :  { %v773_v24 = vsub.f32 %v4421_v16, %v733_v14  ;;  %v770_v25 = vsub.f32 %v4418_v15, %v724_v19  ;;  %3860 = vpow2.f32 %v790_v0 }
 0x2bc   :  { %3862 = vpow2.f32 %v806_v11 }
 0x2bd   :  { %v792_v32 = vmul.f32 1.442695, %v773_v24  ;;  %v786_v35 = vmul.f32 1.442695, %v770_v25 }
 0x2be   :  { %v757_v38 = vpop.xlane.xlu1 %756  ;;  %v748_v45 = vpop.xlane.xlu0 %747 }
 0x2bf   :  { %3864 = vpow2.f32 %v792_v32  ;;  %v781_v47 = vsub.f32 %v4432_v29, %v757_v38  ;;  %v778_v9 = vsub.f32 %v4429_v27, %v748_v45 }
 0x2c0   :  { %3866 = vpow2.f32 %v786_v35 }
 0x2c1   :  { %v808_v6 = vmul.f32 1.442695, %v781_v47  ;;  %v802_v48 = vmul.f32 1.442695, %v778_v9 }
 0x2c2   :  { %v751_v41 = vpop.xlane.xlu1 %750  ;;  %v727_v55 = vpop.xlane.xlu0 %726 }
 0x2c3   :  { %3868 = vpow2.f32 %v808_v6  ;;  %v779_v16 = vsub.f32 %v4447_v51, %v751_v41  ;;  %v771_v15 = vsub.f32 %v4444_v49, %v727_v55 }
 0x2c4   :  { %3870 = vpow2.f32 %v802_v48 }
 0x2c5   :  { %v788_v59 = vmul.f32 1.442695, %v771_v15  ;;  %v4523_v61 = vpop.eup %3860  ;;  %v804_v0 = vmul.f32 1.442695, %v779_v16 }
 0x2c6   :  { %v745_v11 = vpop.xlane.xlu1 %744  ;;  %v742_v14 = vpop.xlane.xlu0 %741  ;;  %v824_v27 = vsel %vm721_vm4, %v4523_v61, 0.0 }
 0x2c7   :  { %v776_v29 = vsub.f32 %v4461_v12, %v742_v14  ;;  %v4528_v19 = vpop.eup %3862  ;;  %3872 = vpow2.f32 %v788_v59  ;;  %825 = vadd.xlane.f32.xlu0 %v824_v27  ;;  %v777_v59 = vsub.f32 %v4464_v13, %v745_v11 }
 0x2c8   :  { %3874 = vpow2.f32 %v804_v0  ;;  %v848_v12 = vsel %vm721_vm4, %v4528_v19, 0.0 }
 0x2c9   :  { %v4530_v24 = vpop.eup %3864  ;;  %v798_v51 = vmul.f32 1.442695, %v776_v29 }
 0x2ca   :  { %v739_v49 = vpop.xlane.xlu1 %738  ;;  %v766_v25 = vpop.xlane.xlu0 %765  ;;  %v827_v32 = vsel %vm721_vm4, %v4530_v24, 0.0 }
 0x2cb   :  { %v784_v35 = vsub.f32 %v4475_v56, %v766_v25  ;;  %828 = vadd.xlane.f32.xlu1 %v827_v32  ;;  %v4537_v38 = vpop.eup %3866  ;;  %3876 = vpow2.f32 %v798_v51  ;;  %849 = vadd.xlane.f32.xlu0 %v848_v12  ;;  %v775_v13 = vsub.f32 %v4478_v23, %v739_v49 }
 0x2cc   :  { %v818_v56 = vsel %vm721_vm4, %v4537_v38, 0.0 }
 0x2cd   :  { %v4539_v45 = vpop.eup %3868  ;;  %v814_v47 = vmul.f32 1.442695, %v784_v35  ;;  %v800_v35 = vmul.f32 1.442695, %v777_v59  ;;  %v796_v23 = vmul.f32 1.442695, %v775_v13 }
 0x2ce   :  { %v769_v9 = vpop.xlane.xlu1 %768  ;;  %v736_v6 = vpop.xlane.xlu0 %735  ;;  %v851_v48 = vsel %vm721_vm4, %v4539_v45, 0.0 }
 0x2cf   :  { %v774_v41 = vsub.f32 %v4488_v31, %v736_v6  ;;  %852 = vadd.xlane.f32.xlu1 %v851_v48  ;;  %v4546_v55 = vpop.eup %3870  ;;  %3878 = vpow2.f32 %v814_v47  ;;  %819 = vadd.xlane.f32.xlu0 %v818_v56  ;;  %v785_v49 = vsub.f32 %v4491_v60, %v769_v9 }
 0x2d0   :  { %v842_v31 = vsel %vm721_vm4, %v4546_v55, 0.0 }
 0x2d1   :  { %v794_v16 = vmul.f32 1.442695, %v774_v41  ;;  %v4548_v15 = vpop.eup %3872 }
 0x2d2   :  { %v760_v0 = vpop.xlane.xlu0 %759  ;;  %v763_v14 = vpop.xlane.xlu1 %762  ;;  %v821_v27 = vsel %vm721_vm4, %v4548_v15, 0.0 }
 0x2d3   :  { %v782_v29 = vsub.f32 %v4498_v37, %v760_v0  ;;  %v4556_v51 = vpop.eup %3874  ;;  %3880 = vpow2.f32 %v794_v16  ;;  %843 = vadd.xlane.f32.xlu0 %v842_v31  ;;  %822 = vadd.xlane.f32.xlu1 %v821_v27  ;;  %v816_v16 = vmul.f32 1.442695, %v785_v49 }
 0x2d4   :  { %v845_v37 = vsel %vm721_vm4, %v4556_v51, 0.0 }
 0x2d5   :  { %v810_v25 = vmul.f32 1.442695, %v782_v29  ;;  %v4558_v32 = vpop.eup %3876 }
 0x2d6   :  { %v1093_v11 = vpop.permute.xlu0 %1092  ;;  %v836_v12 = vsel %vm721_vm4, %v4558_v32, 0.0  ;;  %v1095_v6 = vpop.permute.xlu1 %1094 }
 0x2d7   :  { %3774 = vmatprep.subr.msk.bf16.mxu0 %vm542_vm0, %v1093_v11  ;;  %v1113_v47 = vsel %vm542_vm0, %v1093_v11, 0  ;;  %3882 = vpow2.f32 %v810_v25  ;;  %846 = vadd.xlane.f32.xlu1 %v845_v37  ;;  %v1116_v0 = vsel %vm542_vm0, %v1095_v6, 0  ;;  %v783_v11 = vsub.f32 %v4501_v62, %v763_v14 }
 0x2d8   :  { %837 = vadd.xlane.f32.xlu0 %v836_v12  ;;  %3527 = vmatpush3.bf16.xpose.msra.mxu0 %v1113_v47  ;;  %3884 = vpow2.f32 %v800_v35 }
 0x2d9   :  { %v4567_v48 = vpop.eup %3878  ;;  %3775 = vmatprep.subr.msk.bf16.mxu0 %vm542_vm0, %v1095_v6  ;;  %3886 = vpow2.f32 %v796_v23  ;;  %v812_v37 = vmul.f32 1.442695, %v783_v11 }
 0x2da   :  { %v860_v41 = vsel %vm721_vm4, %v4567_v48, 0.0  ;;  %3888 = vpow2.f32 %v816_v16 }
 0x2db   :  { %3890 = vpow2.f32 %v812_v37 }
 0x2dc   :  { %861 = vadd.xlane.f32.xlu0 %v860_v41 }
 0x2dd   :  { %v4573_v56 = vpop.eup %3880 }
 0x2de   :  { %v830_v59 = vsel %vm721_vm4, %v4573_v56, 0.0 }
 0x2e0   :  { %831 = vadd.xlane.f32.xlu0 %v830_v59  ;;  %3529 = vmatpush3.bf16.xpose.msra.mxu0 %v1116_v0 }
 0x2e1   :  { %v4578_v29 = vpop.eup %3882 }
 0x2e2   :  { %v854_v60 = vsel %vm721_vm4, %v4578_v29, 0.0  ;;  %v4582_v9 = vpop.eup %3884 }
 0x2e3   :  { %855 = vadd.xlane.f32.xlu1 %v854_v60  ;;  %v839_v31 = vsel %vm721_vm4, %v4582_v9, 0.0  ;;  %v4586_v27 = vpop.eup %3886 }
 0x2e4   :  { %v833_v25 = vsel %vm721_vm4, %v4586_v27, 0.0  ;;  %v4590_v35 = vpop.eup %3888 }
 0x2e5   :  { %v863_v13 = vsel %vm721_vm4, %v4590_v35, 0.0  ;;  %v4609_v12 = vpop.eup %3890 }
 0x2e6   :  { %v857_v62 = vsel %vm721_vm4, %v4609_v12, 0.0 }
 0x2e7   :  { %840 = vadd.xlane.f32.xlu1 %v839_v31 }
 0x2eb   :  { %834 = vadd.xlane.f32.xlu1 %v833_v25 }
 0x2ef   :  { %864 = vadd.xlane.f32.xlu1 %v863_v13 }
 0x2f6   :  { %1096 = vrot.lane.b32.xlu0 %v4332_v7, %s4219_s2 }
 0x2fa   :  { %1080 = vrot.lane.b32.xlu0 %v4292_v39, %s4219_s2 }
 0x300   :  { %1205 = vrot.lane.b32.xlu1 %v4298_v44, %s4219_s2 }
 0x304   :  { %1098 = vrot.lane.b32.xlu1 %v4348_v21, %s4219_s2 }
 0x308   :  { %1207 = vrot.lane.b32.xlu1 %v4318_v58, %s4219_s2 }
 0x30c   :  { %1082 = vrot.lane.b32.xlu1 %v4312_v53, %s4219_s2 }
 0x310   :  { %1211 = vrot.lane.b32.xlu1 %v4350_v22, %s4219_s2 }
 0x314   :  { %1195 = vrot.lane.b32.xlu1 %v4314_v54, %s4219_s2 }
 0x318   :  { %1086 = vrot.lane.b32.xlu1 %v4344_v17, %s4219_s2 }
 0x319   :  { %858 = vadd.xlane.f32.xlu0 %v857_v62 }
 0x31c   :  { %1199 = vrot.lane.b32.xlu1 %v4346_v18, %s4219_s2 }
 0x32f   :  { %1209 = vrot.lane.b32.xlu0 %v4334_v8, %s4219_s2 }
 0x333   :  { %1193 = vrot.lane.b32.xlu0 %v4294_v40, %s4219_s2 }
 0x337   :  { %1084 = vrot.lane.b32.xlu0 %v4328_v3, %s4219_s2 }
 0x33b   :  { %1197 = vrot.lane.b32.xlu0 %v4330_v4, %s4219_s2 }
 0x354   :  { %v826_v14 = vpop.xlane.xlu0 %825 }
 0x358   :  { %v829_v47 = vpop.xlane.xlu1 %828  ;;  %v850_v6 = vpop.xlane.xlu0 %849 }
 0x359   :  { %3892 = vrcp.f32 %v829_v47 }
 0x35c   :  { %v853_v23 = vpop.xlane.xlu1 %852  ;;  %v820_v49 = vpop.xlane.xlu0 %819 }
 0x35d   :  { %3894 = vrcp.f32 %v820_v49 }
 0x35e   :  { %3896 = vrcp.f32 %v826_v14 }
 0x360   :  { %v823_v41 = vpop.xlane.xlu1 %822  ;;  %v844_v16 = vpop.xlane.xlu0 %843 }
 0x361   :  { %3898 = vrcp.f32 %v823_v41 }
 0x362   :  { %3900 = vrcp.f32 %v844_v16 }
 0x363   :  { %v3893_v0 = vpop.eup %3892 }
 0x364   :  { %v885_v11 = vmul.f32 %v3893_v0, %v4530_v24  ;;  %v847_v37 = vpop.xlane.xlu1 %846 }
 0x365   :  { %v838_v59 = vpop.xlane.xlu0 %837  ;;  %3902 = vrcp.f32 %v847_v37 }
 0x367   :  { %v3895_v31 = vpop.eup %3894 }
 0x368   :  { %v3897_v25 = vpop.eup %3896  ;;  %v882_v18 = vmul.f32 %v3895_v31, %v4537_v38 }
 0x369   :  { %v4627_v60 = vpop.xlane.xlu0 %861  ;;  %v884_v14 = vmul.f32 %v3897_v25, %v4523_v61 }
 0x36b   :  { %v3899_v13 = vpop.eup %3898  ;;  %v899_v4 = vpack.c.bf16 %v885_v11, %v884_v14 }
 0x36c   :  { %v883_v47 = vmul.f32 %v3899_v13, %v4548_v15  ;;  %v3901_v38 = vpop.eup %3900 }
 0x36d   :  { %v832_v62 = vpop.xlane.xlu0 %831 }
 0x36e   :  { %v898_v49 = vpack.c.bf16 %v883_v47, %v882_v18 }
 0x36f   :  { %v3903_v15 = vpop.eup %3902 }
 0x370   :  { %v4633_v41 = vpop.xlane.xlu1 %855  ;;  %3502 = vmatprep.mubr.msk.bf16.mxu1 %vm721_vm4, %v898_v49  ;;  %v890_v49 = vmul.f32 %v3901_v38, %v4546_v55 }
 0x371   :  { %v1097_v17 = vpop.permute.xlu0 %1096  ;;  %3503 = vmatmul.mubr.msk.bf16.vlgmr.msra.gmra.mrb[40].mxu1 %vm721_vm4, %v899_v4 }
 0x372   :  { %3776 = vmatprep.subr.msk.bf16.mxu0 %vm542_vm0, %v1097_v17  ;;  %v1119_v24 = vsel %vm542_vm0, %v1097_v17, 0  ;;  %3511 = vmatpush3.bf16.msra.mxu1 %v4390_v46 }
 0x373   :  { %3531 = vmatpush3.bf16.xpose.msra.mxu0 %v1119_v24  ;;  %3512 = vmatprep.subr.bf16.mxu1 %v4387_v42 }
 0x374   :  { %v841_v61 = vpop.xlane.xlu1 %840 }
 0x375   :  { %v1081_v18 = vpop.permute.xlu0 %1080  ;;  %3904 = vrcp.f32 %v841_v61 }
 0x376   :  { %3534 = vmatprep.mubr.msk.bf16.mxu0 %vm542_vm0, %v1081_v18  ;;  %3513 = vmatpush3.bf16.msra.mxu1 %v4387_v42  ;;  %3906 = vrcp.f32 %v832_v62 }
 0x377   :  { %3514 = vmatprep.subr.bf16.mxu1 %v4395_v52  ;;  %3908 = vrcp.f32 %v838_v59 }
 0x378   :  { %v835_v4 = vpop.xlane.xlu1 %834 }
 0x379   :  { %3910 = vrcp.f32 %v835_v4 }
 0x37a   :  { %3515 = vmatpush3.bf16.msra.mxu1 %v4395_v52  ;;  %3912 = vrcp.f32 %v853_v23  ;;  %v891_v23 = vmul.f32 %v3903_v15, %v4556_v51 }
 0x37b   :  { %3516 = vmatprep.subr.bf16.mxu1 %v4393_v50  ;;  %3914 = vrcp.f32 %v850_v6 }
 0x37c   :  { %v865_v17 = vpop.xlane.xlu1 %864 }
 0x37d   :  { %3916 = vrcp.f32 %v865_v17 }
 0x37e   :  { %3517 = vmatpush3.bf16.msra.mxu1 %v4393_v50  ;;  %3918 = vrcp.f32 %v4633_v41 }
 0x37f   :  { %v3905_v16 = vpop.eup %3904  ;;  %3920 = vrcp.f32 %v4627_v60 }
 0x380   :  { %v1206_v0 = vpop.permute.xlu1 %1205  ;;  %v3907_v31 = vpop.eup %3906  ;;  %v889_v13 = vmul.f32 %v3905_v16, %v4582_v9 }
 0x381   :  { %3778 = vmatprep.subr.msk.bf16.mxu1 %vm542_vm0, %v1206_v0  ;;  %v3909_v25 = vpop.eup %3908  ;;  %v886_v37 = vmul.f32 %v3907_v31, %v4573_v56  ;;  %v902_v56 = vpack.c.bf16 %v891_v23, %v890_v49  ;;  %v1226_v55 = vsel %vm542_vm0, %v1206_v0, 0 }
 0x382   :  { %v888_v6 = vmul.f32 %v3909_v25, %v4558_v32 }
 0x383   :  { %v3911_v59 = vpop.eup %3910 }
 0x384   :  { %v1099_v11 = vpop.permute.xlu1 %1098  ;;  %v887_v62 = vmul.f32 %v3911_v59, %v4586_v27  ;;  %v901_v24 = vpack.c.bf16 %v889_v13, %v888_v6  ;;  %v3913_v61 = vpop.eup %3912 }
 0x385   :  { %3777 = vmatprep.subr.msk.bf16.mxu0 %vm542_vm0, %v1099_v11  ;;  %v1122_v47 = vsel %vm542_vm0, %v1099_v11, 0  ;;  %v3915_v27 = vpop.eup %3914  ;;  %v893_v51 = vmul.f32 %v3913_v61, %v4539_v45 }
 0x386   :  { %3533 = vmatpush3.bf16.xpose.msra.mxu0 %v1122_v47  ;;  %v900_v14 = vpack.c.bf16 %v887_v62, %v886_v37  ;;  %v892_v32 = vmul.f32 %v3915_v27, %v4528_v19 }
 0x387   :  { %v3917_v31 = vpop.eup %3916 }
 0x388   :  { %v1208_v9 = vpop.permute.xlu1 %1207  ;;  %3506 = vmatprep.mubr.msk.bf16.mxu1 %vm721_vm4, %v900_v14  ;;  %v903_v4 = vpack.c.bf16 %v893_v51, %v892_v32  ;;  %v3919_v59 = vpop.eup %3918  ;;  %v897_v41 = vmul.f32 %v3917_v31, %v4590_v35 }
 0x389   :  { %3507 = vmatmul.mubr.msk.bf16.gmra.mrb[44].mxu1 %vm721_vm4, %v901_v24  ;;  %v1229_v38 = vsel %vm542_vm0, %v1208_v9, 0  ;;  %v3921_v17 = vpop.eup %3920  ;;  %v894_v11 = vmul.f32 %v3919_v59, %v4578_v29 }
 0x38a   :  { %3518 = vmatprep.mubr.msk.bf16.mxu1 %vm721_vm4, %v902_v56  ;;  %v896_v47 = vmul.f32 %v3921_v17, %v4567_v48 }
 0x38c   :  { %v1083_v18 = vpop.permute.xlu1 %1082  ;;  %v905_v14 = vpack.c.bf16 %v897_v41, %v896_v47 }
 0x38d   :  { %3535 = vmatmul.mubr.msk.bf16.vlgmr.msra.gmra.mrb[24].mxu0 %vm542_vm0, %v1083_v18 }
 0x390   :  { %v1212_v19 = vpop.permute.xlu1 %1211 }
 0x391   :  { %3519 = vmatmul.mubr.msk.bf16.vlgmr.msra.gmra.mrb[48].mxu1 %vm721_vm4, %v903_v4  ;;  %v1235_v23 = vsel %vm542_vm0, %v1212_v19, 0 }
 0x392   :  { %3543 = vmatpush3.bf16.xpose.msra.mxu1 %v1226_v55 }
 0x393   :  { %3779 = vmatprep.subr.msk.bf16.mxu1 %vm542_vm0, %v1208_v9 }
 0x394   :  { %v1196_v0 = vpop.permute.xlu1 %1195 }
 0x398   :  { %v1087_v62 = vpop.permute.xlu1 %1086 }
 0x39a   :  { %3545 = vmatpush3.bf16.xpose.msra.mxu1 %v1229_v38 }
 0x39c   :  { %v1200_v35 = vpop.permute.xlu1 %1199 }
 0x3a6   :  { %v859_v45 = vpop.xlane.xlu0 %858 }
 0x3a7   :  { %3922 = vrcp.f32 %v859_v45 }
 0x3aa   :  { %v1210_v15 = vpop.permute.xlu0 %1209 }
 0x3ab   :  { %3780 = vmatprep.subr.msk.bf16.mxu1 %vm542_vm0, %v1210_v15  ;;  %v1232_v16 = vsel %vm542_vm0, %v1210_v15, 0 }
 0x3ac   :  { %3547 = vmatpush3.bf16.xpose.msra.mxu1 %v1232_v16 }
 0x3ad   :  { %3781 = vmatprep.subr.msk.bf16.mxu1 %vm542_vm0, %v1212_v19 }
 0x3ae   :  { %v1194_v25 = vpop.permute.xlu0 %1193 }
 0x3b1   :  { %v3923_v13 = vpop.eup %3922 }
 0x3b2   :  { %v1085_v60 = vpop.permute.xlu0 %1084  ;;  %v895_v37 = vmul.f32 %v3923_v13, %v4609_v12 }
 0x3b3   :  { %3538 = vmatprep.mubr.msk.bf16.mxu0 %vm542_vm0, %v1085_v60 }
 0x3b4   :  { %3539 = vmatmul.mubr.msk.bf16.gmra.mrb[28].mxu0 %vm542_vm0, %v1087_v62  ;;  %3549 = vmatpush3.bf16.xpose.msra.mxu1 %v1235_v23  ;;  %v904_v6 = vpack.c.bf16 %v895_v37, %v894_v11 }
 0x3b6   :  { %3522 = vmatprep.mubr.msk.bf16.mxu1 %vm721_vm4, %v904_v6  ;;  %v1198_v29 = vpop.permute.xlu0 %1197 }
 0x3b7   :  { %3523 = vmatmul.mubr.msk.bf16.gmra.mrb[52].mxu1 %vm721_vm4, %v905_v14 }
 0x3b8   :  { %3550 = vmatprep.mubr.msk.bf16.mxu1 %vm542_vm0, %v1194_v25 }
 0x3bf   :  { %3551 = vmatmul.mubr.msk.bf16.vlgmr.msra.gmra.mrb[56].mxu1 %vm542_vm0, %v1196_v0 }
 0x3c0   :  { %3554 = vmatprep.mubr.msk.bf16.mxu1 %vm542_vm0, %v1198_v29 }
 0x3c7   :  { %3555 = vmatmul.mubr.msk.bf16.gmra.mrb[60].mxu1 %vm542_vm0, %v1200_v35 }
 0x444   :  { %v3504_v48 = vpop.f32.mrb[40].mxu1 }
 0x445   :  { %v952_v12 = vpop.f32.mrb[41].mxu1 }
 0x446   :  { %v3505_v49 = vpop.f32.mrb[42].mxu1 }
 0x447   :  { %v1061_v24 = vpack.c.bf16 %v3505_v49, %v3504_v48  ;;  %v955_v61 = vpop.f32.mrb[43].mxu1 }
 0x448   :  { %v1060_v9 = vpack.c.bf16 %v955_v61, %v952_v12 }
 0x449   :  { %1069 = vst.msk [vmem:[#allocation2 + $0x8] sm:$0xff] %vm542_vm0, %v1061_v24 }
 0x44a   :  { %1068 = vst.msk [vmem:[#allocation2] sm:$0xff] %vm542_vm0, %v1060_v9 }
 0x45c   :  { %v3508_v56 = vpop.f32.mrb[44].mxu1 }
 0x45d   :  { %v968_v27 = vpop.f32.mrb[45].mxu1 }
 0x45e   :  { %v3509_v51 = vpop.f32.mrb[46].mxu1 }
 0x45f   :  { %v1063_v18 = vpack.c.bf16 %v3509_v51, %v3508_v56  ;;  %v971_v32 = vpop.f32.mrb[47].mxu1 }
 0x460   :  { %v1062_v4 = vpack.c.bf16 %v971_v32, %v968_v27  ;;  %v3536_v55 = vpop.f32.mrb[24].mxu0 }
 0x461   :  { %1071 = vst.msk [vmem:[#allocation2 + $0x18] sm:$0xff] %vm542_vm0, %v1063_v18  ;;  %v1158_v38 = vpop.f32.mrb[25].mxu0  ;;  %v4692_v16 = vadd.f32 %v3536_v55, %v4403_v63 }
 0x462   :  { %1070 = vst.msk [vmem:[#allocation2 + $0x10] sm:$0xff] %vm542_vm0, %v1062_v4  ;;  %v4689_v45 = vadd.f32 %v1158_v38, %v4406_v2  ;;  %v3537_v19 = vpop.f32.mrb[26].mxu0 }
 0x463   :  { %v1161_v15 = vpop.f32.mrb[27].mxu0  ;;  %v4702_v11 = vadd.f32 %v3537_v19, %v4409_v5  ;;  %v1308_v62 = vsel %vm721_vm4, %v4692_v16, -inf }
 0x464   :  { %v4695_v0 = vadd.f32 %v1161_v15, %v4439_v33  ;;  %v3520_v31 = vpop.f32.mrb[48].mxu1  ;;  %v1302_v25 = vsel %vm721_vm4, %v4689_v45, -inf }
 0x465   :  { %v1029_v59 = vpop.f32.mrb[49].mxu1  ;;  %1303 = vmax.xlane.f32.xlu0 %v1302_v25  ;;  %v1311_v23 = vsel %vm721_vm4, %v4702_v11, -inf }
 0x466   :  { %v3521_v17 = vpop.f32.mrb[50].mxu1  ;;  %v1305_v13 = vsel %vm721_vm4, %v4695_v0, -inf }
 0x467   :  { %v1065_v41 = vpack.c.bf16 %v3521_v17, %v3520_v31  ;;  %v1032_v60 = vpop.f32.mrb[51].mxu1  ;;  %1306 = vmax.xlane.f32.xlu1 %v1305_v13 }
 0x468   :  { %v1064_v37 = vpack.c.bf16 %v1032_v60, %v1029_v59 }
 0x469   :  { %1073 = vst.msk [vmem:[#allocation2 + $0x28] sm:$0xff] %vm542_vm0, %v1065_v41  ;;  %1309 = vmax.xlane.f32.xlu0 %v1308_v62 }
 0x46a   :  { %1072 = vst.msk [vmem:[#allocation2 + $0x20] sm:$0xff] %vm542_vm0, %v1064_v37 }
 0x46d   :  { %1312 = vmax.xlane.f32.xlu0 %v1311_v23 }
 0x487   :  { %v3540_v47 = vpop.f32.mrb[28].mxu0 }
 0x488   :  { %v1174_v6 = vpop.f32.mrb[29].mxu0  ;;  %v4714_v12 = vadd.f32 %v3540_v47, %v4454_v1 }
 0x489   :  { %v4711_v14 = vadd.f32 %v1174_v6, %v4485_v26  ;;  %v3541_v29 = vpop.f32.mrb[30].mxu0 }
 0x48a   :  { %v3524_v35 = vpop.f32.mrb[52].mxu1  ;;  %v1177_v48 = vpop.f32.mrb[31].mxu0  ;;  %v4722_v56 = vadd.f32 %v3541_v29, %v4457_v10  ;;  %v1320_v4 = vsel %vm721_vm4, %v4714_v12, -inf }
 0x48b   :  { %v4717_v49 = vadd.f32 %v1177_v48, %v4471_v20  ;;  %v1045_v24 = vpop.f32.mrb[53].mxu1  ;;  %v1314_v61 = vsel %vm721_vm4, %v4711_v14, -inf }
 0x48c   :  { %v3525_v9 = vpop.f32.mrb[54].mxu1  ;;  %1315 = vmax.xlane.f32.xlu0 %v1314_v61  ;;  %v1323_v55 = vsel %vm721_vm4, %v4722_v56, -inf }
 0x48d   :  { %v1067_v27 = vpack.c.bf16 %v3525_v9, %v3524_v35  ;;  %v1048_v51 = vpop.f32.mrb[55].mxu1  ;;  %v1317_v18 = vsel %vm721_vm4, %v4717_v49, -inf }
 0x48e   :  { %v1066_v32 = vpack.c.bf16 %v1048_v51, %v1045_v24  ;;  %1318 = vmax.xlane.f32.xlu1 %v1317_v18 }
 0x48f   :  { %1075 = vst.msk [vmem:[#allocation2 + $0x38] sm:$0xff] %vm542_vm0, %v1067_v27 }
 0x490   :  { %1074 = vst.msk [vmem:[#allocation2 + $0x30] sm:$0xff] %vm542_vm0, %v1066_v32  ;;  %1321 = vmax.xlane.f32.xlu0 %v1320_v4 }
 0x492   :  { %v4732_v38 = vpop.f32.mrb[56].mxu1  ;;  %1324 = vmax.xlane.f32.xlu1 %v1323_v55 }
 0x493   :  { %v4734_v19 = vpop.f32.mrb[57].mxu1 }
 0x494   :  { %v4736_v15 = vpop.f32.mrb[58].mxu1 }
 0x495   :  { %v4738_v31 = vpop.f32.mrb[59].mxu1 }
 0x49a   :  { %v4740_v25 = vpop.f32.mrb[60].mxu1 }
 0x49b   :  { %v4742_v59 = vpop.f32.mrb[61].mxu1 }
 0x49c   :  { %v4744_v17 = vpop.f32.mrb[62].mxu1 }
 0x49d   :  { %v4746_v13 = vpop.f32.mrb[63].mxu1 }
 0x4a3   :  { %1492 = vrot.lane.b32.xlu1 %v4360_v28, %s4219_s2 }
 0x4a6   :  { %1490 = vrot.lane.b32.xlu0 %v4362_v30, %s4219_s2 }
 0x4a7   :  { %1496 = vrot.lane.b32.xlu1 %v4375_v34, %s4219_s2 }
 0x4aa   :  { %1494 = vrot.lane.b32.xlu0 %v4377_v36, %s4219_s2 }
 0x4ab   :  { %1585 = vrot.lane.b32.xlu1 %v4387_v42, %s4219_s2 }
 0x4ae   :  { %1583 = vrot.lane.b32.xlu0 %v4390_v46, %s4219_s2 }
 0x4af   :  { %1729 = vrot.lane.b32.xlu1 %v4296_v43, %s4214_s1 }
 0x4b2   :  { %1589 = vrot.lane.b32.xlu0 %v4393_v50, %s4219_s2 }
 0x4b3   :  { %1587 = vrot.lane.b32.xlu1 %v4395_v52, %s4219_s2 }
 0x4b7   :  { %1731 = vrot.lane.b32.xlu1 %v4316_v57, %s4214_s1 }
 0x4f2   :  { %v1304_v41 = vpop.xlane.xlu0 %1303 }
 0x4f3   :  { %v1350_v60 = vsub.f32 %v4689_v45, %v1304_v41 }
 0x4f4   :  { %v1307_v37 = vpop.xlane.xlu1 %1306 }
 0x4f5   :  { %v1366_v47 = vmul.f32 1.442695, %v1350_v60  ;;  %v1351_v6 = vsub.f32 %v4695_v0, %v1307_v37 }
 0x4f6   :  { %v1310_v62 = vpop.xlane.xlu0 %1309 }
 0x4f7   :  { %v1352_v23 = vsub.f32 %v4692_v16, %v1310_v62  ;;  %v1368_v24 = vmul.f32 1.442695, %v1351_v6 }
 0x4f9   :  { %v1370_v29 = vmul.f32 1.442695, %v1352_v23 }
 0x4fa   :  { %v1313_v35 = vpop.xlane.xlu0 %1312 }
 0x4fb   :  { %3924 = vpow2.f32 %v1370_v29  ;;  %v1353_v48 = vsub.f32 %v4702_v11, %v1313_v35 }
 0x4fc   :  { %3926 = vpow2.f32 %v1366_v47 }
 0x4fd   :  { %v1372_v61 = vmul.f32 1.442695, %v1353_v48 }
 0x4ff   :  { %3928 = vpow2.f32 %v1372_v61 }
 0x500   :  { %3930 = vpow2.f32 %v1368_v24 }
 0x505   :  { %v4772_v9 = vpop.eup %3924 }
 0x506   :  { %v1404_v45 = vsel %vm721_vm4, %v4772_v9, 0.0  ;;  %v4776_v27 = vpop.eup %3926 }
 0x507   :  { %1405 = vadd.xlane.f32.xlu0 %v1404_v45  ;;  %v1398_v0 = vsel %vm721_vm4, %v4776_v27, 0.0 }
 0x509   :  { %v4778_v16 = vpop.eup %3928 }
 0x50a   :  { %v1407_v11 = vsel %vm721_vm4, %v4778_v16, 0.0  ;;  %v4784_v51 = vpop.eup %3930 }
 0x50b   :  { %1399 = vadd.xlane.f32.xlu0 %v1398_v0  ;;  %1408 = vadd.xlane.f32.xlu1 %v1407_v11  ;;  %v1401_v18 = vsel %vm721_vm4, %v4784_v51, 0.0 }
 0x50f   :  { %1402 = vadd.xlane.f32.xlu1 %v1401_v18 }
 0x519   :  { %v1316_v32 = vpop.xlane.xlu0 %1315 }
 0x51a   :  { %v1354_v55 = vsub.f32 %v4711_v14, %v1316_v32 }
 0x51b   :  { %v1319_v4 = vpop.xlane.xlu1 %1318 }
 0x51c   :  { %v1355_v41 = vsub.f32 %v4717_v49, %v1319_v4  ;;  %v1374_v47 = vmul.f32 1.442695, %v1354_v55 }
 0x51d   :  { %v1322_v60 = vpop.xlane.xlu0 %1321 }
 0x51e   :  { %v1376_v37 = vmul.f32 1.442695, %v1355_v41  ;;  %v1356_v62 = vsub.f32 %v4714_v12, %v1322_v60 }
 0x51f   :  { %v1325_v23 = vpop.xlane.xlu1 %1324 }
 0x520   :  { %3932 = vpow2.f32 %v1376_v37  ;;  %v1378_v6 = vmul.f32 1.442695, %v1356_v62  ;;  %v1357_v29 = vsub.f32 %v4722_v56, %v1325_v23  ;;  %v4796_v56 = vadd.f32 %v4736_v15, %v4409_v5 }
 0x521   :  { %v1491_v35 = vpop.permute.xlu0 %1490  ;;  %v4808_v15 = vadd.f32 %v4738_v31, %v4439_v33  ;;  %v4821_v62 = vadd.f32 %v4732_v38, %v4403_v63  ;;  %v4833_v38 = vadd.f32 %v4740_v25, %v4454_v1  ;;  %v4853_v25 = vadd.f32 %v4744_v17, %v4457_v10 }
 0x522   :  { %3934 = vpow2.f32 %v1378_v6  ;;  %3558 = vmatprep.subr.bf16.mxu0 %v1491_v35  ;;  %v1380_v24 = vmul.f32 1.442695, %v1357_v29  ;;  %v1335_v55 = vsel %vm721_vm4, %v4796_v56, -inf  ;;  %v4827_v6 = vadd.f32 %v4734_v19, %v4406_v2 }
 0x523   :  { %v1493_v48 = vpop.permute.xlu1 %1492  ;;  %3559 = vmatpush3.bf16.msra.mxu0 %v1491_v35  ;;  %3936 = vpow2.f32 %v1374_v47  ;;  %v1329_v31 = vsel %vm721_vm4, %v4808_v15, -inf  ;;  %v1332_v29 = vsel %vm721_vm4, %v4821_v62, -inf  ;;  %v1344_v19 = vsel %vm721_vm4, %v4833_v38, -inf }
 0x524   :  { %3560 = vmatprep.subr.bf16.mxu0 %v1493_v48  ;;  %3938 = vpow2.f32 %v1380_v24  ;;  %v1326_v35 = vsel %vm721_vm4, %v4827_v6, -inf }
 0x525   :  { %v1495_v14 = vpop.permute.xlu0 %1494 }
 0x527   :  { %v1497_v49 = vpop.permute.xlu1 %1496  ;;  %3561 = vmatpush3.bf16.msra.mxu0 %v1493_v48  ;;  %v4839_v48 = vadd.f32 %v4742_v59, %v4485_v26  ;;  %v4857_v59 = vadd.f32 %v4746_v13, %v4471_v20 }
 0x528   :  { %3562 = vmatprep.subr.bf16.mxu0 %v1495_v14 }
 0x529   :  { %v1584_v12 = vpop.permute.xlu0 %1583  ;;  %v1338_v24 = vsel %vm721_vm4, %v4839_v48, -inf }
 0x52a   :  { %v4792_v61 = vpop.eup %3932  ;;  %3574 = vmatprep.subr.bf16.mxu1 %v1584_v12 }
 0x52b   :  { %v1586_v45 = vpop.permute.xlu1 %1585  ;;  %3563 = vmatpush3.bf16.msra.mxu0 %v1495_v14  ;;  %3575 = vmatpush3.bf16.msra.mxu1 %v1584_v12  ;;  %v1413_v0 = vsel %vm721_vm4, %v4792_v61, 0.0  ;;  %v1347_v14 = vsel %vm721_vm4, %v4853_v25, -inf }
 0x52c   :  { %v4800_v11 = vpop.eup %3934  ;;  %1414 = vadd.xlane.f32.xlu1 %v1413_v0  ;;  %3564 = vmatprep.subr.bf16.mxu0 %v1497_v49 }
 0x52d   :  { %3576 = vmatprep.subr.bf16.mxu1 %v1586_v45  ;;  %v1416_v18 = vsel %vm721_vm4, %v4800_v11, 0.0  ;;  %v4804_v32 = vpop.eup %3936  ;;  %v1590_v23 = vpop.permute.xlu0 %1589 }
 0x52e   :  { %1417 = vadd.xlane.f32.xlu0 %v1416_v18  ;;  %v1410_v41 = vsel %vm721_vm4, %v4804_v32, 0.0  ;;  %v4815_v60 = vpop.eup %3938 }
 0x52f   :  { %v1730_v4 = vpop.permute.xlu1 %1729  ;;  %3565 = vmatpush3.bf16.msra.mxu0 %v1497_v49  ;;  %3577 = vmatpush3.bf16.msra.mxu1 %v1586_v45  ;;  %v1419_v47 = vsel %vm721_vm4, %v4815_v60, 0.0  ;;  %v1341_v49 = vsel %vm721_vm4, %v4857_v59, -inf }
 0x530   :  { %1336 = vmax.xlane.f32.xlu1 %v1335_v55  ;;  %3782 = vmatprep.subr.msk.bf16.mxu0 %vm542_vm0, %v1730_v4 }
 0x532   :  { %1411 = vadd.xlane.f32.xlu0 %v1410_v41 }
 0x533   :  { %v1588_v37 = vpop.permute.xlu1 %1587 }
 0x534   :  { %1330 = vmax.xlane.f32.xlu1 %v1329_v31  ;;  %3578 = vmatprep.subr.bf16.mxu1 %v1588_v37 }
 0x535   :  { %3579 = vmatpush3.bf16.msra.mxu1 %v1588_v37 }
 0x536   :  { %1420 = vadd.xlane.f32.xlu0 %v1419_v47  ;;  %3580 = vmatprep.subr.bf16.mxu1 %v1590_v23 }
 0x537   :  { %v1732_v12 = vpop.permute.xlu1 %1731 }
 0x539   :  { %3581 = vmatpush3.bf16.msra.mxu1 %v1590_v23 }
 0x53a   :  { %1333 = vmax.xlane.f32.xlu0 %v1332_v29 }
 0x53e   :  { %1327 = vmax.xlane.f32.xlu0 %v1326_v35 }
 0x542   :  { %1345 = vmax.xlane.f32.xlu0 %v1344_v19 }
 0x545   :  { %1834 = vrot.lane.b32.xlu1 %v4298_v44, %s4214_s1 }
 0x546   :  { %1339 = vmax.xlane.f32.xlu0 %v1338_v24  ;;  %v1750_v24 = vsel %vm542_vm0, %v1730_v4, 0 }
 0x549   :  { %1735 = vrot.lane.b32.xlu1 %v4348_v21, %s4214_s1 }
 0x55c   :  { %1733 = vrot.lane.b32.xlu0 %v4332_v7, %s4214_s1 }
 0x56d   :  { %1348 = vmax.xlane.f32.xlu1 %v1347_v14  ;;  %v1753_v14 = vsel %vm542_vm0, %v1732_v12, 0 }
 0x571   :  { %1342 = vmax.xlane.f32.xlu1 %v1341_v49 }
 0x582   :  { %1836 = vrot.lane.b32.xlu1 %v4318_v58, %s4214_s1 }
 0x594   :  { %v1406_v45 = vpop.xlane.xlu0 %1405 }
 0x598   :  { %v1409_v0 = vpop.xlane.xlu1 %1408  ;;  %v1400_v17 = vpop.xlane.xlu0 %1399 }
 0x599   :  { %3940 = vrcp.f32 %v1409_v0 }
 0x59a   :  { %3942 = vrcp.f32 %v1400_v17 }
 0x59b   :  { %3944 = vrcp.f32 %v1406_v45 }
 0x59c   :  { %v1403_v13 = vpop.xlane.xlu1 %1402 }
 0x59d   :  { %3946 = vrcp.f32 %v1403_v13 }
 0x5a3   :  { %v3941_v18 = vpop.eup %3940 }
 0x5a4   :  { %v3943_v55 = vpop.eup %3942  ;;  %v1465_v31 = vmul.f32 %v3941_v18, %v4778_v16 }
 0x5a5   :  { %v3945_v41 = vpop.eup %3944  ;;  %v1462_v23 = vmul.f32 %v3943_v55, %v4776_v27 }
 0x5a6   :  { %v1464_v29 = vmul.f32 %v3945_v41, %v4772_v9 }
 0x5a7   :  { %v3947_v37 = vpop.eup %3946 }
 0x5a8   :  { %v1463_v47 = vmul.f32 %v3947_v37, %v4784_v51  ;;  %v1479_v19 = vpack.c.bf16 %v1465_v31, %v1464_v29 }
 0x5aa   :  { %v1478_v35 = vpack.c.bf16 %v1463_v47, %v1462_v23 }
 0x5ac   :  { %3566 = vmatprep.mubr.msk.bf16.mxu0 %vm721_vm4, %v1478_v35 }
 0x5ad   :  { %3567 = vmatmul.mubr.msk.bf16.vlgmr.msra.gmra.mrb[32].mxu0 %vm721_vm4, %v1479_v19 }
 0x5ae   :  { %3591 = vmatpush3.bf16.xpose.msra.mxu0 %v1750_v24 }
 0x5af   :  { %3783 = vmatprep.subr.msk.bf16.mxu0 %vm542_vm0, %v1732_v12 }
 0x5b6   :  { %3593 = vmatpush3.bf16.xpose.msra.mxu0 %v1753_v14 }
 0x5b9   :  { %v1415_v16 = vpop.xlane.xlu1 %1414 }
 0x5ba   :  { %3948 = vrcp.f32 %v1415_v16 }
 0x5bb   :  { %v1418_v27 = vpop.xlane.xlu0 %1417 }
 0x5bd   :  { %v1337_v49 = vpop.xlane.xlu1 %1336 }
 0x5be   :  { %v1361_v41 = vsub.f32 %v4796_v56, %v1337_v49 }
 0x5bf   :  { %v1412_v51 = vpop.xlane.xlu0 %1411 }
 0x5c0   :  { %3950 = vrcp.f32 %v1412_v51  ;;  %v1388_v24 = vmul.f32 1.442695, %v1361_v41 }
 0x5c1   :  { %v1331_v9 = vpop.xlane.xlu1 %1330  ;;  %3952 = vrcp.f32 %v1418_v27 }
 0x5c2   :  { %v1359_v45 = vsub.f32 %v4808_v15, %v1331_v9 }
 0x5c3   :  { %v1421_v0 = vpop.xlane.xlu0 %1420 }
 0x5c4   :  { %v1384_v17 = vmul.f32 1.442695, %v1359_v45  ;;  %3954 = vrcp.f32 %v1421_v0  ;;  %v3949_v13 = vpop.eup %3948 }
 0x5c5   :  { %v4875_v4 = vpop.permute.xlu1 %1834  ;;  %v1467_v23 = vmul.f32 %v3949_v13, %v4792_v61 }
 0x5c6   :  { %3956 = vpow2.f32 %v1384_v17  ;;  %3786 = vmatprep.subr.msk.bf16.mxu1 %vm542_vm0, %v4875_v4 }
 0x5c7   :  { %v1334_v12 = vpop.xlane.xlu0 %1333 }
 0x5c8   :  { %v1360_v18 = vsub.f32 %v4821_v62, %v1334_v12 }
 0x5c9   :  { %v1736_v9 = vpop.permute.xlu1 %1735 }
 0x5ca   :  { %v3951_v55 = vpop.eup %3950  ;;  %v1386_v37 = vmul.f32 1.442695, %v1360_v18  ;;  %v1759_v13 = vsel %vm542_vm0, %v1736_v9, 0 }
 0x5cb   :  { %v1328_v31 = vpop.xlane.xlu0 %1327  ;;  %v1466_v15 = vmul.f32 %v3951_v55, %v4804_v32  ;;  %v3953_v47 = vpop.eup %3952 }
 0x5cc   :  { %3958 = vpow2.f32 %v1386_v37  ;;  %v1358_v29 = vsub.f32 %v4827_v6, %v1328_v31  ;;  %v1468_v16 = vmul.f32 %v3953_v47, %v4800_v11 }
 0x5cd   :  { %v1480_v35 = vpack.c.bf16 %v1467_v23, %v1466_v15 }
 0x5ce   :  { %v3955_v19 = vpop.eup %3954  ;;  %v1382_v14 = vmul.f32 1.442695, %v1358_v29 }
 0x5cf   :  { %3570 = vmatprep.mubr.msk.bf16.mxu0 %vm721_vm4, %v1480_v35  ;;  %v1346_v62 = vpop.xlane.xlu0 %1345  ;;  %v1469_v56 = vmul.f32 %v3955_v19, %v4815_v60 }
 0x5d0   :  { %v4887_v27 = vpop.eup %3956  ;;  %3960 = vpow2.f32 %v1382_v14  ;;  %v1364_v18 = vsub.f32 %v4833_v38, %v1346_v62 }
 0x5d1   :  { %v1425_v61 = vsel %vm721_vm4, %v4887_v27, 0.0  ;;  %v1481_v32 = vpack.c.bf16 %v1469_v56, %v1468_v16  ;;  %3962 = vpow2.f32 %v1388_v24  ;;  %v5651_v16 = vld [vmem:[#allocation14_spill] sm:$0xff]  ;;  %v5652_v56 = vld [vmem:[#allocation13_spill] sm:$0xff] }
 0x5d2   :  { %1426 = vadd.xlane.f32.xlu0 %v1425_v61  ;;  %v1394_v55 = vmul.f32 1.442695, %v1364_v18  ;;  %v5653_v61 = vld [vmem:[#allocation15_spill] sm:$0xff] }
 0x5d3   :  { %3571 = vmatmul.mubr.msk.bf16.gmra.mrb[36].mxu0 %vm721_vm4, %v1481_v32  ;;  %v1340_v6 = vpop.xlane.xlu0 %1339 }
 0x5d4   :  { %v1362_v41 = vsub.f32 %v4839_v48, %v1340_v6  ;;  %3964 = vpow2.f32 %v1394_v55 }
 0x5d6   :  { %v4892_v49 = vpop.eup %3958  ;;  %v1390_v37 = vmul.f32 1.442695, %v1362_v41 }
 0x5d7   :  { %v1734_v51 = vpop.permute.xlu0 %1733  ;;  %v1428_v11 = vsel %vm721_vm4, %v4892_v49, 0.0 }
 0x5d8   :  { %1429 = vadd.xlane.f32.xlu1 %v1428_v11  ;;  %3784 = vmatprep.subr.msk.bf16.mxu0 %vm542_vm0, %v1734_v51  ;;  %v1756_v60 = vsel %vm542_vm0, %v1734_v51, 0  ;;  %3966 = vpow2.f32 %v1390_v37 }
 0x5d9   :  { %3595 = vmatpush3.bf16.xpose.msra.mxu0 %v1756_v60 }
 0x5da   :  { %v3961_v45 = vpop.eup %3960  ;;  %3785 = vmatprep.subr.msk.bf16.mxu0 %vm542_vm0, %v1736_v9 }
 0x5db   :  { %v1422_v0 = vsel %vm721_vm4, %v3961_v45, 0.0  ;;  %v4900_v17 = vpop.eup %3962 }
 0x5dc   :  { %1423 = vadd.xlane.f32.xlu1 %v1422_v0  ;;  %v1431_v12 = vsel %vm721_vm4, %v4900_v17, 0.0 }
 0x5de   :  { %v4913_v35 = vpop.eup %3964 }
 0x5df   :  { %v1440_v19 = vsel %vm721_vm4, %v4913_v35, 0.0 }
 0x5e0   :  { %1432 = vadd.xlane.f32.xlu1 %v1431_v12 }
 0x5e1   :  { %3597 = vmatpush3.bf16.xpose.msra.mxu0 %v1759_v13 }
 0x5e2   :  { %v4917_v24 = vpop.eup %3966 }
 0x5e3   :  { %v1434_v48 = vsel %vm721_vm4, %v4917_v24, 0.0 }
 0x5e8   :  { %1721 = vrot.lane.b32.xlu0 %v4292_v39, %s4214_s1 }
 0x5f1   :  { %1723 = vrot.lane.b32.xlu1 %v4312_v53, %s4214_s1 }
 0x5fa   :  { %v1349_v31 = vpop.xlane.xlu1 %1348 }
 0x5fb   :  { %v1365_v15 = vsub.f32 %v4853_v25, %v1349_v31 }
 0x5fd   :  { %v1396_v23 = vmul.f32 1.442695, %v1365_v15 }
 0x5fe   :  { %v1343_v47 = vpop.xlane.xlu1 %1342 }
 0x5ff   :  { %v1363_v29 = vsub.f32 %v4857_v59, %v1343_v47  ;;  %3968 = vpow2.f32 %v1396_v23 }
 0x601   :  { %v1392_v38 = vmul.f32 1.442695, %v1363_v29  ;;  %v1855_v29 = vsel %vm542_vm0, %v4875_v4, 0 }
 0x602   :  { %v1837_v6 = vpop.permute.xlu1 %1836 }
 0x603   :  { %3970 = vpow2.f32 %v1392_v38 }
 0x607   :  { %1441 = vadd.xlane.f32.xlu0 %v1440_v19 }
 0x609   :  { %v4921_v25 = vpop.eup %3968 }
 0x60a   :  { %v1443_v59 = vsel %vm721_vm4, %v4921_v25, 0.0 }
 0x60b   :  { %1435 = vadd.xlane.f32.xlu0 %v1434_v48  ;;  %v1858_v48 = vsel %vm542_vm0, %v1837_v6, 0 }
 0x60d   :  { %v4925_v14 = vpop.eup %3970 }
 0x60e   :  { %v1437_v62 = vsel %vm721_vm4, %v4925_v14, 0.0 }
 0x60f   :  { %1444 = vadd.xlane.f32.xlu0 %v1443_v59 }
 0x615   :  { %1438 = vadd.xlane.f32.xlu1 %v1437_v62 }
 0x625   :  { %1838 = vrot.lane.b32.xlu0 %v4334_v8, %s4214_s1 }
 0x626   :  { %1840 = vrot.lane.b32.xlu1 %v4350_v22, %s4214_s1 }
 0x629   :  { %1826 = vrot.lane.b32.xlu0 %v4294_v40, %s4214_s1 }
 0x62a   :  { %1828 = vrot.lane.b32.xlu1 %v4314_v54, %s4214_s1 }
 0x62d   :  { %1725 = vrot.lane.b32.xlu0 %v4328_v3, %s4214_s1 }
 0x62e   :  { %1727 = vrot.lane.b32.xlu1 %v5651_v16, %s4214_s1 }
 0x631   :  { %1830 = vrot.lane.b32.xlu0 %v5652_v56, %s4214_s1 }
 0x632   :  { %1832 = vrot.lane.b32.xlu1 %v5653_v61, %s4214_s1 }
 0x65f   :  { %v1427_v32 = vpop.xlane.xlu0 %1426 }
 0x660   :  { %3972 = vrcp.f32 %v1427_v32 }
 0x663   :  { %v1722_v51 = vpop.permute.xlu0 %1721 }
 0x664   :  { %3598 = vmatprep.mubr.msk.bf16.mxu0 %vm542_vm0, %v1722_v51 }
 0x665   :  { %v1430_v11 = vpop.xlane.xlu1 %1429 }
 0x669   :  { %v1424_v60 = vpop.xlane.xlu1 %1423 }
 0x66a   :  { %3974 = vrcp.f32 %v1424_v60  ;;  %v3973_v12 = vpop.eup %3972 }
 0x66b   :  { %3976 = vrcp.f32 %v1430_v11  ;;  %v1471_v55 = vmul.f32 %v3973_v12, %v4887_v27 }
 0x66d   :  { %v1433_v9 = vpop.xlane.xlu1 %1432 }
 0x66e   :  { %3978 = vrcp.f32 %v1433_v9 }
 0x671   :  { %v1724_v0 = vpop.permute.xlu1 %1723 }
 0x672   :  { %3599 = vmatmul.mubr.msk.bf16.vlgmr.msra.gmra.mrb[40].mxu0 %vm542_vm0, %v1724_v0 }
 0x674   :  { %v3975_v13 = vpop.eup %3974 }
 0x675   :  { %v1470_v18 = vmul.f32 %v3975_v13, %v3961_v45  ;;  %v3977_v41 = vpop.eup %3976 }
 0x676   :  { %v1472_v15 = vmul.f32 %v3977_v41, %v4892_v49 }
 0x677   :  { %v1482_v37 = vpack.c.bf16 %v1471_v55, %v1470_v18 }
 0x678   :  { %v3979_v31 = vpop.eup %3978 }
 0x679   :  { %v1473_v23 = vmul.f32 %v3979_v31, %v4900_v17  ;;  %3582 = vmatprep.mubr.msk.bf16.mxu1 %vm721_vm4, %v1482_v37 }
 0x67b   :  { %v1483_v47 = vpack.c.bf16 %v1473_v23, %v1472_v15 }
 0x67d   :  { %3583 = vmatmul.mubr.msk.bf16.vlgmr.msra.gmra.mrb[64].mxu1 %vm721_vm4, %v1483_v47 }
 0x67e   :  { %3607 = vmatpush3.bf16.xpose.msra.mxu1 %v1855_v29 }
 0x67f   :  { %3787 = vmatprep.subr.msk.bf16.mxu1 %vm542_vm0, %v1837_v6 }
 0x680   :  { %v4955_v45 = vpop.f32.mrb[32].mxu0 }
 0x681   :  { %v4957_v27 = vpop.f32.mrb[33].mxu0 }
 0x682   :  { %v4959_v38 = vpop.f32.mrb[34].mxu0 }
 0x683   :  { %v4963_v17 = vpop.f32.mrb[35].mxu0 }
 0x686   :  { %3609 = vmatpush3.bf16.xpose.msra.mxu1 %v1858_v48 }
 0x694   :  { %v1442_v4 = vpop.xlane.xlu0 %1441 }
 0x698   :  { %v1436_v59 = vpop.xlane.xlu0 %1435 }
 0x69c   :  { %v1445_v62 = vpop.xlane.xlu0 %1444 }
 0x69d   :  { %3980 = vrcp.f32 %v1445_v62 }
 0x69e   :  { %3982 = vrcp.f32 %v1436_v59 }
 0x69f   :  { %3984 = vrcp.f32 %v1442_v4 }
 0x6a0   :  { %v1839_v32 = vpop.permute.xlu0 %1838 }
 0x6a1   :  { %3788 = vmatprep.subr.msk.bf16.mxu1 %vm542_vm0, %v1839_v32  ;;  %v1861_v51 = vsel %vm542_vm0, %v1839_v32, 0 }
 0x6a2   :  { %v1439_v11 = vpop.xlane.xlu1 %1438  ;;  %3611 = vmatpush3.bf16.xpose.msra.mxu1 %v1861_v51 }
 0x6a3   :  { %3986 = vrcp.f32 %v1439_v11 }
 0x6a4   :  { %v1827_v60 = vpop.permute.xlu0 %1826 }
 0x6a6   :  { %v4970_v9 = vpop.f32.mrb[36].mxu0  ;;  %v1841_v0 = vpop.permute.xlu1 %1840 }
 0x6a7   :  { %5654 = vst [vmem:[#allocation14_spill] sm:$0xff] %v4970_v9  ;;  %v4972_v6 = vpop.f32.mrb[37].mxu0  ;;  %3789 = vmatprep.subr.msk.bf16.mxu1 %vm542_vm0, %v1841_v0  ;;  %v1864_v41 = vsel %vm542_vm0, %v1841_v0, 0  ;;  %v3981_v37 = vpop.eup %3980 }
 0x6a8   :  { %5655 = vst [vmem:[#allocation13_spill] sm:$0xff] %v4972_v6  ;;  %v4975_v12 = vpop.f32.mrb[38].mxu0  ;;  %v1726_v13 = vpop.permute.xlu0 %1725  ;;  %v1477_v48 = vmul.f32 %v3981_v37, %v4921_v25 }
 0x6a9   :  { %5656 = vst [vmem:[#allocation15_spill] sm:$0xff] %v4975_v12  ;;  %v4979_v55 = vpop.f32.mrb[39].mxu0  ;;  %3602 = vmatprep.mubr.msk.bf16.mxu0 %vm542_vm0, %v1726_v13  ;;  %v3983_v23 = vpop.eup %3982 }
 0x6aa   :  { %5657 = vst [vmem:[#allocation16_spill] sm:$0xff] %v4979_v55  ;;  %v1829_v15 = vpop.permute.xlu1 %1828  ;;  %3613 = vmatpush3.bf16.xpose.msra.mxu1 %v1864_v41  ;;  %v3985_v47 = vpop.eup %3984  ;;  %v1474_v59 = vmul.f32 %v3983_v23, %v4917_v24 }
 0x6ab   :  { %v1476_v32 = vmul.f32 %v3985_v47, %v4913_v35 }
 0x6ac   :  { %v1831_v0 = vpop.permute.xlu0 %1830 }
 0x6ad   :  { %v3987_v29 = vpop.eup %3986  ;;  %v1485_v11 = vpack.c.bf16 %v1477_v48, %v1476_v32 }
 0x6ae   :  { %v1728_v4 = vpop.permute.xlu1 %1727  ;;  %v1475_v62 = vmul.f32 %v3987_v29, %v4925_v14 }
 0x6af   :  { %3603 = vmatmul.mubr.msk.bf16.gmra.mrb[44].mxu0 %vm542_vm0, %v1728_v4 }
 0x6b0   :  { %v1484_v51 = vpack.c.bf16 %v1475_v62, %v1474_v59 }
 0x6b2   :  { %3586 = vmatprep.mubr.msk.bf16.mxu1 %vm721_vm4, %v1484_v51  ;;  %v1833_v24 = vpop.permute.xlu1 %1832 }
 0x6b3   :  { %3587 = vmatmul.mubr.msk.bf16.gmra.mrb[68].mxu1 %vm721_vm4, %v1485_v11 }
 0x6b4   :  { %3614 = vmatprep.mubr.msk.bf16.mxu1 %vm542_vm0, %v1827_v60 }
 0x6bb   :  { %3615 = vmatmul.mubr.msk.bf16.vlgmr.msra.gmra.mrb[72].mxu1 %vm542_vm0, %v1829_v15 }
 0x6bc   :  { %3618 = vmatprep.mubr.msk.bf16.mxu1 %vm542_vm0, %v1831_v0 }
 0x6c3   :  { %3619 = vmatmul.mubr.msk.bf16.gmra.mrb[76].mxu1 %vm542_vm0, %v1833_v24 }
 0x745   :  { %v3600_v25 = vpop.f32.mrb[40].mxu0 }
 0x746   :  { %v1795_v14 = vpop.f32.mrb[41].mxu0  ;;  %v5000_v37 = vadd.f32 %v3600_v25, %v4403_v63 }
 0x747   :  { %v4997_v35 = vadd.f32 %v1795_v14, %v4406_v2  ;;  %v3601_v13 = vpop.f32.mrb[42].mxu0 }
 0x748   :  { %v1798_v41 = vpop.f32.mrb[43].mxu0  ;;  %v5010_v47 = vadd.f32 %v3601_v13, %v4409_v5  ;;  %v1937_v29 = vsel %vm721_vm4, %v5000_v37, -inf }
 0x749   :  { %v5003_v60 = vadd.f32 %v1798_v41, %v4439_v33  ;;  %v1931_v15 = vsel %vm721_vm4, %v4997_v35, -inf }
 0x74a   :  { %1932 = vmax.xlane.f32.xlu0 %v1931_v15  ;;  %v1940_v59 = vsel %vm721_vm4, %v5010_v47, -inf }
 0x74b   :  { %v1934_v23 = vsel %vm721_vm4, %v5003_v60, -inf }
 0x74c   :  { %1935 = vmax.xlane.f32.xlu1 %v1934_v23 }
 0x74e   :  { %1938 = vmax.xlane.f32.xlu0 %v1937_v29 }
 0x750   :  { %v5014_v48 = vpop.f32.mrb[64].mxu1 }
 0x751   :  { %5658 = vst [vmem:[#allocation17_spill] sm:$0xff] %v5014_v48  ;;  %v5016_v4 = vpop.f32.mrb[65].mxu1 }
 0x752   :  { %5659 = vst [vmem:[#allocation18_spill] sm:$0xff] %v5016_v4  ;;  %v5020_v62 = vpop.f32.mrb[66].mxu1  ;;  %1941 = vmax.xlane.f32.xlu0 %v1940_v59 }
 0x753   :  { %5660 = vst [vmem:[#allocation19_spill] sm:$0xff] %v5020_v62  ;;  %v5024_v51 = vpop.f32.mrb[67].mxu1 }
 0x754   :  { %5661 = vst [vmem:[#allocation20_spill] sm:$0xff] %v5024_v51 }
 0x782   :  { %v3604_v0 = vpop.f32.mrb[44].mxu0 }
 0x783   :  { %v1811_v24 = vpop.f32.mrb[45].mxu0  ;;  %v5032_v41 = vadd.f32 %v3604_v0, %v4454_v1 }
 0x784   :  { %v5029_v25 = vadd.f32 %v1811_v24, %v4485_v26  ;;  %v3605_v14 = vpop.f32.mrb[46].mxu0 }
 0x785   :  { %v1814_v13 = vpop.f32.mrb[47].mxu0  ;;  %v5044_v11 = vadd.f32 %v3605_v14, %v4457_v10 }
 0x786   :  { %v5035_v15 = vadd.f32 %v1814_v13, %v4471_v20  ;;  %v5037_v23 = vpop.f32.mrb[68].mxu1  ;;  %v1943_v29 = vsel %vm721_vm4, %v5029_v25, -inf }
 0x787   :  { %5662 = vst [vmem:[#allocation21_spill] sm:$0xff] %v5037_v23  ;;  %v5041_v59 = vpop.f32.mrb[69].mxu1  ;;  %1944 = vmax.xlane.f32.xlu0 %v1943_v29  ;;  %v1949_v29 = vsel %vm721_vm4, %v5032_v41, -inf  ;;  %v1952_v14 = vsel %vm721_vm4, %v5044_v11, -inf }
 0x788   :  { %5663 = vst [vmem:[#allocation22_spill] sm:$0xff] %v5041_v59  ;;  %v5046_v24 = vpop.f32.mrb[70].mxu1  ;;  %v1946_v0 = vsel %vm721_vm4, %v5035_v15, -inf }
 0x789   :  { %5664 = vst [vmem:[#allocation23_spill] sm:$0xff] %v5046_v24  ;;  %v5052_v32 = vpop.f32.mrb[71].mxu1  ;;  %1947 = vmax.xlane.f32.xlu1 %v1946_v0 }
 0x78a   :  { %5665 = vst [vmem:[#allocation24_spill] sm:$0xff] %v5052_v32 }
 0x78b   :  { %1950 = vmax.xlane.f32.xlu0 %v1949_v29 }
 0x78d   :  { %1953 = vmax.xlane.f32.xlu1 %v1952_v14 }
 0x78e   :  { %v5060_v18 = vpop.f32.mrb[72].mxu1 }
 0x78f   :  { %v5062_v19 = vpop.f32.mrb[73].mxu1 }
 0x790   :  { %v5064_v49 = vpop.f32.mrb[74].mxu1 }
 0x791   :  { %v5066_v13 = vpop.f32.mrb[75].mxu1 }
 0x796   :  { %v5068_v0 = vpop.f32.mrb[76].mxu1 }
 0x797   :  { %v5070_v23 = vpop.f32.mrb[77].mxu1 }
 0x798   :  { %v5072_v31 = vpop.f32.mrb[78].mxu1 }
 0x799   :  { %v5074_v59 = vpop.f32.mrb[79].mxu1 }
 0x79e   :  { %2117 = vrot.lane.b32.xlu1 %v4360_v28, %s4214_s1 }
 0x7a1   :  { %2115 = vrot.lane.b32.xlu0 %v4362_v30, %s4214_s1 }
 0x7a2   :  { %2121 = vrot.lane.b32.xlu1 %v4375_v34, %s4214_s1 }
 0x7a5   :  { %2119 = vrot.lane.b32.xlu0 %v4377_v36, %s4214_s1 }
 0x7a6   :  { %2206 = vrot.lane.b32.xlu1 %v4387_v42, %s4214_s1 }
 0x7a9   :  { %2204 = vrot.lane.b32.xlu0 %v4390_v46, %s4214_s1 }
 0x7aa   :  { %2350 = vrot.lane.b32.xlu1 %v4296_v43, %s4220_s23 }
 0x7ad   :  { %2210 = vrot.lane.b32.xlu0 %v4393_v50, %s4214_s1 }
 0x7ae   :  { %2208 = vrot.lane.b32.xlu1 %v4395_v52, %s4214_s1 }
 0x7b1   :  { %2354 = vrot.lane.b32.xlu0 %v4332_v7, %s4220_s23 }
 0x7b2   :  { %2352 = vrot.lane.b32.xlu1 %v4316_v57, %s4220_s23 }
 0x7b6   :  { %2455 = vrot.lane.b32.xlu1 %v4298_v44, %s4220_s23 }
 0x7ba   :  { %2356 = vrot.lane.b32.xlu1 %v4348_v21, %s4220_s23 }
 0x7be   :  { %2457 = vrot.lane.b32.xlu1 %v4318_v58, %s4220_s23 }
 0x7d7   :  { %v1933_v43 = vpop.xlane.xlu0 %1932 }
 0x7d8   :  { %v1979_v29 = vsub.f32 %v4997_v35, %v1933_v43 }
 0x7d9   :  { %v1936_v14 = vpop.xlane.xlu1 %1935 }
 0x7da   :  { %v1995_v7 = vmul.f32 1.442695, %v1979_v29  ;;  %v1980_v4 = vsub.f32 %v5003_v60, %v1936_v14 }
 0x7db   :  { %v1939_v32 = vpop.xlane.xlu0 %1938 }
 0x7dc   :  { %v1981_v24 = vsub.f32 %v5000_v37, %v1939_v32  ;;  %v1997_v21 = vmul.f32 1.442695, %v1980_v4 }
 0x7de   :  { %v1999_v57 = vmul.f32 1.442695, %v1981_v24 }
 0x7df   :  { %v1942_v51 = vpop.xlane.xlu0 %1941 }
 0x7e0   :  { %3988 = vpow2.f32 %v1999_v57  ;;  %v1982_v44 = vsub.f32 %v5010_v47, %v1942_v51 }
 0x7e1   :  { %3990 = vpow2.f32 %v1995_v7 }
 0x7e2   :  { %v2001_v48 = vmul.f32 1.442695, %v1982_v44 }
 0x7e4   :  { %3992 = vpow2.f32 %v2001_v48 }
 0x7e5   :  { %3994 = vpow2.f32 %v1997_v21 }
 0x7ea   :  { %v5108_v58 = vpop.eup %3988 }
 0x7eb   :  { %v2033_v35 = vsel %vm721_vm4, %v5108_v58, 0.0  ;;  %v5112_v43 = vpop.eup %3990 }
 0x7ec   :  { %2034 = vadd.xlane.f32.xlu0 %v2033_v35  ;;  %v2027_v60 = vsel %vm721_vm4, %v5112_v43, 0.0 }
 0x7ee   :  { %v5114_v37 = vpop.eup %3992 }
 0x7ef   :  { %v2036_v47 = vsel %vm721_vm4, %v5114_v37, 0.0  ;;  %v5120_v4 = vpop.eup %3994 }
 0x7f0   :  { %2028 = vadd.xlane.f32.xlu0 %v2027_v60  ;;  %2037 = vadd.xlane.f32.xlu1 %v2036_v47  ;;  %v2030_v48 = vsel %vm721_vm4, %v5120_v4, 0.0 }
 0x7f4   :  { %2031 = vadd.xlane.f32.xlu1 %v2030_v48 }
 0x814   :  { %v1945_v32 = vpop.xlane.xlu0 %1944 }
 0x815   :  { %v1983_v24 = vsub.f32 %v5029_v25, %v1945_v32 }
 0x816   :  { %v1948_v51 = vpop.xlane.xlu1 %1947 }
 0x817   :  { %v1984_v29 = vsub.f32 %v5035_v15, %v1948_v51  ;;  %v2003_v21 = vmul.f32 1.442695, %v1983_v24 }
 0x818   :  { %v1951_v14 = vpop.xlane.xlu0 %1950 }
 0x819   :  { %v2005_v7 = vmul.f32 1.442695, %v1984_v29  ;;  %v1985_v57 = vsub.f32 %v5032_v41, %v1951_v14 }
 0x81a   :  { %v1954_v44 = vpop.xlane.xlu1 %1953 }
 0x81b   :  { %3996 = vpow2.f32 %v2005_v7  ;;  %v2007_v35 = vmul.f32 1.442695, %v1985_v57  ;;  %v1986_v60 = vsub.f32 %v5044_v11, %v1954_v44  ;;  %v5132_v11 = vadd.f32 %v5064_v49, %v4409_v5 }
 0x81c   :  { %v2116_v47 = vpop.permute.xlu0 %2115  ;;  %v5144_v49 = vadd.f32 %v5066_v13, %v4439_v33  ;;  %v5158_v13 = vadd.f32 %v5072_v31, %v4457_v10  ;;  %v5170_v31 = vadd.f32 %v5074_v59, %v4471_v20 }
 0x81d   :  { %3998 = vpow2.f32 %v2007_v35  ;;  %3622 = vmatprep.subr.bf16.mxu0 %v2116_v47  ;;  %v2009_v62 = vmul.f32 1.442695, %v1986_v60  ;;  %v1964_v57 = vsel %vm721_vm4, %v5132_v11, -inf }
 0x81e   :  { %v2118_v48 = vpop.permute.xlu1 %2117  ;;  %3623 = vmatpush3.bf16.msra.mxu0 %v2116_v47  ;;  %4000 = vpow2.f32 %v2003_v21  ;;  %v1958_v60 = vsel %vm721_vm4, %v5144_v49, -inf  ;;  %v5164_v47 = vadd.f32 %v5060_v18, %v4403_v63  ;;  %v5176_v18 = vadd.f32 %v5062_v19, %v4406_v2 }
 0x81f   :  { %3624 = vmatprep.subr.bf16.mxu0 %v2118_v48  ;;  %4002 = vpow2.f32 %v2009_v62  ;;  %v1970_v59 = vsel %vm721_vm4, %v5170_v31, -inf }
 0x820   :  { %v2120_v25 = vpop.permute.xlu0 %2119  ;;  %v1955_v19 = vsel %vm721_vm4, %v5176_v18, -inf }
 0x822   :  { %v2122_v15 = vpop.permute.xlu1 %2121  ;;  %3625 = vmatpush3.bf16.msra.mxu0 %v2118_v48 }
 0x823   :  { %3626 = vmatprep.subr.bf16.mxu0 %v2120_v25 }
 0x824   :  { %v2205_v41 = vpop.permute.xlu0 %2204 }
 0x825   :  { %v5128_v32 = vpop.eup %3996  ;;  %3638 = vmatprep.subr.bf16.mxu1 %v2205_v41 }
 0x826   :  { %v2207_v51 = vpop.permute.xlu1 %2206  ;;  %3627 = vmatpush3.bf16.msra.mxu0 %v2120_v25  ;;  %3639 = vmatpush3.bf16.msra.mxu1 %v2205_v41  ;;  %v2042_v24 = vsel %vm721_vm4, %v5128_v32, 0.0  ;;  %v1976_v41 = vsel %vm721_vm4, %v5158_v13, -inf }
 0x827   :  { %v5136_v29 = vpop.eup %3998  ;;  %2043 = vadd.xlane.f32.xlu1 %v2042_v24  ;;  %3628 = vmatprep.subr.bf16.mxu0 %v2122_v15 }
 0x828   :  { %3640 = vmatprep.subr.bf16.mxu1 %v2207_v51  ;;  %v2045_v62 = vsel %vm721_vm4, %v5136_v29, 0.0  ;;  %v5140_v14 = vpop.eup %4000  ;;  %v2211_v48 = vpop.permute.xlu0 %2210 }
 0x829   :  { %2046 = vadd.xlane.f32.xlu0 %v2045_v62  ;;  %v2039_v44 = vsel %vm721_vm4, %v5140_v14, 0.0  ;;  %v5154_v21 = vpop.eup %4002  ;;  %v5188_v62 = vadd.f32 %v5068_v0, %v4454_v1 }
 0x82a   :  { %v5146_v7 = vpop.permute.xlu1 %2350  ;;  %3629 = vmatpush3.bf16.msra.mxu0 %v2122_v15  ;;  %3641 = vmatpush3.bf16.msra.mxu1 %v2207_v51  ;;  %v2048_v25 = vsel %vm721_vm4, %v5154_v21, 0.0  ;;  %v1961_v51 = vsel %vm721_vm4, %v5164_v47, -inf }
 0x82b   :  { %1965 = vmax.xlane.f32.xlu1 %v1964_v57  ;;  %3790 = vmatprep.subr.msk.bf16.mxu0 %vm542_vm0, %v5146_v7  ;;  %v5194_v57 = vadd.f32 %v5070_v23, %v4485_v26 }
 0x82d   :  { %2040 = vadd.xlane.f32.xlu0 %v2039_v44  ;;  %v1973_v44 = vsel %vm721_vm4, %v5188_v62, -inf }
 0x82e   :  { %v2209_v35 = vpop.permute.xlu1 %2208 }
 0x82f   :  { %1959 = vmax.xlane.f32.xlu1 %v1958_v60  ;;  %3642 = vmatprep.subr.bf16.mxu1 %v2209_v35  ;;  %v2355_v60 = vpop.permute.xlu0 %2354 }
 0x830   :  { %3643 = vmatpush3.bf16.msra.mxu1 %v2209_v35  ;;  %v1967_v35 = vsel %vm721_vm4, %v5194_v57, -inf }
 0x831   :  { %2049 = vadd.xlane.f32.xlu0 %v2048_v25  ;;  %3644 = vmatprep.subr.bf16.mxu1 %v2211_v48 }
 0x832   :  { %v2353_v15 = vpop.permute.xlu1 %2352 }
 0x833   :  { %1977 = vmax.xlane.f32.xlu1 %v1976_v41 }
 0x834   :  { %3645 = vmatpush3.bf16.msra.mxu1 %v2211_v48 }
 0x835   :  { %1962 = vmax.xlane.f32.xlu0 %v1961_v51 }
 0x836   :  { %v5180_v24 = vpop.permute.xlu1 %2455 }
 0x837   :  { %1971 = vmax.xlane.f32.xlu1 %v1970_v59  ;;  %3794 = vmatprep.subr.msk.bf16.mxu1 %vm542_vm0, %v5180_v24 }
 0x839   :  { %1956 = vmax.xlane.f32.xlu0 %v1955_v19 }
 0x83a   :  { %v2357_v0 = vpop.permute.xlu1 %2356 }
 0x83d   :  { %1974 = vmax.xlane.f32.xlu0 %v1973_v44 }
 0x83e   :  { %v5204_v48 = vpop.permute.xlu1 %2457 }
 0x841   :  { %1968 = vmax.xlane.f32.xlu0 %v1967_v35 }
 0x848   :  { %2344 = vrot.lane.b32.xlu1 %v4312_v53, %s4220_s23 }
 0x857   :  { %2342 = vrot.lane.b32.xlu0 %v4292_v39, %s4220_s23 }
 0x879   :  { %v2035_v23 = vpop.xlane.xlu0 %2034 }
 0x87d   :  { %v2038_v25 = vpop.xlane.xlu1 %2037  ;;  %v2029_v41 = vpop.xlane.xlu0 %2028 }
 0x87e   :  { %4004 = vrcp.f32 %v2038_v25 }
 0x87f   :  { %4006 = vrcp.f32 %v2029_v41 }
 0x880   :  { %4008 = vrcp.f32 %v2035_v23  ;;  %v2371_v23 = vsel %vm542_vm0, %v5146_v7, 0 }
 0x881   :  { %v2032_v51 = vpop.xlane.xlu1 %2031 }
 0x882   :  { %4010 = vrcp.f32 %v2032_v51 }
 0x888   :  { %v4005_v59 = vpop.eup %4004 }
 0x889   :  { %v4007_v19 = vpop.eup %4006  ;;  %v2094_v53 = vmul.f32 %v4005_v59, %v5114_v37  ;;  %v2374_v37 = vsel %vm542_vm0, %v2353_v15, 0 }
 0x88a   :  { %v4009_v44 = vpop.eup %4008  ;;  %v2091_v39 = vmul.f32 %v4007_v19, %v5112_v43  ;;  %v2377_v43 = vsel %vm542_vm0, %v2355_v60, 0 }
 0x88b   :  { %v2093_v55 = vmul.f32 %v4009_v44, %v5108_v58 }
 0x88c   :  { %v4011_v35 = vpop.eup %4010 }
 0x88d   :  { %v2092_v6 = vmul.f32 %v4011_v35, %v5120_v4  ;;  %v2108_v12 = vpack.c.bf16 %v2094_v53, %v2093_v55 }
 0x88f   :  { %v2107_v9 = vpack.c.bf16 %v2092_v6, %v2091_v39 }
 0x891   :  { %3630 = vmatprep.mubr.msk.bf16.mxu0 %vm721_vm4, %v2107_v9  ;;  %v2380_v9 = vsel %vm542_vm0, %v2357_v0, 0 }
 0x892   :  { %3631 = vmatmul.mubr.msk.bf16.vlgmr.msra.gmra.mrb[48].mxu0 %vm721_vm4, %v2108_v12 }
 0x893   :  { %3655 = vmatpush3.bf16.xpose.msra.mxu0 %v2371_v23 }
 0x894   :  { %3791 = vmatprep.subr.msk.bf16.mxu0 %vm542_vm0, %v2353_v15 }
 0x89b   :  { %3657 = vmatpush3.bf16.xpose.msra.mxu0 %v2374_v37 }
 0x89c   :  { %3792 = vmatprep.subr.msk.bf16.mxu0 %vm542_vm0, %v2355_v60 }
 0x8a3   :  { %3659 = vmatpush3.bf16.xpose.msra.mxu0 %v2377_v43 }
 0x8a4   :  { %3793 = vmatprep.subr.msk.bf16.mxu0 %vm542_vm0, %v2357_v0 }
 0x8ab   :  { %3661 = vmatpush3.bf16.xpose.msra.mxu0 %v2380_v9 }
 0x8b4   :  { %v2044_v6 = vpop.xlane.xlu1 %2043 }
 0x8b5   :  { %4012 = vrcp.f32 %v2044_v6 }
 0x8b6   :  { %v2047_v12 = vpop.xlane.xlu0 %2046 }
 0x8b8   :  { %v1966_v55 = vpop.xlane.xlu1 %1965 }
 0x8b9   :  { %v1990_v59 = vsub.f32 %v5132_v11, %v1966_v55 }
 0x8ba   :  { %v2041_v58 = vpop.xlane.xlu0 %2040 }
 0x8bb   :  { %4014 = vrcp.f32 %v2041_v58  ;;  %v2017_v43 = vmul.f32 1.442695, %v1990_v59 }
 0x8bc   :  { %v1960_v4 = vpop.xlane.xlu1 %1959  ;;  %4016 = vrcp.f32 %v2047_v12 }
 0x8bd   :  { %v1988_v7 = vsub.f32 %v5144_v49, %v1960_v4 }
 0x8be   :  { %v2050_v15 = vpop.xlane.xlu0 %2049 }
 0x8bf   :  { %v2013_v25 = vmul.f32 1.442695, %v1988_v7  ;;  %4018 = vrcp.f32 %v2050_v15  ;;  %v4013_v41 = vpop.eup %4012 }
 0x8c0   :  { %v2096_v53 = vmul.f32 %v4013_v41, %v5128_v32  ;;  %v1978_v9 = vpop.xlane.xlu1 %1977 }
 0x8c1   :  { %4020 = vpow2.f32 %v2013_v25 }
 0x8c2   :  { %v1963_v60 = vpop.xlane.xlu0 %1962 }
 0x8c3   :  { %v1989_v51 = vsub.f32 %v5164_v47, %v1963_v60 }
 0x8c4   :  { %v1972_v58 = vpop.xlane.xlu1 %1971 }
 0x8c5   :  { %v4015_v0 = vpop.eup %4014  ;;  %v2015_v19 = vmul.f32 1.442695, %v1989_v51 }
 0x8c6   :  { %v1957_v44 = vpop.xlane.xlu0 %1956  ;;  %v2095_v35 = vmul.f32 %v4015_v0, %v5140_v14  ;;  %v4017_v39 = vpop.eup %4016 }
 0x8c7   :  { %4022 = vpow2.f32 %v2015_v19  ;;  %v1987_v49 = vsub.f32 %v5176_v18, %v1957_v44  ;;  %v2097_v11 = vmul.f32 %v4017_v39, %v5136_v29  ;;  %v1994_v19 = vsub.f32 %v5158_v13, %v1978_v9 }
 0x8c8   :  { %v2109_v23 = vpack.c.bf16 %v2096_v53, %v2095_v35  ;;  %v2345_v15 = vpop.permute.xlu1 %2344  ;;  %v1992_v53 = vsub.f32 %v5170_v31, %v1972_v58 }
 0x8c9   :  { %v4019_v37 = vpop.eup %4018  ;;  %v2011_v6 = vmul.f32 1.442695, %v1987_v49  ;;  %v2025_v35 = vmul.f32 1.442695, %v1994_v19 }
 0x8ca   :  { %3634 = vmatprep.mubr.msk.bf16.mxu0 %vm721_vm4, %v2109_v23  ;;  %v1975_v47 = vpop.xlane.xlu0 %1974  ;;  %v2098_v12 = vmul.f32 %v4019_v37, %v5154_v21 }
 0x8cb   :  { %v5229_v55 = vpop.eup %4020  ;;  %4024 = vpow2.f32 %v2011_v6  ;;  %v1993_v51 = vsub.f32 %v5188_v62, %v1975_v47 }
 0x8cc   :  { %v2054_v32 = vsel %vm721_vm4, %v5229_v55, 0.0  ;;  %v2110_v14 = vpack.c.bf16 %v2098_v12, %v2097_v11  ;;  %4026 = vpow2.f32 %v2017_v43 }
 0x8cd   :  { %2055 = vadd.xlane.f32.xlu0 %v2054_v32  ;;  %v2023_v0 = vmul.f32 1.442695, %v1993_v51 }
 0x8ce   :  { %3635 = vmatmul.mubr.msk.bf16.gmra.mrb[52].mxu0 %vm721_vm4, %v2110_v14  ;;  %v1969_v18 = vpop.xlane.xlu0 %1968 }
 0x8cf   :  { %v1991_v59 = vsub.f32 %v5194_v57, %v1969_v18  ;;  %4028 = vpow2.f32 %v2023_v0 }
 0x8d1   :  { %v5234_v4 = vpop.eup %4022  ;;  %v2019_v44 = vmul.f32 1.442695, %v1991_v59 }
 0x8d2   :  { %v2343_v7 = vpop.permute.xlu0 %2342  ;;  %v2057_v29 = vsel %vm721_vm4, %v5234_v4, 0.0 }
 0x8d3   :  { %2058 = vadd.xlane.f32.xlu1 %v2057_v29  ;;  %3662 = vmatprep.mubr.msk.bf16.mxu0 %vm542_vm0, %v2343_v7  ;;  %4030 = vpow2.f32 %v2019_v44 }
 0x8d4   :  { %4032 = vpow2.f32 %v2025_v35 }
 0x8d5   :  { %v4025_v21 = vpop.eup %4024 }
 0x8d6   :  { %3663 = vmatmul.mubr.msk.bf16.vlgmr.msra.gmra.mrb[56].mxu0 %vm542_vm0, %v2345_v15  ;;  %v2051_v25 = vsel %vm721_vm4, %v4025_v21, 0.0  ;;  %v4027_v60 = vpop.eup %4026 }
 0x8d7   :  { %2052 = vadd.xlane.f32.xlu1 %v2051_v25  ;;  %v2060_v41 = vsel %vm721_vm4, %v4027_v60, 0.0 }
 0x8d9   :  { %v5250_v39 = vpop.eup %4028 }
 0x8da   :  { %v2069_v62 = vsel %vm721_vm4, %v5250_v39, 0.0 }
 0x8db   :  { %2061 = vadd.xlane.f32.xlu1 %v2060_v41  ;;  %v2476_v41 = vsel %vm542_vm0, %v5180_v24, 0 }
 0x8dd   :  { %v5254_v49 = vpop.eup %4030 }
 0x8de   :  { %v5258_v13 = vpop.eup %4032 }
 0x8df   :  { %v2072_v31 = vsel %vm721_vm4, %v5258_v13, 0.0 }
 0x8e3   :  { %2459 = vrot.lane.b32.xlu0 %v4334_v8, %s4220_s23  ;;  %v2021_v8 = vmul.f32 1.442695, %v1992_v53 }
 0x8e5   :  { %4034 = vpow2.f32 %v2021_v8 }
 0x8ec   :  { %2346 = vrot.lane.b32.xlu1 %v4328_v3, %s4220_s23  ;;  %v2063_v3 = vsel %vm721_vm4, %v5254_v49, 0.0 }
 0x8ef   :  { %v5262_v57 = vpop.eup %4034 }
 0x8f0   :  { %v2066_v23 = vsel %vm721_vm4, %v5262_v57, 0.0 }
 0x902   :  { %2070 = vadd.xlane.f32.xlu0 %v2069_v62 }
 0x906   :  { %2064 = vadd.xlane.f32.xlu0 %v2063_v3 }
 0x90a   :  { %2073 = vadd.xlane.f32.xlu0 %v2072_v31 }
 0x910   :  { %2067 = vadd.xlane.f32.xlu1 %v2066_v23 }
 0x920   :  { %2348 = vrot.lane.b32.xlu0 %v5651_v16, %s4220_s23 }
 0x921   :  { %2461 = vrot.lane.b32.xlu1 %v4350_v22, %s4220_s23 }
 0x924   :  { %2447 = vrot.lane.b32.xlu0 %v4294_v40, %s4220_s23 }
 0x925   :  { %2449 = vrot.lane.b32.xlu1 %v4314_v54, %s4220_s23 }
 0x928   :  { %2451 = vrot.lane.b32.xlu0 %v5652_v56, %s4220_s23 }
 0x929   :  { %2453 = vrot.lane.b32.xlu1 %v5653_v61, %s4220_s23 }
 0x95a   :  { %v2056_v37 = vpop.xlane.xlu0 %2055 }
 0x95b   :  { %4036 = vrcp.f32 %v2056_v37 }
 0x960   :  { %v2059_v43 = vpop.xlane.xlu1 %2058 }
 0x964   :  { %v2053_v9 = vpop.xlane.xlu1 %2052 }
 0x965   :  { %4038 = vrcp.f32 %v2053_v9  ;;  %v5278_v16 = vpop.f32.mrb[48].mxu0  ;;  %v4037_v11 = vpop.eup %4036 }
 0x966   :  { %v5280_v22 = vpop.f32.mrb[49].mxu0  ;;  %4040 = vrcp.f32 %v2059_v43  ;;  %v2100_v14 = vmul.f32 %v4037_v11, %v5229_v55  ;;  %v2479_v55 = vsel %vm542_vm0, %v5204_v48, 0 }
 0x967   :  { %v5282_v40 = vpop.f32.mrb[50].mxu0 }
 0x968   :  { %v5286_v6 = vpop.f32.mrb[51].mxu0  ;;  %v2062_v56 = vpop.xlane.xlu1 %2061 }
 0x969   :  { %4042 = vrcp.f32 %v2062_v56 }
 0x96c   :  { %v2347_v47 = vpop.permute.xlu1 %2346 }
 0x96d   :  { %3666 = vmatprep.mubr.msk.bf16.mxu0 %vm542_vm0, %v2347_v47 }
 0x96f   :  { %v4039_v12 = vpop.eup %4038 }
 0x970   :  { %v2099_v32 = vmul.f32 %v4039_v12, %v4025_v21  ;;  %v4041_v18 = vpop.eup %4040  ;;  %v2460_v21 = vpop.permute.xlu0 %2459 }
 0x971   :  { %v2101_v29 = vmul.f32 %v4041_v18, %v5234_v4  ;;  %v2482_v4 = vsel %vm542_vm0, %v2460_v21, 0 }
 0x972   :  { %v2111_v58 = vpack.c.bf16 %v2100_v14, %v2099_v32 }
 0x973   :  { %v4043_v7 = vpop.eup %4042 }
 0x974   :  { %v2102_v15 = vmul.f32 %v4043_v7, %v4027_v60  ;;  %3646 = vmatprep.mubr.msk.bf16.mxu1 %vm721_vm4, %v2111_v58 }
 0x976   :  { %v2112_v25 = vpack.c.bf16 %v2102_v15, %v2101_v29 }
 0x978   :  { %3647 = vmatmul.mubr.msk.bf16.vlgmr.msra.gmra.mrb[80].mxu1 %vm721_vm4, %v2112_v25 }
 0x979   :  { %3671 = vmatpush3.bf16.xpose.msra.mxu1 %v2476_v41 }
 0x97a   :  { %3795 = vmatprep.subr.msk.bf16.mxu1 %vm542_vm0, %v5204_v48 }
 0x981   :  { %3673 = vmatpush3.bf16.xpose.msra.mxu1 %v2479_v55 }
 0x982   :  { %3796 = vmatprep.subr.msk.bf16.mxu1 %vm542_vm0, %v2460_v21 }
 0x989   :  { %3675 = vmatpush3.bf16.xpose.msra.mxu1 %v2482_v4 }
 0x98f   :  { %v2071_v60 = vpop.xlane.xlu0 %2070 }
 0x993   :  { %v2065_v51 = vpop.xlane.xlu0 %2064 }
 0x997   :  { %v2074_v0 = vpop.xlane.xlu0 %2073 }
 0x998   :  { %4044 = vrcp.f32 %v2074_v0 }
 0x999   :  { %4046 = vrcp.f32 %v2065_v51 }
 0x99a   :  { %4048 = vrcp.f32 %v2071_v60 }
 0x99b   :  { %v2349_v59 = vpop.permute.xlu0 %2348 }
 0x99c   :  { %3667 = vmatmul.mubr.msk.bf16.gmra.mrb[60].mxu0 %vm542_vm0, %v2349_v59 }
 0x99d   :  { %v2068_v24 = vpop.xlane.xlu1 %2067 }
 0x99e   :  { %4050 = vrcp.f32 %v2068_v24 }
 0x9a1   :  { %v5304_v19 = vpop.f32.mrb[52].mxu0  ;;  %v2462_v48 = vpop.permute.xlu1 %2461 }
 0x9a2   :  { %v2485_v44 = vsel %vm542_vm0, %v2462_v48, 0  ;;  %v5307_v35 = vpop.f32.mrb[53].mxu0  ;;  %3797 = vmatprep.subr.msk.bf16.mxu1 %vm542_vm0, %v2462_v48  ;;  %v4045_v3 = vpop.eup %4044 }
 0x9a3   :  { %v5310_v53 = vpop.f32.mrb[54].mxu0  ;;  %3677 = vmatpush3.bf16.xpose.msra.mxu1 %v2485_v44  ;;  %v4047_v23 = vpop.eup %4046  ;;  %v2106_v9 = vmul.f32 %v4045_v3, %v5258_v13 }
 0x9a4   :  { %v5314_v62 = vpop.f32.mrb[55].mxu0  ;;  %v4049_v37 = vpop.eup %4048  ;;  %v2103_v47 = vmul.f32 %v4047_v23, %v5254_v49 }
 0x9a5   :  { %v2105_v32 = vmul.f32 %v4049_v37, %v5250_v39  ;;  %v2448_v49 = vpop.permute.xlu0 %2447  ;;  %v2450_v55 = vpop.permute.xlu1 %2449 }
 0x9a7   :  { %v2114_v29 = vpack.c.bf16 %v2106_v9, %v2105_v32 }
 0x9a8   :  { %v4051_v43 = vpop.eup %4050 }
 0x9a9   :  { %v3664_v56 = vpop.f32.mrb[56].mxu0  ;;  %v2104_v11 = vmul.f32 %v4051_v43, %v5262_v57  ;;  %v2452_v4 = vpop.permute.xlu0 %2451 }
 0x9aa   :  { %v2416_v12 = vpop.f32.mrb[57].mxu0  ;;  %v2425_v15 = vadd.f32 %v3664_v56, %v4403_v63  ;;  %v2454_v60 = vpop.permute.xlu1 %2453 }
 0x9ab   :  { %v2417_v14 = vadd.f32 %v2416_v12, %v4406_v2  ;;  %v3665_v18 = vpop.f32.mrb[58].mxu0  ;;  %v2113_v58 = vpack.c.bf16 %v2104_v11, %v2103_v47 }
 0x9ac   :  { %v2419_v7 = vpop.f32.mrb[59].mxu0  ;;  %v2428_v57 = vadd.f32 %v3665_v18, %v4409_v5  ;;  %v2558_v41 = vsel %vm721_vm4, %v2425_v15, -inf }
 0x9ad   :  { %v2420_v25 = vadd.f32 %v2419_v7, %v4439_v33  ;;  %3650 = vmatprep.mubr.msk.bf16.mxu1 %vm721_vm4, %v2113_v58  ;;  %v2552_v13 = vsel %vm721_vm4, %v2417_v14, -inf }
 0x9ae   :  { %2553 = vmax.xlane.f32.xlu0 %v2552_v13  ;;  %3651 = vmatmul.mubr.msk.bf16.gmra.mrb[84].mxu1 %vm721_vm4, %v2114_v29  ;;  %v2561_v21 = vsel %vm721_vm4, %v2428_v57, -inf }
 0x9af   :  { %3678 = vmatprep.mubr.msk.bf16.mxu1 %vm542_vm0, %v2448_v49  ;;  %v2555_v39 = vsel %vm721_vm4, %v2420_v25, -inf }
 0x9b0   :  { %2556 = vmax.xlane.f32.xlu1 %v2555_v39 }
 0x9b2   :  { %2559 = vmax.xlane.f32.xlu0 %v2558_v41 }
 0x9b6   :  { %2562 = vmax.xlane.f32.xlu0 %v2561_v21  ;;  %3679 = vmatmul.mubr.msk.bf16.vlgmr.msra.gmra.mrb[88].mxu1 %vm542_vm0, %v2450_v55 }
 0x9b7   :  { %3682 = vmatprep.mubr.msk.bf16.mxu1 %vm542_vm0, %v2452_v4 }
 0x9be   :  { %3683 = vmatmul.mubr.msk.bf16.gmra.mrb[92].mxu1 %vm542_vm0, %v2454_v60 }
 0xa3b   :  { %v2554_v3 = vpop.xlane.xlu0 %2553 }
 0xa3c   :  { %v2600_v47 = vsub.f32 %v2417_v14, %v2554_v3 }
 0xa3d   :  { %v2557_v56 = vpop.xlane.xlu1 %2556 }
 0xa3e   :  { %v2601_v12 = vsub.f32 %v2420_v25, %v2557_v56  ;;  %v2616_v18 = vmul.f32 1.442695, %v2600_v47 }
 0xa3f   :  { %v2560_v23 = vpop.xlane.xlu0 %2559 }
 0xa40   :  { %v2602_v43 = vsub.f32 %v2425_v15, %v2560_v23  ;;  %v2618_v7 = vmul.f32 1.442695, %v2601_v12 }
 0xa42   :  { %v2620_v11 = vmul.f32 1.442695, %v2602_v43 }
 0xa43   :  { %v2563_v37 = vpop.xlane.xlu0 %2562 }
 0xa44   :  { %v2603_v9 = vsub.f32 %v2428_v57, %v2563_v37  ;;  %4052 = vpow2.f32 %v2620_v11 }
 0xa46   :  { %v2622_v32 = vmul.f32 1.442695, %v2603_v9 }
 0xa48   :  { %4054 = vpow2.f32 %v2622_v32 }
 0xa49   :  { %4056 = vpow2.f32 %v2616_v18 }
 0xa4a   :  { %4058 = vpow2.f32 %v2618_v7 }
 0xa4b   :  { %v5336_v51 = vpop.f32.mrb[80].mxu1 }
 0xa4c   :  { %v5338_v0 = vpop.f32.mrb[81].mxu1 }
 0xa4d   :  { %v5340_v59 = vpop.f32.mrb[82].mxu1 }
 0xa4e   :  { %v5344_v48 = vpop.f32.mrb[83].mxu1  ;;  %v5358_v21 = vpop.eup %4052 }
 0xa4f   :  { %v2654_v3 = vsel %vm721_vm4, %v5358_v21, 0.0 }
 0xa52   :  { %v5361_v60 = vpop.eup %4054 }
 0xa53   :  { %v5365_v23 = vpop.eup %4056  ;;  %v2657_v37 = vsel %vm721_vm4, %v5361_v60, 0.0 }
 0xa54   :  { %v5369_v43 = vpop.eup %4058  ;;  %v2648_v9 = vsel %vm721_vm4, %v5365_v23, 0.0 }
 0xa55   :  { %v2651_v47 = vsel %vm721_vm4, %v5369_v43, 0.0 }
 0xa6f   :  { %v3668_v58 = vpop.f32.mrb[60].mxu0 }
 0xa70   :  { %v2432_v29 = vpop.f32.mrb[61].mxu0  ;;  %v5350_v41 = vadd.f32 %v3668_v58, %v4454_v1 }
 0xa71   :  { %v2433_v13 = vadd.f32 %v2432_v29, %v4485_v26  ;;  %v3669_v49 = vpop.f32.mrb[62].mxu0 }
 0xa72   :  { %v2435_v39 = vpop.f32.mrb[63].mxu0  ;;  %v2444_v25 = vadd.f32 %v3669_v49, %v4457_v10  ;;  %v2570_v55 = vsel %vm721_vm4, %v5350_v41, -inf }
 0xa73   :  { %v2436_v15 = vadd.f32 %v2435_v39, %v4471_v20  ;;  %v2564_v14 = vsel %vm721_vm4, %v2433_v13, -inf }
 0xa74   :  { %2565 = vmax.xlane.f32.xlu0 %v2564_v14  ;;  %v2573_v4 = vsel %vm721_vm4, %v2444_v25, -inf }
 0xa75   :  { %v2567_v57 = vsel %vm721_vm4, %v2436_v15, -inf }
 0xa76   :  { %2568 = vmax.xlane.f32.xlu1 %v2567_v57 }
 0xa78   :  { %2571 = vmax.xlane.f32.xlu0 %v2570_v55 }
 0xa7a   :  { %2574 = vmax.xlane.f32.xlu1 %v2573_v4 }
 0xa7c   :  { %2655 = vadd.xlane.f32.xlu0 %v2654_v3 }
 0xa7e   :  { %2658 = vadd.xlane.f32.xlu1 %v2657_v37 }
 0xa80   :  { %2649 = vadd.xlane.f32.xlu0 %v2648_v9 }
 0xa81   :  { %v5373_v56 = vpop.f32.mrb[84].mxu1 }
 0xa82   :  { %5666 = vst [vmem:[#allocation25_spill] sm:$0xff] %v5373_v56  ;;  %v5377_v11 = vpop.f32.mrb[85].mxu1  ;;  %2652 = vadd.xlane.f32.xlu1 %v2651_v47 }
 0xa83   :  { %5667 = vst [vmem:[#allocation26_spill] sm:$0xff] %v5377_v11  ;;  %v5379_v12 = vpop.f32.mrb[86].mxu1 }
 0xa84   :  { %v5383_v18 = vpop.f32.mrb[87].mxu1 }
 0xa85   :  { %5668 = vst [vmem:[#allocation27_spill] sm:$0xff] %v5383_v18 }
 0xa89   :  { %v3680_v7 = vpop.f32.mrb[88].mxu1 }
 0xa8a   :  { %v2521_v29 = vpop.f32.mrb[89].mxu1 }
 0xa8b   :  { %v3681_v49 = vpop.f32.mrb[90].mxu1 }
 0xa8c   :  { %v2524_v39 = vpop.f32.mrb[91].mxu1 }
 0xa91   :  { %v3684_v14 = vpop.f32.mrb[92].mxu1 }
 0xa92   :  { %v2537_v57 = vpop.f32.mrb[93].mxu1 }
 0xa93   :  { %v5387_v55 = vpop.f32.mrb[94].mxu1 }
 0xa94   :  { %v5389_v4 = vpop.f32.mrb[95].mxu1 }
 0xb01   :  { %v2566_v3 = vpop.xlane.xlu0 %2565 }
 0xb02   :  { %v2604_v37 = vsub.f32 %v2433_v13, %v2566_v3 }
 0xb03   :  { %v2569_v9 = vpop.xlane.xlu1 %2568 }
 0xb04   :  { %v2624_v47 = vmul.f32 1.442695, %v2604_v37  ;;  %v2605_v32 = vsub.f32 %v2436_v15, %v2569_v9  ;;  %v2530_v15 = vadd.f32 %v3680_v7, %v4403_v63  ;;  %v2546_v7 = vadd.f32 %v3684_v14, %v4454_v1 }
 0xb05   :  { %v2572_v44 = vpop.xlane.xlu0 %2571 }
 0xb06   :  { %4060 = vpow2.f32 %v2624_v47  ;;  %v2626_v24 = vmul.f32 1.442695, %v2605_v32  ;;  %v2606_v13 = vsub.f32 %v5350_v41, %v2572_v44  ;;  %v2522_v44 = vadd.f32 %v2521_v29, %v4406_v2 }
 0xb07   :  { %v2575_v31 = vpop.xlane.xlu1 %2574  ;;  %v2582_v41 = vsel %vm721_vm4, %v2530_v15, -inf  ;;  %v2594_v1 = vsel %vm721_vm4, %v2546_v7, -inf }
 0xb08   :  { %4062 = vpow2.f32 %v2626_v24  ;;  %v2607_v8 = vsub.f32 %v2444_v25, %v2575_v31  ;;  %v2525_v25 = vadd.f32 %v2524_v39, %v4439_v33  ;;  %v2576_v2 = vsel %vm721_vm4, %v2522_v44, -inf }
 0xb09   :  { %v2656_v58 = vpop.xlane.xlu0 %2655 }
 0xb0a   :  { %4064 = vrcp.f32 %v2656_v58  ;;  %v2630_v11 = vmul.f32 1.442695, %v2607_v8  ;;  %v2628_v8 = vmul.f32 1.442695, %v2606_v13  ;;  %v2579_v33 = vsel %vm721_vm4, %v2525_v25, -inf }
 0xb0b   :  { %v2659_v61 = vpop.xlane.xlu1 %2658 }
 0xb0c   :  { %4066 = vrcp.f32 %v2659_v61  ;;  %v2533_v61 = vadd.f32 %v3681_v49, %v4409_v5 }
 0xb0d   :  { %v2650_v54 = vpop.xlane.xlu0 %2649 }
 0xb0e   :  { %4068 = vrcp.f32 %v2650_v54 }
 0xb0f   :  { %v2653_v18 = vpop.xlane.xlu1 %2652 }
 0xb10   :  { %v5391_v56 = vpop.eup %4060  ;;  %4070 = vrcp.f32 %v2653_v18  ;;  %v2585_v18 = vsel %vm721_vm4, %v2533_v61, -inf }
 0xb11   :  { %v2660_v32 = vsel %vm721_vm4, %v5391_v56, 0.0  ;;  %4072 = vpow2.f32 %v2630_v11 }
 0xb12   :  { %v5397_v24 = vpop.eup %4062  ;;  %2661 = vadd.xlane.f32.xlu0 %v2660_v32  ;;  %4074 = vpow2.f32 %v2628_v8 }
 0xb13   :  { %v2663_v54 = vsel %vm721_vm4, %v5397_v24, 0.0 }
 0xb14   :  { %2664 = vadd.xlane.f32.xlu1 %v2663_v54  ;;  %v4065_v31 = vpop.eup %4064 }
 0xb15   :  { %v5407_v5 = vmul.f32 %v4065_v31, %v5358_v21 }
 0xb16   :  { %2583 = vmax.xlane.f32.xlu0 %v2582_v41  ;;  %v4067_v63 = vpop.eup %4066 }
 0xb17   :  { %v5410_v58 = vmul.f32 %v4067_v63, %v5361_v60  ;;  %v2538_v60 = vadd.f32 %v2537_v57, %v4485_v26  ;;  %v5441_v26 = vadd.f32 %v5387_v55, %v4457_v10  ;;  %v5445_v57 = vadd.f32 %v5389_v4, %v4471_v20 }
 0xb18   :  { %v4069_v11 = vpop.eup %4068  ;;  %2586 = vmax.xlane.f32.xlu1 %v2585_v18 }
 0xb19   :  { %v2729_v49 = vpack.c.bf16 %v5410_v58, %v5407_v5  ;;  %v2712_v39 = vmul.f32 %v4069_v11, %v5365_v23  ;;  %v2588_v9 = vsel %vm721_vm4, %v2538_v60, -inf }
 0xb1a   :  { %v4071_v29 = vpop.eup %4070  ;;  %2577 = vmax.xlane.f32.xlu0 %v2576_v2 }
 0xb1b   :  { %v2713_v21 = vmul.f32 %v4071_v29, %v5369_v43  ;;  %v5419_v3 = vpop.eup %4072 }
 0xb1c   :  { %2580 = vmax.xlane.f32.xlu1 %v2579_v33  ;;  %v2669_v37 = vsel %vm721_vm4, %v5419_v3, 0.0  ;;  %v5427_v23 = vpop.eup %4074 }
 0xb1d   :  { %v2728_v14 = vpack.c.bf16 %v2713_v21, %v2712_v39  ;;  %v2666_v43 = vsel %vm721_vm4, %v5427_v23, 0.0 }
 0xb1e   :  { %2595 = vmax.xlane.f32.xlu0 %v2594_v1 }
 0xb1f   :  { %3694 = vmatprep.mubr.msk.bf16.mxu0 %vm721_vm4, %v2728_v14 }
 0xb20   :  { %2670 = vadd.xlane.f32.xlu1 %v2669_v37 }
 0xb22   :  { %2589 = vmax.xlane.f32.xlu0 %v2588_v9 }
 0xb26   :  { %2667 = vadd.xlane.f32.xlu0 %v2666_v43 }
 0xb31   :  { %2738 = vrot.lane.b32.xlu1 %v4360_v28, %s4220_s23  ;;  %v2597_v28 = vsel %vm721_vm4, %v5441_v26, -inf }
 0xb3c   :  { %2736 = vrot.lane.b32.xlu0 %v4362_v30, %s4220_s23  ;;  %v2591_v30 = vsel %vm721_vm4, %v5445_v57, -inf }
 0xb40   :  { %2740 = vrot.lane.b32.xlu0 %v4377_v36, %s4220_s23 }
 0xb44   :  { %2742 = vrot.lane.b32.xlu0 %v4375_v34, %s4220_s23 }
 0xb55   :  { %2598 = vmax.xlane.f32.xlu1 %v2597_v28 }
 0xb59   :  { %2592 = vmax.xlane.f32.xlu1 %v2591_v30 }
 0xb6a   :  { %2825 = vrot.lane.b32.xlu1 %v4390_v46, %s4220_s23 }
 0xb6e   :  { %2827 = vrot.lane.b32.xlu1 %v4387_v42, %s4220_s23 }
 0xb9f   :  { %v2662_v34 = vpop.xlane.xlu0 %2661 }
 0xba1   :  { %v2665_v36 = vpop.xlane.xlu1 %2664 }
 0xba3   :  { %v2584_v10 = vpop.xlane.xlu0 %2583 }
 0xba4   :  { %v2610_v55 = vsub.f32 %v2530_v15, %v2584_v10 }
 0xba5   :  { %v2587_v20 = vpop.xlane.xlu1 %2586 }
 0xba6   :  { %v2636_v4 = vmul.f32 1.442695, %v2610_v55  ;;  %v2611_v47 = vsub.f32 %v2533_v61, %v2587_v20 }
 0xba7   :  { %v2578_v13 = vpop.xlane.xlu0 %2577 }
 0xba8   :  { %4076 = vpow2.f32 %v2636_v4  ;;  %v2608_v32 = vsub.f32 %v2522_v44, %v2578_v13  ;;  %v2638_v8 = vmul.f32 1.442695, %v2611_v47 }
 0xba9   :  { %v2581_v54 = vpop.xlane.xlu1 %2580 }
 0xbaa   :  { %v2632_v31 = vmul.f32 1.442695, %v2608_v32  ;;  %v2609_v41 = vsub.f32 %v2525_v25, %v2581_v54 }
 0xbab   :  { %v2596_v63 = vpop.xlane.xlu0 %2595 }
 0xbac   :  { %4078 = vpow2.f32 %v2632_v31  ;;  %v2614_v46 = vsub.f32 %v2546_v7, %v2596_v63  ;;  %v2634_v18 = vmul.f32 1.442695, %v2609_v41 }
 0xbad   :  { %4080 = vpow2.f32 %v2638_v8  ;;  %v2671_v29 = vpop.xlane.xlu1 %2670 }
 0xbae   :  { %v2644_v42 = vmul.f32 1.442695, %v2614_v46 }
 0xbaf   :  { %v2590_v11 = vpop.xlane.xlu0 %2589 }
 0xbb0   :  { %4082 = vpow2.f32 %v2644_v42  ;;  %v2612_v2 = vsub.f32 %v2538_v60, %v2590_v11  ;;  %v5670_v42 = vpack.c.bf16 %v4963_v17, %v4957_v27  ;;  %v5671_v11 = vpack.c.bf16 %v5282_v40, %v5278_v16  ;;  %v3855_v27 = vld [vmem:[#allocation8 + $0x18] sm:$0xff]   ;;  %v3856_v16 = vld [vmem:[#allocation8 + $0x20] sm:$0xff]  }
 0xbb1   :  { %4084 = vpow2.f32 %v2634_v18  ;;  %v2739_v60 = vpop.permute.xlu1 %2738 }
 0xbb2   :  { %v5455_v15 = vpop.eup %4076  ;;  %v2640_v61 = vmul.f32 1.442695, %v2612_v2  ;;  %v3853_v2 = vld [vmem:[#allocation8 + $0x8] sm:$0xff]  }
 0xbb3   :  { %v2668_v33 = vpop.xlane.xlu0 %2667  ;;  %v2678_v44 = vsel %vm721_vm4, %v5455_v15, 0.0 }
 0xbb4   :  { %4086 = vpow2.f32 %v2640_v61  ;;  %2679 = vadd.xlane.f32.xlu1 %v2678_v44  ;;  %v3857_v61 = vld [vmem:[#allocation8 + $0x28] sm:$0xff]  }
 0xbb5   :  { %4088 = vrcp.f32 %v2665_v36 }
 0xbb6   :  { %v5459_v25 = vpop.eup %4078  ;;  %4090 = vrcp.f32 %v2662_v34 }
 0xbb7   :  { %v2737_v7 = vpop.permute.xlu0 %2736  ;;  %v2672_v39 = vsel %vm721_vm4, %v5459_v25, 0.0  ;;  %v5463_v21 = vpop.eup %4080  ;;  %4092 = vrcp.f32 %v2668_v33 }
 0xbb8   :  { %2673 = vadd.xlane.f32.xlu1 %v2672_v39  ;;  %3686 = vmatprep.subr.bf16.mxu0 %v2737_v7  ;;  %v2681_v37 = vsel %vm721_vm4, %v5463_v21, 0.0  ;;  %4094 = vrcp.f32 %v2671_v29 }
 0xbb9   :  { %3687 = vmatpush3.bf16.msra.mxu0 %v2737_v7 }
 0xbba   :  { %v5465_v1 = vpop.eup %4082  ;;  %3688 = vmatprep.subr.bf16.mxu0 %v2739_v60 }
 0xbbb   :  { %v2741_v14 = vpop.permute.xlu0 %2740  ;;  %v2690_v9 = vsel %vm721_vm4, %v5465_v1, 0.0  ;;  %v5471_v43 = vpop.eup %4084 }
 0xbbc   :  { %2682 = vadd.xlane.f32.xlu1 %v2681_v37  ;;  %2691 = vadd.xlane.f32.xlu0 %v2690_v9  ;;  %v2675_v30 = vsel %vm721_vm4, %v5471_v43, 0.0 }
 0xbbd   :  { %3689 = vmatpush3.bf16.msra.mxu0 %v2739_v60 }
 0xbbe   :  { %v5473_v28 = vpop.eup %4086  ;;  %3690 = vmatprep.subr.bf16.mxu0 %v2741_v14 }
 0xbbf   :  { %v2684_v34 = vsel %vm721_vm4, %v5473_v28, 0.0  ;;  %v4089_v36 = vpop.eup %4088  ;;  %v2743_v10 = vpop.permute.xlu0 %2742 }
 0xbc0   :  { %2676 = vadd.xlane.f32.xlu1 %v2675_v30  ;;  %2685 = vadd.xlane.f32.xlu0 %v2684_v34  ;;  %v4091_v55 = vpop.eup %4090  ;;  %v2717_v20 = vmul.f32 %v4089_v36, %v5397_v24 }
 0xbc1   :  { %3691 = vmatpush3.bf16.msra.mxu0 %v2741_v14  ;;  %v2716_v4 = vmul.f32 %v4091_v55, %v5391_v56  ;;  %v4093_v47 = vpop.eup %4092 }
 0xbc2   :  { %3692 = vmatprep.subr.bf16.mxu0 %v2743_v10  ;;  %v4095_v32 = vpop.eup %4094  ;;  %v2718_v54 = vmul.f32 %v4093_v47, %v5427_v23 }
 0xbc3   :  { %v2730_v13 = vpack.c.bf16 %v2717_v20, %v2716_v4  ;;  %v2719_v8 = vmul.f32 %v4095_v32, %v5419_v3 }
 0xbc5   :  { %3693 = vmatpush3.bf16.msra.mxu0 %v2743_v10  ;;  %v2731_v31 = vpack.c.bf16 %v2719_v8, %v2718_v54 }
 0xbc8   :  { %3695 = vmatmul.mubr.msk.bf16.vlgmr.msra.gmra.mrb[64].mxu0 %vm721_vm4, %v2729_v49 }
 0xbc9   :  { %3698 = vmatprep.mubr.msk.bf16.mxu0 %vm721_vm4, %v2730_v13 }
 0xbd0   :  { %3699 = vmatmul.mubr.msk.bf16.gmra.mrb[68].mxu0 %vm721_vm4, %v2731_v31 }
 0xbe2   :  { %v2599_v24 = vpop.xlane.xlu1 %2598 }
 0xbe3   :  { %v2615_v56 = vsub.f32 %v5441_v26, %v2599_v24 }
 0xbe5   :  { %v2646_v41 = vmul.f32 1.442695, %v2615_v56 }
 0xbe6   :  { %v2593_v63 = vpop.xlane.xlu1 %2592 }
 0xbe7   :  { %4096 = vpow2.f32 %v2646_v41  ;;  %v2613_v5 = vsub.f32 %v5445_v57, %v2593_v63  ;;  %v5669_v57 = vpack.c.bf16 %v4959_v38, %v4955_v45  ;;  %v3854_v45 = vld [vmem:[#allocation8 + $0x10] sm:$0xff]  }
 0xbe8   :  { %v3858_v63 = vld [vmem:[#allocation8 + $0x30] sm:$0xff]  }
 0xbe9   :  { %v2642_v58 = vmul.f32 1.442695, %v2613_v5  ;;  %v3859_v5 = vld [vmem:[#allocation8 + $0x38] sm:$0xff]  }
 0xbea   :  { %v2826_v49 = vpop.permute.xlu1 %2825 }
 0xbeb   :  { %4098 = vpow2.f32 %v2642_v58  ;;  %3702 = vmatprep.subr.bf16.mxu1 %v2826_v49 }
 0xbec   :  { %3703 = vmatpush3.bf16.msra.mxu1 %v2826_v49 }
 0xbee   :  { %v2828_v46 = vpop.permute.xlu1 %2827 }
 0xbef   :  { %3704 = vmatprep.subr.bf16.mxu1 %v2828_v46 }
 0xbf0   :  { %3705 = vmatpush3.bf16.msra.mxu1 %v2828_v46 }
 0xbf1   :  { %v5491_v3 = vpop.eup %4096 }
 0xbf2   :  { %v2693_v23 = vsel %vm721_vm4, %v5491_v3, 0.0 }
 0xbf3   :  { %2694 = vadd.xlane.f32.xlu0 %v2693_v23 }
 0xbf5   :  { %v5495_v26 = vpop.eup %4098 }
 0xbf6   :  { %v2687_v18 = vsel %vm721_vm4, %v5495_v26, 0.0 }
 0xbf7   :  { %2688 = vadd.xlane.f32.xlu1 %v2687_v18  ;;  %v5674_v18 = vld [vmem:[#allocation14_spill] sm:$0xff] }
 0xc08   :  { %2831 = vrot.lane.b32.xlu1 %v4393_v50, %s4220_s23  ;;  %v5672_v50 = vpack.c.bf16 %v5286_v6, %v5280_v22 }
 0xc09   :  { %2829 = vrot.lane.b32.xlu0 %v4395_v52, %s4220_s23  ;;  %v3852_v52 = vld [vmem:[#allocation8] sm:$0xff]  }
 0xc0a   :  { %3718 = vmatprep.subr.bf16.mxu0 %v3852_v52 }
 0xc0b   :  { %3719 = vmatpush3.bf16.msra.mxu0 %v3852_v52 }
 0xc0c   :  { %1690 = vrot.lane.b32.xlu1 %v5669_v57, %s4220_s23  ;;  %3720 = vmatprep.subr.bf16.mxu0 %v3853_v2 }
 0xc0d   :  { %1688 = vrot.lane.b32.xlu0 %v5670_v42, %s4220_s23 }
 0xc0f   :  { %3721 = vmatpush3.bf16.msra.mxu0 %v3853_v2 }
 0xc10   :  { %2311 = vrot.lane.b32.xlu1 %v5671_v11, %s4214_s1  ;;  %3722 = vmatprep.subr.bf16.mxu0 %v3854_v45  ;;  %v5676_v11 = vld [vmem:[#allocation16_spill] sm:$0xff] }
 0xc11   :  { %2309 = vrot.lane.b32.xlu0 %v5672_v50, %s4214_s1  ;;  %v5677_v50 = vld [vmem:[#allocation13_spill] sm:$0xff] }
 0xc12   :  { %v5678_v52 = vpack.c.bf16 %v5676_v11, %v5677_v50 }
 0xc13   :  { %3723 = vmatpush3.bf16.msra.mxu0 %v3854_v45 }
 0xc14   :  { %3724 = vmatprep.subr.bf16.mxu0 %v3855_v27 }
 0xc17   :  { %3725 = vmatpush3.bf16.msra.mxu0 %v3855_v27 }
 0xc18   :  { %3726 = vmatprep.subr.bf16.mxu0 %v3856_v16 }
 0xc1b   :  { %3727 = vmatpush3.bf16.msra.mxu0 %v3856_v16  ;;  %v5680_v16 = vpack.c.bf16 %v5314_v62, %v5307_v35  ;;  %v5688_v35 = vpack.c.bf16 %v5344_v48, %v5338_v0  ;;  %v5690_v62 = vld [vmem:[#allocation21_spill] sm:$0xff] }
 0xc1c   :  { %3728 = vmatprep.subr.bf16.mxu0 %v3857_v61 }
 0xc1f   :  { %3729 = vmatpush3.bf16.msra.mxu0 %v3857_v61  ;;  %v5682_v61 = vld [vmem:[#allocation17_spill] sm:$0xff] }
 0xc20   :  { %3730 = vmatprep.subr.bf16.mxu0 %v3858_v63 }
 0xc23   :  { %3731 = vmatpush3.bf16.msra.mxu0 %v3858_v63 }
 0xc24   :  { %3732 = vmatprep.subr.bf16.mxu0 %v3859_v5 }
 0xc27   :  { %3733 = vmatpush3.bf16.msra.mxu0 %v3859_v5  ;;  %v5697_v5 = vld [vmem:[#allocation27_spill] sm:$0xff] }
 0xc41   :  { %v2680_v38 = vpop.xlane.xlu1 %2679 }
 0xc45   :  { %v2674_v17 = vpop.xlane.xlu1 %2673 }
 0xc46   :  { %4100 = vrcp.f32 %v2674_v17  ;;  %v5679_v17 = vpack.c.bf16 %v5310_v53, %v5304_v19  ;;  %v5687_v19 = vpack.c.bf16 %v5340_v59, %v5336_v51  ;;  %v5689_v53 = vld [vmem:[#allocation23_spill] sm:$0xff] }
 0xc49   :  { %v2683_v40 = vpop.xlane.xlu1 %2682  ;;  %v2692_v39 = vpop.xlane.xlu0 %2691 }
 0xc4d   :  { %v2677_v22 = vpop.xlane.xlu1 %2676  ;;  %v2686_v60 = vpop.xlane.xlu0 %2685 }
 0xc4e   :  { %4102 = vrcp.f32 %v2677_v22 }
 0xc4f   :  { %4104 = vrcp.f32 %v2683_v40  ;;  %v5681_v40 = vld [vmem:[#allocation19_spill] sm:$0xff] }
 0xc50   :  { %v4101_v6 = vpop.eup %4100  ;;  %4106 = vrcp.f32 %v2680_v38  ;;  %v5683_v22 = vpack.c.bf16 %v5681_v40, %v5682_v61 }
 0xc51   :  { %v2720_v33 = vmul.f32 %v4101_v6, %v5459_v25  ;;  %v5684_v6 = vld [vmem:[#allocation20_spill] sm:$0xff] }
 0xc58   :  { %v4103_v29 = vpop.eup %4102 }
 0xc59   :  { %v2721_v44 = vmul.f32 %v4103_v29, %v5471_v43  ;;  %v4105_v37 = vpop.eup %4104  ;;  %v5685_v29 = vld [vmem:[#allocation18_spill] sm:$0xff] }
 0xc5a   :  { %v4107_v34 = vpop.eup %4106  ;;  %v2723_v25 = vmul.f32 %v4105_v37, %v5463_v21 }
 0xc5b   :  { %v2732_v7 = vpack.c.bf16 %v2721_v44, %v2720_v33  ;;  %v2722_v10 = vmul.f32 %v4107_v34, %v5455_v15  ;;  %v5686_v33 = vpack.c.bf16 %v5684_v6, %v5685_v29  ;;  %v5691_v44 = vpack.c.bf16 %v5689_v53, %v5690_v62 }
 0xc5d   :  { %3710 = vmatprep.mubr.msk.bf16.mxu1 %vm721_vm4, %v2732_v7  ;;  %v2733_v55 = vpack.c.bf16 %v2723_v25, %v2722_v10  ;;  %v5692_v7 = vld [vmem:[#allocation24_spill] sm:$0xff] }
 0xc80   :  { %v2695_v14 = vpop.xlane.xlu0 %2694 }
 0xc81   :  { %4108 = vrcp.f32 %v2695_v14 }
 0xc82   :  { %4110 = vrcp.f32 %v2686_v60 }
 0xc83   :  { %4112 = vrcp.f32 %v2692_v39  ;;  %v5693_v39 = vld [vmem:[#allocation22_spill] sm:$0xff] }
 0xc84   :  { %v2689_v9 = vpop.xlane.xlu1 %2688  ;;  %v2830_v30 = vpop.permute.xlu0 %2829  ;;  %v5694_v60 = vpack.c.bf16 %v5692_v7, %v5693_v39 }
 0xc85   :  { %4114 = vrcp.f32 %v2689_v9  ;;  %3706 = vmatprep.subr.bf16.mxu1 %v2830_v30 }
 0xc86   :  { %3707 = vmatpush3.bf16.msra.mxu1 %v2830_v30 }
 0xc88   :  { %v2832_v43 = vpop.permute.xlu1 %2831  ;;  %v1689_v36 = vpop.permute.xlu0 %1688 }
 0xc89   :  { %1713 = vst.msk [vmem:[#allocation2] sm:$0xff] %vm1712_vm10, %v1689_v36  ;;  %3708 = vmatprep.subr.bf16.mxu1 %v2832_v43 }
 0xc8a   :  { %3709 = vmatpush3.bf16.msra.mxu1 %v2832_v43 }
 0xc8b   :  { %v4109_v20 = vpop.eup %4108 }
 0xc8c   :  { %v1691_v4 = vpop.permute.xlu1 %1690  ;;  %v2310_v47 = vpop.permute.xlu0 %2309  ;;  %v2727_v15 = vmul.f32 %v4109_v20, %v5491_v3 }
 0xc8d   :  { %v4111_v13 = vpop.eup %4110  ;;  %1714 = vst.msk [vmem:[#allocation2 + $0x8] sm:$0xff] %vm1712_vm10, %v1691_v4  ;;  %3711 = vmatmul.mubr.msk.bf16.vlgmr.msra.gmra.mrb[96].mxu1 %vm721_vm4, %v2733_v55 }
 0xc8e   :  { %2334 = vst.msk [vmem:[#allocation2] sm:$0xff] %vm2333_vm11, %v2310_v47  ;;  %v4113_v21 = vpop.eup %4112  ;;  %v2724_v8 = vmul.f32 %v4111_v13, %v5473_v28 }
 0xc8f   :  { %v4115_v32 = vpop.eup %4114  ;;  %v2726_v24 = vmul.f32 %v4113_v21, %v5465_v1 }
 0xc90   :  { %v2312_v54 = vpop.permute.xlu1 %2311  ;;  %v2725_v31 = vmul.f32 %v4115_v32, %v5495_v26  ;;  %v5673_v26 = vld [vmem:[#allocation15_spill] sm:$0xff] }
 0xc91   :  { %2335 = vst.msk [vmem:[#allocation2 + $0x8] sm:$0xff] %vm2333_vm11, %v2312_v54  ;;  %v2735_v41 = vpack.c.bf16 %v2727_v15, %v2726_v24  ;;  %v5675_v57 = vpack.c.bf16 %v5673_v26, %v5674_v18 }
 0xc92   :  { %v2734_v56 = vpack.c.bf16 %v2725_v31, %v2724_v8 }
 0xc94   :  { %3714 = vmatprep.mubr.msk.bf16.mxu1 %vm721_vm4, %v2734_v56  ;;  %v5695_v56 = vld [vmem:[#allocation25_spill] sm:$0xff] }
 0xc95   :  { %3715 = vmatmul.mubr.msk.bf16.gmra.mrb[100].mxu1 %vm721_vm4, %v2735_v41  ;;  %v5696_v41 = vpack.c.bf16 %v5379_v12, %v5695_v56 }
 0xc9b   :  { %v3696_v58 = vpop.f32.mrb[64].mxu0 }
 0xc9c   :  { %v2794_v28 = vpop.f32.mrb[65].mxu0 }
 0xc9d   :  { %v3697_v49 = vpop.f32.mrb[66].mxu0 }
 0xc9e   :  { %v2915_v46 = vpack.c.bf16 %v3697_v49, %v3696_v58  ;;  %v2797_v3 = vpop.f32.mrb[67].mxu0  ;;  %v5698_v58 = vld [vmem:[#allocation26_spill] sm:$0xff] }
 0xc9f   :  { %v2914_v23 = vpack.c.bf16 %v2797_v3, %v2794_v28  ;;  %v5699_v28 = vpack.c.bf16 %v5697_v5, %v5698_v58 }
 0xca0   :  { %2932 = vrot.lane.b32.xlu1 %v2915_v46, %s4219_s2 }
 0xca1   :  { %2930 = vrot.lane.b32.xlu0 %v2914_v23, %s4219_s2 }
 0xca3   :  { %v3700_v1 = vpop.f32.mrb[68].mxu0 }
 0xca4   :  { %1694 = vrot.lane.b32.xlu1 %v5675_v57, %s4220_s23  ;;  %v2810_v42 = vpop.f32.mrb[69].mxu0 }
 0xca5   :  { %1692 = vrot.lane.b32.xlu0 %v5678_v52, %s4220_s23  ;;  %v3701_v2 = vpop.f32.mrb[70].mxu0 }
 0xca6   :  { %v2917_v45 = vpack.c.bf16 %v3701_v2, %v3700_v1  ;;  %v2813_v38 = vpop.f32.mrb[71].mxu0 }
 0xca7   :  { %v2916_v27 = vpack.c.bf16 %v2813_v38, %v2810_v42 }
 0xca8   :  { %2315 = vrot.lane.b32.xlu1 %v5679_v17, %s4214_s1 }
 0xca9   :  { %2313 = vrot.lane.b32.xlu0 %v5680_v16, %s4214_s1 }
 0xcac   :  { %2936 = vrot.lane.b32.xlu1 %v2917_v45, %s4219_s2 }
 0xcad   :  { %2934 = vrot.lane.b32.xlu0 %v2916_v27, %s4219_s2 }
 0xcb0   :  { %1698 = vrot.lane.b32.xlu1 %v5683_v22, %s4220_s23 }
 0xcb1   :  { %1696 = vrot.lane.b32.xlu0 %v5686_v33, %s4220_s23 }
 0xcb4   :  { %2319 = vrot.lane.b32.xlu1 %v5687_v19, %s4214_s1 }
 0xcb5   :  { %2317 = vrot.lane.b32.xlu0 %v5688_v35, %s4214_s1 }
 0xcb8   :  { %1702 = vrot.lane.b32.xlu1 %v5691_v44, %s4220_s23 }
 0xcb9   :  { %1700 = vrot.lane.b32.xlu0 %v5694_v60, %s4220_s23 }
 0xd12   :  { %v2933_v14 = vpop.permute.xlu1 %2932 }
 0xd13   :  { %2956 = vst.msk [vmem:[#allocation2 + $0x8] sm:$0xff] %vm2954_vm12, %v2933_v14  ;;  %v2931_v51 = vpop.permute.xlu0 %2930 }
 0xd14   :  { %2955 = vst.msk [vmem:[#allocation2] sm:$0xff] %vm2954_vm12, %v2931_v51 }
 0xd16   :  { %v1695_v59 = vpop.permute.xlu1 %1694 }
 0xd17   :  { %1716 = vst.msk [vmem:[#allocation2 + $0x18] sm:$0xff] %vm1712_vm10, %v1695_v59  ;;  %v1693_v0 = vpop.permute.xlu0 %1692 }
 0xd18   :  { %1715 = vst.msk [vmem:[#allocation2 + $0x10] sm:$0xff] %vm1712_vm10, %v1693_v0 }
 0xd1a   :  { %v2316_v48 = vpop.permute.xlu1 %2315  ;;  %v2964_v30 = vld [vmem:[#allocation2 + $0x8] sm:$0xff] }
 0xd1b   :  { %2337 = vst.msk [vmem:[#allocation2 + $0x18] sm:$0xff] %vm2333_vm11, %v2316_v48  ;;  %v2314_v37 = vpop.permute.xlu0 %2313  ;;  %v2963_v9 = vld [vmem:[#allocation2] sm:$0xff] }
 0xd1c   :  { %2336 = vst.msk [vmem:[#allocation2 + $0x10] sm:$0xff] %vm2333_vm11, %v2314_v37  ;;  %3734 = vmatprep.mubr.bf16.mxu0 %v2963_v9 }
 0xd1d   :  { %3735 = vmatmul.mubr.bf16.vlgmr.msra.gmra.mrb[72].mxu0 %v2964_v30 }
 0xd1e   :  { %v2937_v34 = vpop.permute.xlu1 %2936 }
 0xd1f   :  { %2958 = vst.msk [vmem:[#allocation2 + $0x18] sm:$0xff] %vm2954_vm12, %v2937_v34  ;;  %v2935_v25 = vpop.permute.xlu0 %2934 }
 0xd20   :  { %2957 = vst.msk [vmem:[#allocation2 + $0x10] sm:$0xff] %vm2954_vm12, %v2935_v25 }
 0xd22   :  { %v1699_v43 = vpop.permute.xlu1 %1698 }
 0xd23   :  { %1718 = vst.msk [vmem:[#allocation2 + $0x28] sm:$0xff] %vm1712_vm10, %v1699_v43  ;;  %v1697_v36 = vpop.permute.xlu0 %1696 }
 0xd24   :  { %1717 = vst.msk [vmem:[#allocation2 + $0x20] sm:$0xff] %vm1712_vm10, %v1697_v36 }
 0xd26   :  { %v2320_v10 = vpop.permute.xlu1 %2319  ;;  %v2966_v4 = vld [vmem:[#allocation2 + $0x18] sm:$0xff] }
 0xd27   :  { %2339 = vst.msk [vmem:[#allocation2 + $0x28] sm:$0xff] %vm2333_vm11, %v2320_v10  ;;  %v2318_v55 = vpop.permute.xlu0 %2317  ;;  %v2965_v20 = vld [vmem:[#allocation2 + $0x10] sm:$0xff] }
 0xd28   :  { %2338 = vst.msk [vmem:[#allocation2 + $0x20] sm:$0xff] %vm2333_vm11, %v2318_v55  ;;  %3738 = vmatprep.mubr.bf16.mxu0 %v2965_v20 }
 0xd29   :  { %3739 = vmatmul.mubr.bf16.gmra.mrb[76].mxu0 %v2966_v4 }
 0xd2a   :  { %v1703_v47 = vpop.permute.xlu1 %1702 }
 0xd2b   :  { %1720 = vst.msk [vmem:[#allocation2 + $0x38] sm:$0xff] %vm1712_vm10, %v1703_v47  ;;  %v1701_v13 = vpop.permute.xlu0 %1700 }
 0xd2c   :  { %1719 = vst.msk [vmem:[#allocation2 + $0x30] sm:$0xff] %vm1712_vm10, %v1701_v13 }
 0xd60   :  { %v3712_v21 = vpop.f32.mrb[96].mxu1 }
 0xd61   :  { %v2883_v32 = vpop.f32.mrb[97].mxu1 }
 0xd62   :  { %v3713_v15 = vpop.f32.mrb[98].mxu1 }
 0xd63   :  { %v2919_v54 = vpack.c.bf16 %v3713_v15, %v3712_v21  ;;  %v2886_v8 = vpop.f32.mrb[99].mxu1 }
 0xd64   :  { %v2918_v31 = vpack.c.bf16 %v2886_v8, %v2883_v32 }
 0xd65   :  { %2940 = vrot.lane.b32.xlu1 %v2919_v54, %s4219_s2 }
 0xd66   :  { %2938 = vrot.lane.b32.xlu0 %v2918_v31, %s4219_s2 }
 0xd68   :  { %v3716_v24 = vpop.f32.mrb[100].mxu1 }
 0xd69   :  { %2323 = vrot.lane.b32.xlu1 %v5696_v41, %s4214_s1  ;;  %v2899_v63 = vpop.f32.mrb[101].mxu1 }
 0xd6a   :  { %2321 = vrot.lane.b32.xlu0 %v5699_v28, %s4214_s1  ;;  %v3717_v49 = vpop.f32.mrb[102].mxu1 }
 0xd6b   :  { %v2921_v46 = vpack.c.bf16 %v3717_v49, %v3716_v24  ;;  %v2902_v3 = vpop.f32.mrb[103].mxu1 }
 0xd6c   :  { %v2920_v23 = vpack.c.bf16 %v2902_v3, %v2899_v63 }
 0xd6d   :  { %2944 = vrot.lane.b32.xlu1 %v2921_v46, %s4219_s2 }
 0xd6e   :  { %2942 = vrot.lane.b32.xlu0 %v2920_v23, %s4219_s2 }
 0xdd7   :  { %v2941_v1 = vpop.permute.xlu1 %2940 }
 0xdd8   :  { %2960 = vst.msk [vmem:[#allocation2 + $0x28] sm:$0xff] %vm2954_vm12, %v2941_v1  ;;  %v2939_v26 = vpop.permute.xlu0 %2938 }
 0xdd9   :  { %2959 = vst.msk [vmem:[#allocation2 + $0x20] sm:$0xff] %vm2954_vm12, %v2939_v26 }
 0xddb   :  { %v2324_v12 = vpop.permute.xlu1 %2323 }
 0xddc   :  { %2341 = vst.msk [vmem:[#allocation2 + $0x38] sm:$0xff] %vm2333_vm11, %v2324_v12  ;;  %v2322_v18 = vpop.permute.xlu0 %2321 }
 0xddd   :  { %2340 = vst.msk [vmem:[#allocation2 + $0x30] sm:$0xff] %vm2333_vm11, %v2322_v18 }
 0xddf   :  { %v2945_v57 = vpop.permute.xlu1 %2944  ;;  %v2968_v50 = vld [vmem:[#allocation2 + $0x28] sm:$0xff] }
 0xde0   :  { %2962 = vst.msk [vmem:[#allocation2 + $0x38] sm:$0xff] %vm2954_vm12, %v2945_v57  ;;  %v2943_v42 = vpop.permute.xlu0 %2942  ;;  %v2967_v11 = vld [vmem:[#allocation2 + $0x20] sm:$0xff] }
 0xde1   :  { %2961 = vst.msk [vmem:[#allocation2 + $0x30] sm:$0xff] %vm2954_vm12, %v2943_v42  ;;  %3742 = vmatprep.mubr.bf16.mxu0 %v2967_v11 }
 0xde2   :  { %3743 = vmatmul.mubr.bf16.gmra.mrb[80].mxu0 %v2968_v50 }
 0xde7   :  { %v2970_v2 = vld [vmem:[#allocation2 + $0x38] sm:$0xff] }
 0xde8   :  { %v2969_v52 = vld [vmem:[#allocation2 + $0x30] sm:$0xff] }
 0xde9   :  { %3746 = vmatprep.mubr.bf16.mxu0 %v2969_v52 }
 0xdea   :  { %3747 = vmatmul.mubr.bf16.gmra.mrb[84].mxu0 %v2970_v2 }
 0xdf0   :  { %v3736_v45 = vpop.f32.mrb[72].mxu0 }
 0xdf1   :  { %3134 = vst [vmem:[#allocation9 + $0x10] sm:$0xff] %v3736_v45  ;;  %v3069_v38 = vpop.f32.mrb[73].mxu0 }
 0xdf2   :  { %3132 = vst [vmem:[#allocation9] sm:$0xff] %v3069_v38  ;;  %v3737_v27 = vpop.f32.mrb[74].mxu0 }
 0xdf3   :  { %3135 = vst [vmem:[#allocation9 + $0x18] sm:$0xff] %v3737_v27  ;;  %v3072_v17 = vpop.f32.mrb[75].mxu0 }
 0xdf4   :  { %3133 = vst [vmem:[#allocation9 + $0x8] sm:$0xff] %v3072_v17 }
 0xdfc   :  { %v3740_v16 = vpop.f32.mrb[76].mxu0 }
 0xdfd   :  { %3138 = vst [vmem:[#allocation9 + $0x30] sm:$0xff] %v3740_v16  ;;  %v3085_v40 = vpop.f32.mrb[77].mxu0 }
 0xdfe   :  { %3136 = vst [vmem:[#allocation9 + $0x20] sm:$0xff] %v3085_v40  ;;  %v3741_v61 = vpop.f32.mrb[78].mxu0 }
 0xdff   :  { %3139 = vst [vmem:[#allocation9 + $0x38] sm:$0xff] %v3741_v61  ;;  %v3088_v22 = vpop.f32.mrb[79].mxu0 }
 0xe00   :  { %3137 = vst [vmem:[#allocation9 + $0x28] sm:$0xff] %v3088_v22 }
 0xeb5   :  { %v3744_v6 = vpop.f32.mrb[80].mxu0 }
 0xeb6   :  { %3142 = vst [vmem:[#allocation9 + $0x50] sm:$0xff] %v3744_v6  ;;  %v3101_v29 = vpop.f32.mrb[81].mxu0 }
 0xeb7   :  { %3140 = vst [vmem:[#allocation9 + $0x40] sm:$0xff] %v3101_v29  ;;  %v3745_v33 = vpop.f32.mrb[82].mxu0 }
 0xeb8   :  { %3143 = vst [vmem:[#allocation9 + $0x58] sm:$0xff] %v3745_v33  ;;  %v3104_v19 = vpop.f32.mrb[83].mxu0 }
 0xeb9   :  { %3141 = vst [vmem:[#allocation9 + $0x48] sm:$0xff] %v3104_v19 }
 0xebd   :  { %v3748_v35 = vpop.f32.mrb[84].mxu0 }
 0xebe   :  { %3146 = vst [vmem:[#allocation9 + $0x70] sm:$0xff] %v3748_v35  ;;  %v3117_v53 = vpop.f32.mrb[85].mxu0 }
 0xebf   :  { %3144 = vst [vmem:[#allocation9 + $0x60] sm:$0xff] %v3117_v53  ;;  %v3749_v62 = vpop.f32.mrb[86].mxu0 }
 0xec0   :  { %3147 = vst [vmem:[#allocation9 + $0x78] sm:$0xff] %v3749_v62  ;;  %v3120_v44 = vpop.f32.mrb[87].mxu0 }
 0xec1   :  { %3145 = vst [vmem:[#allocation9 + $0x68] sm:$0xff] %v3120_v44 }
 0xec2   :  { %4193 = shalt.err (!%p4190_p0)
}
 0xec3   :  { %s4194_s29 = scalar_lea.hbm %s5626_s3, 2048 }
 0xec4   :  { %p4195_p1 = scmp.ne.s32.totalorder %s5626_s3, %s4194_s29  ;;  %p4198_p2 = scmp.lt.u32.totalorder %s4194_s29, %s5626_s3 }
 0xec6   :  { %p4200_p3 = pnand %p4198_p2, %p4195_p1 }
 0xec8   :  { %4203 = shalt.err (!%p4200_p3)
}
 0xec9   :  { %s4222_s7 = smov 128   ;;  %s4223_s8 = smov 8  }
 0xeca   :  { %3159 = dma.vmem_to_hbm [thread:$0]  %s3154_s25, 2048, %s5626_s3, [#allocation5], %s4222_s7, %s4222_s7, %s4223_s8  }
 0xecb   :  { %4208 = dma.done.wait [#allocation5], 2048  }
 0xecc   :  { %4209 = vsyncadd [#allocation5], 4294965248 }
 0xecd   :  { %3163 = vsyncpa [#allocation4], 1 }
 0xece   :  { %3164 = vsyncpa [#allocation7], 1 }
 0xecf   :  { %3165 = vsyncpa [#allocation5], 1 }

</bundles_post_ra>
